<compile_context>
chip_gen: v7x
topology: tpu7x:2x2x1
jax: 0.10.0
libtpu: 0.0.40
codegen_flags: <defaults>
</compile_context>

<pallas_src>
import numpy as np
import jax
import jax.numpy as jnp
from jax.experimental import pallas as pl
from jax.experimental.pallas import tpu as pltpu

# ---------------- synthetic "args" config ----------------
BS = 2              # text batch size
NUM_CHOICE = 2      # args.num_choice
B = BS * NUM_CHOICE
N_NODES = 16        # nodes per graph
BN = B * N_NODES    # folded batch*nodes = 64
HIDDEN = 32         # args.gnn_dim
HEADS = 4
TOKEN_DIM = 64      # args.token_dim
CONCEPT_NUM = 100
N_EDGES = 40        # random edges per graph
NEG_SLOPE = 0.2     # GATConv LeakyReLU slope

HB4 = HEADS * BN                 # 256  (heads packed along lanes)
HF4 = HEADS * HIDDEN             # 128
NCT = NUM_CHOICE * TOKEN_DIM     # 128  (lane-dense output width)


# ---------------- packed-buffer layouts (static, 8-row aligned) ----------------
def _make_layout(entries):
    layout, off = {}, 0
    for name, r, c in entries:
        layout[name] = (off, r, c)
        off += ((r + 7) // 8) * 8
    return layout, off


_W_WIDTH = 128
_W_LAYOUT, _W_ROWS = _make_layout([
    ("w0", HIDDEN, HF4), ("w1", HF4, HF4), ("w2", HF4, HIDDEN),
    ("a0", HF4, 2 * HEADS), ("a1", HF4, 2 * HEADS), ("a2", HIDDEN, 2),
    ("b0", 1, HF4), ("b1", 1, HF4), ("b2", 1, HIDDEN),
    ("pw1", HIDDEN, HIDDEN), ("pb1", 1, HIDDEN),
    ("pw2", HIDDEN, TOKEN_DIM), ("pb2", 1, TOKEN_DIM),
])

_C_WIDTH = 256
_C_LAYOUT, _C_ROWS = _make_layout([
    ("es4", 2 * HEADS, HB4), ("ed4", 2 * HEADS, HB4),
    ("es1", 2, BN), ("ed1", 2, BN),
    ("beye4", BN, HB4), ("eye1", BN, BN), ("ones_bn", BN, BN),
    ("blk4", HB4, HB4), ("hmask4", HB4, HF4),
    ("dup", TOKEN_DIM, NCT), ("cmask", B, NCT), ("s2", BS, B),
])

_D_WIDTH = 256
_D_LAYOUT, _D_ROWS = _make_layout([
    ("x0", BN, HIDDEN), ("neigh4", BN, HB4), ("adj1", BN, BN), ("smask", B, BN),
])


def _get(ref, layout, name):
    off, r, c = layout[name]
    return ref[off:off + r, 0:c]


def _gelu(x):
    # tanh-approx GELU (common gnn.GELU implementation)
    return 0.5 * x * (1.0 + jnp.tanh(0.7978845608028654 * (x + 0.044715 * x * x * x)))


# ---------------- single fused kernel ----------------
def _fused_mygnn_kernel(d_ref, w_ref, c_ref, o_ref):
    gd = lambda n: _get(d_ref, _D_LAYOUT, n)
    gw = lambda n: _get(w_ref, _W_LAYOUT, n)
    gcn = lambda n: _get(c_ref, _C_LAYOUT, n)

    ones_bn = gcn("ones_bn")                       # (BN, BN)

    def gat(x, w, a_cat, bias, es, ed, beye, neigh, blk, heads, hmask):
        # linear transform for all graphs / heads (MXU)
        h = jnp.dot(x, w, preferred_element_type=jnp.float32)            # (BN, heads*F)
        # per-head src/dst scores: cols [0:heads]=src, [heads:2h]=dst
        scores = jnp.dot(h, a_cat, preferred_element_type=jnp.float32)   # (BN, 2*heads)
        # lane-dense score layout: column c = hd*BN + j
        dst_b = jnp.dot(scores, ed, preferred_element_type=jnp.float32)      # s_dst[i,hd]
        src_pn = jnp.dot(scores, es, preferred_element_type=jnp.float32)     # s_src[i,hd] (all j)
        src_diag = src_pn * beye                                              # keep only j == row
        src_b = jnp.dot(ones_bn, src_diag, preferred_element_type=jnp.float32)  # s_src[j,hd] (all i)
        e = dst_b + src_b                            # e[i, hd*BN+j] = a_dst.h_i + a_src.h_j
        e = jnp.where(e > 0.0, e, NEG_SLOPE * e)     # LeakyReLU(0.2)
        e = jnp.where(neigh, e, -1e30)
        # shared per-row max (softmax shift-invariant; per-segment max unnecessary here)
        e = e - jnp.max(e, axis=-1, keepdims=True)
        p = jnp.where(neigh, jnp.exp(e), 0.0)
        # per-(row, head) softmax denominator via block matmul on the idle MXU
        denom = jnp.dot(p, blk, preferred_element_type=jnp.float32)
        alpha = p * pl.reciprocal(denom, approx=True)                    # EUP reciprocal
        # aggregation: one block-diagonal matmul -> concatenated heads
        if heads > 1:
            hbig = jnp.concatenate([h] * heads, axis=0) * hmask          # (heads*BN, heads*F)
        else:
            hbig = h
        out = jnp.dot(alpha, hbig, preferred_element_type=jnp.float32)   # (BN, heads*F)
        return out + bias

    def elu(v):
        return jnp.where(v > 0.0, v, jnp.exp(v) - 1.0)

    neigh4 = gd("neigh4") > 0.0                    # (BN, HEADS*BN)  adj tiled per head
    neigh1 = gd("adj1") > 0.0                      # (BN, BN)

    # ---- GAT stack (dropout is a no-op in eval mode) ----
    x = gd("x0")                                                          # (BN, HIDDEN)
    x = gat(x, gw("w0"), gw("a0"), gw("b0"), gcn("es4"), gcn("ed4"),
            gcn("beye4"), neigh4, gcn("blk4"), HEADS, gcn("hmask4"))
    x = elu(x)
    x = gat(x, gw("w1"), gw("a1"), gw("b1"), gcn("es4"), gcn("ed4"),
            gcn("beye4"), neigh4, gcn("blk4"), HEADS, gcn("hmask4"))
    x = elu(x)
    x = gat(x, gw("w2"), gw("a2"), gw("b2"), gcn("es1"), gcn("ed1"),
            gcn("eye1"), neigh1, ones_bn, 1, None)                        # (BN, HIDDEN)

    # ---- valid-node masked nonzero-mean pooling (mask folded into selector) ----
    sm = gd("smask")                                                      # (B, BN)  S * valid_mask
    nzx = (x != 0.0).astype(jnp.float32)
    psum = jnp.dot(sm, x, preferred_element_type=jnp.float32)             # (B, HIDDEN)
    pcnt = jnp.dot(sm, nzx, preferred_element_type=jnp.float32)           # (B, HIDDEN)
    v = psum * pl.reciprocal(pcnt + 1e-10, approx=True)

    # ---- projector: Linear -> GELU -> Linear ----
    h1 = jnp.dot(v, gw("pw1"), preferred_element_type=jnp.float32) + gw("pb1")
    h1 = _gelu(h1)
    out = jnp.dot(h1, gw("pw2"), preferred_element_type=jnp.float32) + gw("pb2")   # (B, T)

    # ---- pack to lane-dense (BS, NUM_CHOICE*TOKEN_DIM) with precomputed matrices ----
    big = jnp.dot(out, gcn("dup"), preferred_element_type=jnp.float32) * gcn("cmask")  # (B, NC*T)
    o_ref[...] = jnp.dot(gcn("s2"), big, preferred_element_type=jnp.float32)           # (BS, NC*T)


# ---------------- constant pack (built once with numpy) ----------------
def _make_cpack():
    es4 = np.zeros((2 * HEADS, HB4), np.float32)
    ed4 = np.zeros((2 * HEADS, HB4), np.float32)
    for h in range(HEADS):
        es4[h, h * BN:(h + 1) * BN] = 1.0
        ed4[HEADS + h, h * BN:(h + 1) * BN] = 1.0
    es1 = np.zeros((2, BN), np.float32); es1[0] = 1.0
    ed1 = np.zeros((2, BN), np.float32); ed1[1] = 1.0
    beye4 = np.tile(np.eye(BN, dtype=np.float32), (1, HEADS))
    eye1 = np.eye(BN, dtype=np.float32)
    ones_bn = np.ones((BN, BN), np.float32)
    blk4 = np.kron(np.eye(HEADS, dtype=np.float32), np.ones((BN, BN), np.float32))
    hmask4 = np.kron(np.eye(HEADS, dtype=np.float32), np.ones((BN, HIDDEN), np.float32))
    dup = np.tile(np.eye(TOKEN_DIM, dtype=np.float32), (1, NUM_CHOICE))
    cmask = np.zeros((B, NCT), np.float32)
    for g in range(B):
        c = g % NUM_CHOICE
        cmask[g, c * TOKEN_DIM:(c + 1) * TOKEN_DIM] = 1.0
    s2 = np.kron(np.eye(BS, dtype=np.float32), np.ones((1, NUM_CHOICE), np.float32))
    pieces = dict(es4=es4, ed4=ed4, es1=es1, ed1=ed1, beye4=beye4, eye1=eye1,
                  ones_bn=ones_bn, blk4=blk4, hmask4=hmask4, dup=dup,
                  cmask=cmask, s2=s2)
    buf = np.zeros((_C_ROWS, _C_WIDTH), np.float32)
    for name, arr in pieces.items():
        off, r, c = _C_LAYOUT[name]
        assert arr.shape == (r, c)
        buf[off:off + r, :c] = arr
    return jnp.asarray(buf)


_CPACK = _make_cpack()


# ---------------- parameter construction (deterministic) ----------------
def init_params(key):
    ks = jax.random.split(key, 16)
    params = {}
    params["emb_table"] = 0.02 * jax.random.normal(ks[0], (CONCEPT_NUM + 2, HIDDEN), jnp.float32)

    def glorot(k, shape):
        fan_in, fan_out = shape[0], shape[1]
        lim = (6.0 / (fan_in + fan_out)) ** 0.5
        return jax.random.uniform(k, shape, jnp.float32, -lim, lim)

    # GATConv(32 -> 32, heads=4, concat)
    params["gat0"] = dict(
        w=glorot(ks[1], (HIDDEN, HF4)),
        a_src=0.1 * jax.random.normal(ks[2], (HEADS, HIDDEN), jnp.float32),
        a_dst=0.1 * jax.random.normal(ks[3], (HEADS, HIDDEN), jnp.float32),
        bias=jnp.zeros((1, HF4), jnp.float32),
    )
    # GATConv(128 -> 32, heads=4, concat)
    params["gat1"] = dict(
        w=glorot(ks[4], (HF4, HF4)),
        a_src=0.1 * jax.random.normal(ks[5], (HEADS, HIDDEN), jnp.float32),
        a_dst=0.1 * jax.random.normal(ks[6], (HEADS, HIDDEN), jnp.float32),
        bias=jnp.zeros((1, HF4), jnp.float32),
    )
    # GATConv(128 -> 32, heads=1, concat=False)
    params["gat2"] = dict(
        w=glorot(ks[7], (HF4, HIDDEN)),
        a_src=0.1 * jax.random.normal(ks[8], (1, HIDDEN), jnp.float32),
        a_dst=0.1 * jax.random.normal(ks[9], (1, HIDDEN), jnp.float32),
        bias=jnp.zeros((1, HIDDEN), jnp.float32),
    )
    # projector: Linear(H,H) -> GELU -> Linear(H, token_dim)
    params["proj_w1"] = glorot(ks[10], (HIDDEN, HIDDEN))
    params["proj_b1"] = jnp.zeros((1, HIDDEN), jnp.float32)
    params["proj_w2"] = glorot(ks[11], (HIDDEN, TOKEN_DIM))
    params["proj_b2"] = jnp.zeros((1, TOKEN_DIM), jnp.float32)
    return params


def _block_att(a_src, a_dst):
    """Pack per-head attention vectors into (heads*f_out, 2*heads):
    h @ A gives [s_src_h0..s_src_h{H-1}, s_dst_h0..s_dst_h{H-1}] per row."""
    heads, f_out = a_src.shape
    A = jnp.zeros((heads * f_out, 2 * heads), jnp.float32)
    for hd in range(heads):
        A = A.at[hd * f_out:(hd + 1) * f_out, hd].set(a_src[hd])
        A = A.at[hd * f_out:(hd + 1) * f_out, heads + hd].set(a_dst[hd])
    return A


def _pack_params(params):
    a0 = _block_att(params["gat0"]["a_src"], params["gat0"]["a_dst"])
    a1 = _block_att(params["gat1"]["a_src"], params["gat1"]["a_dst"])
    a2 = _block_att(params["gat2"]["a_src"], params["gat2"]["a_dst"])
    pieces = dict(
        w0=params["gat0"]["w"], w1=params["gat1"]["w"], w2=params["gat2"]["w"],
        a0=a0, a1=a1, a2=a2,
        b0=params["gat0"]["bias"], b1=params["gat1"]["bias"], b2=params["gat2"]["bias"],
        pw1=params["proj_w1"], pb1=params["proj_b1"],
        pw2=params["proj_w2"], pb2=params["proj_b2"])
    buf = jnp.zeros((_W_ROWS, _W_WIDTH), jnp.float32)
    for name, arr in pieces.items():
        off, r, c = _W_LAYOUT[name]
        buf = buf.at[off:off + r, :c].set(arr.astype(jnp.float32))
    return buf


def _pack_data(x0, adj_bd, smask):
    neigh4 = jnp.tile(adj_bd, (1, HEADS))                   # (BN, HEADS*BN)
    pieces = dict(x0=x0, neigh4=neigh4, adj1=adj_bd, smask=smask)
    buf = jnp.zeros((_D_ROWS, _D_WIDTH), jnp.float32)
    for name, arr in pieces.items():
        off, r, c = _D_LAYOUT[name]
        buf = buf.at[off:off + r, :c].set(arr.astype(jnp.float32))
    return buf


# ---------------- full forward (light prep in JAX, everything else fused) ----------------
def my_gnn_forward(params, concept_ids, adj_dense, adj_lengths):
    # concept_ids: (BS, NUM_CHOICE, N) int32 ; adj_dense: (B, N, N) float32 ;
    # adj_lengths: (B,) int32
    ids = concept_ids.reshape(B, N_NODES)
    ids = jnp.where(ids == 0, CONCEPT_NUM + 2, ids)           # concept_ids[concept_ids==0] = concept_num+2
    gnn_input = params["emb_table"][ids - 1]                   # concept_emb(concept_ids - 1)
    gnn_input = gnn_input.at[:, 0].set(0.0)                    # gnn_input[:, 0] = 0
    x0 = gnn_input.reshape(BN, HIDDEN)

    # block-diagonal adjacency over the folded batch
    eyeb = jnp.eye(B, dtype=jnp.float32)
    adj_bd = (eyeb[:, None, :, None] * adj_dense[:, :, None, :]).reshape(BN, BN)

    # per-graph selector with the valid-node mask folded in: sm[g,i] = [i in graph g] * valid[i]
    node_mask = jnp.arange(N_NODES)[None, :] >= adj_lengths[:, None]     # (B, N)
    vm = (~node_mask).astype(jnp.float32).reshape(1, BN)
    S = jnp.asarray(np.kron(np.eye(B, dtype=np.float32),
                            np.ones((1, N_NODES), np.float32)))          # (B, BN)
    smask = S * vm

    dpack = _pack_data(x0, adj_bd, smask)
    wpack = _pack_params(params)

    vspec = lambda: pl.BlockSpec(memory_space=pltpu.MemorySpace.VMEM)
    out = pl.pallas_call(
        _fused_mygnn_kernel,
        out_shape=jax.ShapeDtypeStruct((BS, NCT), jnp.float32),
        in_specs=[vspec(), vspec(), vspec()],
        out_specs=vspec(),
    )(dpack, wpack, _CPACK)

    graph_vecs = out.reshape(BS, NUM_CHOICE, TOKEN_DIM)
    link_loss = 0.0
    moe_loss = 0.0
    return graph_vecs, link_loss, moe_loss


def build_inputs(key):
    k1, k2, k3, k4 = jax.random.split(key, 4)
    concept_ids = jax.random.randint(k1, (BS, NUM_CHOICE, N_NODES), 0, CONCEPT_NUM, jnp.int32)
    # random directed edges per graph + self loops -> dense adjacency [B, tgt, src]
    src = jax.random.randint(k2, (B, N_EDGES), 0, N_NODES, jnp.int32)
    dst = jax.random.randint(k3, (B, N_EDGES), 0, N_NODES, jnp.int32)
    b_idx = jnp.repeat(jnp.arange(B), N_EDGES)
    adj = jnp.zeros((B, N_NODES, N_NODES), jnp.float32)
    adj = adj.at[b_idx, dst.reshape(-1), src.reshape(-1)].set(1.0)
    adj = jnp.maximum(adj, jnp.eye(N_NODES, dtype=jnp.float32)[None])
    adj_lengths = jax.random.randint(k4, (B,), 4, N_NODES + 1, jnp.int32)
    return concept_ids, adj, adj_lengths


if __name__ == "__main__":
    key = jax.random.PRNGKey(0)
    pkey, ikey = jax.random.split(key)
    params = init_params(pkey)
    concept_ids, adj_dense, adj_lengths = build_inputs(ikey)

    graph_vecs, link_loss, moe_loss = jax.jit(my_gnn_forward)(
        params, concept_ids, adj_dense, adj_lengths)
    graph_vecs = jax.block_until_ready(graph_vecs)

    assert graph_vecs.shape == (BS, NUM_CHOICE, TOKEN_DIM)
    assert bool(jnp.all(jnp.isfinite(graph_vecs)))
    print("KERNEL_OK")
</pallas_src>

<mosaic_0001>
module attributes {stable_mosaic.version = 11 : i64} {
  func.func @_fused_mygnn_kernel(%arg0: memref<200x256xf32, #tpu.memory_space<vmem>>, %arg1: memref<680x128xf32, #tpu.memory_space<vmem>>, %arg2: memref<816x256xf32, #tpu.memory_space<vmem>>, %arg3: memref<2x128xf32, #tpu.memory_space<vmem>>) attributes {dimension_semantics = [], scalar_prefetch = 0 : i64, scratch_operands = 0 : i64, tpu.core_type = #tpu.core_type<tc>} {
    %c160 = arith.constant 160 : index
    %c0 = arith.constant 0 : index
    %0 = vector.load %arg2[%c160, %c0] : memref<816x256xf32, #tpu.memory_space<vmem>>, vector<64x64xf32>
    %c64 = arith.constant 64 : index
    %c0_0 = arith.constant 0 : index
    %1 = vector.load %arg0[%c64, %c0_0] : memref<200x256xf32, #tpu.memory_space<vmem>>, vector<64x256xf32>
    %cst = arith.constant 0.000000e+00 : f32
    %2 = vector.broadcast %cst : f32 to vector<64x256xf32>
    %3 = arith.cmpf ogt, %1, %2 : vector<64x256xf32>
    %c128 = arith.constant 128 : index
    %c0_1 = arith.constant 0 : index
    %4 = vector.load %arg0[%c128, %c0_1] : memref<200x256xf32, #tpu.memory_space<vmem>>, vector<64x64xf32>
    %cst_2 = arith.constant 0.000000e+00 : f32
    %5 = vector.broadcast %cst_2 : f32 to vector<64x64xf32>
    %6 = arith.cmpf ogt, %4, %5 : vector<64x64xf32>
    %c0_3 = arith.constant 0 : index
    %c0_4 = arith.constant 0 : index
    %7 = vector.load %arg0[%c0_3, %c0_4] : memref<200x256xf32, #tpu.memory_space<vmem>>, vector<64x32xf32>
    %c0_5 = arith.constant 0 : index
    %c0_6 = arith.constant 0 : index
    %8 = vector.load %arg1[%c0_5, %c0_6] : memref<680x128xf32, #tpu.memory_space<vmem>>, vector<32x128xf32>
    %c288 = arith.constant 288 : index
    %c0_7 = arith.constant 0 : index
    %9 = vector.load %arg1[%c288, %c0_7] : memref<680x128xf32, #tpu.memory_space<vmem>>, vector<128x8xf32>
    %c576 = arith.constant 576 : index
    %c0_8 = arith.constant 0 : index
    %10 = vector.load %arg1[%c576, %c0_8] : memref<680x128xf32, #tpu.memory_space<vmem>>, vector<1x128xf32>
    %c0_9 = arith.constant 0 : index
    %c0_10 = arith.constant 0 : index
    %11 = vector.load %arg2[%c0_9, %c0_10] : memref<816x256xf32, #tpu.memory_space<vmem>>, vector<8x256xf32>
    %c8 = arith.constant 8 : index
    %c0_11 = arith.constant 0 : index
    %12 = vector.load %arg2[%c8, %c0_11] : memref<816x256xf32, #tpu.memory_space<vmem>>, vector<8x256xf32>
    %c32 = arith.constant 32 : index
    %c0_12 = arith.constant 0 : index
    %13 = vector.load %arg2[%c32, %c0_12] : memref<816x256xf32, #tpu.memory_space<vmem>>, vector<64x256xf32>
    %c224 = arith.constant 224 : index
    %c0_13 = arith.constant 0 : index
    %14 = vector.load %arg2[%c224, %c0_13] : memref<816x256xf32, #tpu.memory_space<vmem>>, vector<256x256xf32>
    %c480 = arith.constant 480 : index
    %c0_14 = arith.constant 0 : index
    %15 = vector.load %arg2[%c480, %c0_14] : memref<816x256xf32, #tpu.memory_space<vmem>>, vector<256x128xf32>
    %cst_15 = arith.constant dense<0.000000e+00> : vector<64x128xf32>
    %16 = tpu.matmul %7, %8, %cst_15 {dimension_numbers = #tpu.dot_dimension_numbers<[1], [0], [0], [1], [0, 0, 1, 1], [], []>} : vector<64x32xf32>, vector<32x128xf32>, vector<64x128xf32> -> vector<64x128xf32>
    %cst_16 = arith.constant dense<0.000000e+00> : vector<64x8xf32>
    %17 = tpu.matmul %16, %9, %cst_16 {dimension_numbers = #tpu.dot_dimension_numbers<[1], [0], [0], [1], [0, 0, 1, 1], [], []>} : vector<64x128xf32>, vector<128x8xf32>, vector<64x8xf32> -> vector<64x8xf32>
    %cst_17 = arith.constant dense<0.000000e+00> : vector<64x256xf32>
    %18 = tpu.matmul %17, %12, %cst_17 {dimension_numbers = #tpu.dot_dimension_numbers<[1], [0], [0], [1], [0, 0, 1, 1], [], []>} : vector<64x8xf32>, vector<8x256xf32>, vector<64x256xf32> -> vector<64x256xf32>
    %cst_18 = arith.constant dense<0.000000e+00> : vector<64x256xf32>
    %19 = tpu.matmul %17, %11, %cst_18 {dimension_numbers = #tpu.dot_dimension_numbers<[1], [0], [0], [1], [0, 0, 1, 1], [], []>} : vector<64x8xf32>, vector<8x256xf32>, vector<64x256xf32> -> vector<64x256xf32>
    %20 = arith.mulf %19, %13 : vector<64x256xf32>
    %cst_19 = arith.constant dense<0.000000e+00> : vector<64x256xf32>
    %21 = tpu.matmul %0, %20, %cst_19 {dimension_numbers = #tpu.dot_dimension_numbers<[1], [0], [0], [1], [0, 0, 1, 1], [], []>} : vector<64x64xf32>, vector<64x256xf32>, vector<64x256xf32> -> vector<64x256xf32>
    %22 = arith.addf %18, %21 : vector<64x256xf32>
    %cst_20 = arith.constant 0.000000e+00 : f32
    %23 = vector.broadcast %cst_20 : f32 to vector<64x256xf32>
    %24 = arith.cmpf ogt, %22, %23 : vector<64x256xf32>
    %cst_21 = arith.constant 2.000000e-01 : f32
    %25 = vector.broadcast %cst_21 : f32 to vector<64x256xf32>
    %26 = arith.mulf %25, %22 : vector<64x256xf32>
    %27 = arith.select %24, %22, %26 : vector<64x256xi1>, vector<64x256xf32>
    %cst_22 = arith.constant -1.000000e+30 : f32
    %28 = vector.broadcast %cst_22 : f32 to vector<64x256xf32>
    %29 = arith.select %3, %27, %28 : vector<64x256xi1>, vector<64x256xf32>
    %cst_23 = arith.constant dense<0xFF800000> : vector<64xf32>
    %30 = vector.multi_reduction <maximumf>, %29, %cst_23 [1] : vector<64x256xf32> to vector<64xf32>
    %31 = vector.shape_cast %30 : vector<64xf32> to vector<64x1xf32>
    %32 = vector.broadcast %31 : vector<64x1xf32> to vector<64x256xf32>
    %33 = arith.subf %29, %32 : vector<64x256xf32>
    %34 = math.exp %33 : vector<64x256xf32>
    %cst_24 = arith.constant 0.000000e+00 : f32
    %35 = vector.broadcast %cst_24 : f32 to vector<64x256xf32>
    %36 = arith.select %3, %34, %35 : vector<64x256xi1>, vector<64x256xf32>
    %cst_25 = arith.constant dense<0.000000e+00> : vector<64x256xf32>
    %37 = tpu.matmul %36, %14, %cst_25 {dimension_numbers = #tpu.dot_dimension_numbers<[1], [0], [0], [1], [0, 0, 1, 1], [], []>} : vector<64x256xf32>, vector<256x256xf32>, vector<64x256xf32> -> vector<64x256xf32>
    %38 = tpu.reciprocal %37 {approx = true} : vector<64x256xf32> -> vector<64x256xf32>
    %39 = arith.mulf %36, %38 : vector<64x256xf32>
    %40 = tpu.concatenate %16, %16, %16, %16 in 0 : vector<64x128xf32>, vector<64x128xf32>, vector<64x128xf32>, vector<64x128xf32> -> vector<256x128xf32>
    %41 = arith.mulf %40, %15 : vector<256x128xf32>
    %cst_26 = arith.constant dense<0.000000e+00> : vector<64x128xf32>
    %42 = tpu.matmul %39, %41, %cst_26 {dimension_numbers = #tpu.dot_dimension_numbers<[1], [0], [0], [1], [0, 0, 1, 1], [], []>} : vector<64x256xf32>, vector<256x128xf32>, vector<64x128xf32> -> vector<64x128xf32>
    %43 = vector.broadcast %10 : vector<1x128xf32> to vector<64x128xf32>
    %44 = arith.addf %42, %43 : vector<64x128xf32>
    %cst_27 = arith.constant 0.000000e+00 : f32
    %45 = vector.broadcast %cst_27 : f32 to vector<64x128xf32>
    %46 = arith.cmpf ogt, %44, %45 : vector<64x128xf32>
    %47 = math.exp %44 : vector<64x128xf32>
    %cst_28 = arith.constant 1.000000e+00 : f32
    %48 = vector.broadcast %cst_28 : f32 to vector<64x128xf32>
    %49 = arith.subf %47, %48 : vector<64x128xf32>
    %50 = arith.select %46, %44, %49 : vector<64x128xi1>, vector<64x128xf32>
    %c32_29 = arith.constant 32 : index
    %c0_30 = arith.constant 0 : index
    %51 = vector.load %arg1[%c32_29, %c0_30] : memref<680x128xf32, #tpu.memory_space<vmem>>, vector<128x128xf32>
    %c416 = arith.constant 416 : index
    %c0_31 = arith.constant 0 : index
    %52 = vector.load %arg1[%c416, %c0_31] : memref<680x128xf32, #tpu.memory_space<vmem>>, vector<128x8xf32>
    %c584 = arith.constant 584 : index
    %c0_32 = arith.constant 0 : index
    %53 = vector.load %arg1[%c584, %c0_32] : memref<680x128xf32, #tpu.memory_space<vmem>>, vector<1x128xf32>
    %c0_33 = arith.constant 0 : index
    %c0_34 = arith.constant 0 : index
    %54 = vector.load %arg2[%c0_33, %c0_34] : memref<816x256xf32, #tpu.memory_space<vmem>>, vector<8x256xf32>
    %c8_35 = arith.constant 8 : index
    %c0_36 = arith.constant 0 : index
    %55 = vector.load %arg2[%c8_35, %c0_36] : memref<816x256xf32, #tpu.memory_space<vmem>>, vector<8x256xf32>
    %c32_37 = arith.constant 32 : index
    %c0_38 = arith.constant 0 : index
    %56 = vector.load %arg2[%c32_37, %c0_38] : memref<816x256xf32, #tpu.memory_space<vmem>>, vector<64x256xf32>
    %c224_39 = arith.constant 224 : index
    %c0_40 = arith.constant 0 : index
    %57 = vector.load %arg2[%c224_39, %c0_40] : memref<816x256xf32, #tpu.memory_space<vmem>>, vector<256x256xf32>
    %c480_41 = arith.constant 480 : index
    %c0_42 = arith.constant 0 : index
    %58 = vector.load %arg2[%c480_41, %c0_42] : memref<816x256xf32, #tpu.memory_space<vmem>>, vector<256x128xf32>
    %cst_43 = arith.constant dense<0.000000e+00> : vector<64x128xf32>
    %59 = tpu.matmul %50, %51, %cst_43 {dimension_numbers = #tpu.dot_dimension_numbers<[1], [0], [0], [1], [0, 0, 1, 1], [], []>} : vector<64x128xf32>, vector<128x128xf32>, vector<64x128xf32> -> vector<64x128xf32>
    %cst_44 = arith.constant dense<0.000000e+00> : vector<64x8xf32>
    %60 = tpu.matmul %59, %52, %cst_44 {dimension_numbers = #tpu.dot_dimension_numbers<[1], [0], [0], [1], [0, 0, 1, 1], [], []>} : vector<64x128xf32>, vector<128x8xf32>, vector<64x8xf32> -> vector<64x8xf32>
    %cst_45 = arith.constant dense<0.000000e+00> : vector<64x256xf32>
    %61 = tpu.matmul %60, %55, %cst_45 {dimension_numbers = #tpu.dot_dimension_numbers<[1], [0], [0], [1], [0, 0, 1, 1], [], []>} : vector<64x8xf32>, vector<8x256xf32>, vector<64x256xf32> -> vector<64x256xf32>
    %cst_46 = arith.constant dense<0.000000e+00> : vector<64x256xf32>
    %62 = tpu.matmul %60, %54, %cst_46 {dimension_numbers = #tpu.dot_dimension_numbers<[1], [0], [0], [1], [0, 0, 1, 1], [], []>} : vector<64x8xf32>, vector<8x256xf32>, vector<64x256xf32> -> vector<64x256xf32>
    %63 = arith.mulf %62, %56 : vector<64x256xf32>
    %cst_47 = arith.constant dense<0.000000e+00> : vector<64x256xf32>
    %64 = tpu.matmul %0, %63, %cst_47 {dimension_numbers = #tpu.dot_dimension_numbers<[1], [0], [0], [1], [0, 0, 1, 1], [], []>} : vector<64x64xf32>, vector<64x256xf32>, vector<64x256xf32> -> vector<64x256xf32>
    %65 = arith.addf %61, %64 : vector<64x256xf32>
    %cst_48 = arith.constant 0.000000e+00 : f32
    %66 = vector.broadcast %cst_48 : f32 to vector<64x256xf32>
    %67 = arith.cmpf ogt, %65, %66 : vector<64x256xf32>
    %cst_49 = arith.constant 2.000000e-01 : f32
    %68 = vector.broadcast %cst_49 : f32 to vector<64x256xf32>
    %69 = arith.mulf %68, %65 : vector<64x256xf32>
    %70 = arith.select %67, %65, %69 : vector<64x256xi1>, vector<64x256xf32>
    %cst_50 = arith.constant -1.000000e+30 : f32
    %71 = vector.broadcast %cst_50 : f32 to vector<64x256xf32>
    %72 = arith.select %3, %70, %71 : vector<64x256xi1>, vector<64x256xf32>
    %cst_51 = arith.constant dense<0xFF800000> : vector<64xf32>
    %73 = vector.multi_reduction <maximumf>, %72, %cst_51 [1] : vector<64x256xf32> to vector<64xf32>
    %74 = vector.shape_cast %73 : vector<64xf32> to vector<64x1xf32>
    %75 = vector.broadcast %74 : vector<64x1xf32> to vector<64x256xf32>
    %76 = arith.subf %72, %75 : vector<64x256xf32>
    %77 = math.exp %76 : vector<64x256xf32>
    %cst_52 = arith.constant 0.000000e+00 : f32
    %78 = vector.broadcast %cst_52 : f32 to vector<64x256xf32>
    %79 = arith.select %3, %77, %78 : vector<64x256xi1>, vector<64x256xf32>
    %cst_53 = arith.constant dense<0.000000e+00> : vector<64x256xf32>
    %80 = tpu.matmul %79, %57, %cst_53 {dimension_numbers = #tpu.dot_dimension_numbers<[1], [0], [0], [1], [0, 0, 1, 1], [], []>} : vector<64x256xf32>, vector<256x256xf32>, vector<64x256xf32> -> vector<64x256xf32>
    %81 = tpu.reciprocal %80 {approx = true} : vector<64x256xf32> -> vector<64x256xf32>
    %82 = arith.mulf %79, %81 : vector<64x256xf32>
    %83 = tpu.concatenate %59, %59, %59, %59 in 0 : vector<64x128xf32>, vector<64x128xf32>, vector<64x128xf32>, vector<64x128xf32> -> vector<256x128xf32>
    %84 = arith.mulf %83, %58 : vector<256x128xf32>
    %cst_54 = arith.constant dense<0.000000e+00> : vector<64x128xf32>
    %85 = tpu.matmul %82, %84, %cst_54 {dimension_numbers = #tpu.dot_dimension_numbers<[1], [0], [0], [1], [0, 0, 1, 1], [], []>} : vector<64x256xf32>, vector<256x128xf32>, vector<64x128xf32> -> vector<64x128xf32>
    %86 = vector.broadcast %53 : vector<1x128xf32> to vector<64x128xf32>
    %87 = arith.addf %85, %86 : vector<64x128xf32>
    %cst_55 = arith.constant 0.000000e+00 : f32
    %88 = vector.broadcast %cst_55 : f32 to vector<64x128xf32>
    %89 = arith.cmpf ogt, %87, %88 : vector<64x128xf32>
    %90 = math.exp %87 : vector<64x128xf32>
    %cst_56 = arith.constant 1.000000e+00 : f32
    %91 = vector.broadcast %cst_56 : f32 to vector<64x128xf32>
    %92 = arith.subf %90, %91 : vector<64x128xf32>
    %93 = arith.select %89, %87, %92 : vector<64x128xi1>, vector<64x128xf32>
    %c160_57 = arith.constant 160 : index
    %c0_58 = arith.constant 0 : index
    %94 = vector.load %arg1[%c160_57, %c0_58] : memref<680x128xf32, #tpu.memory_space<vmem>>, vector<128x32xf32>
    %c544 = arith.constant 544 : index
    %c0_59 = arith.constant 0 : index
    %95 = vector.load %arg1[%c544, %c0_59] : memref<680x128xf32, #tpu.memory_space<vmem>>, vector<32x2xf32>
    %c592 = arith.constant 592 : index
    %c0_60 = arith.constant 0 : index
    %96 = vector.load %arg1[%c592, %c0_60] : memref<680x128xf32, #tpu.memory_space<vmem>>, vector<1x32xf32>
    %c16 = arith.constant 16 : index
    %c0_61 = arith.constant 0 : index
    %97 = vector.load %arg2[%c16, %c0_61] : memref<816x256xf32, #tpu.memory_space<vmem>>, vector<2x64xf32>
    %c24 = arith.constant 24 : index
    %c0_62 = arith.constant 0 : index
    %98 = vector.load %arg2[%c24, %c0_62] : memref<816x256xf32, #tpu.memory_space<vmem>>, vector<2x64xf32>
    %c96 = arith.constant 96 : index
    %c0_63 = arith.constant 0 : index
    %99 = vector.load %arg2[%c96, %c0_63] : memref<816x256xf32, #tpu.memory_space<vmem>>, vector<64x64xf32>
    %cst_64 = arith.constant dense<0.000000e+00> : vector<64x32xf32>
    %100 = tpu.matmul %93, %94, %cst_64 {dimension_numbers = #tpu.dot_dimension_numbers<[1], [0], [0], [1], [0, 0, 1, 1], [], []>} : vector<64x128xf32>, vector<128x32xf32>, vector<64x32xf32> -> vector<64x32xf32>
    %cst_65 = arith.constant dense<0.000000e+00> : vector<64x2xf32>
    %101 = tpu.matmul %100, %95, %cst_65 {dimension_numbers = #tpu.dot_dimension_numbers<[1], [0], [0], [1], [0, 0, 1, 1], [], []>} : vector<64x32xf32>, vector<32x2xf32>, vector<64x2xf32> -> vector<64x2xf32>
    %cst_66 = arith.constant dense<0.000000e+00> : vector<64x64xf32>
    %102 = tpu.matmul %101, %98, %cst_66 {dimension_numbers = #tpu.dot_dimension_numbers<[1], [0], [0], [1], [0, 0, 1, 1], [], []>} : vector<64x2xf32>, vector<2x64xf32>, vector<64x64xf32> -> vector<64x64xf32>
    %cst_67 = arith.constant dense<0.000000e+00> : vector<64x64xf32>
    %103 = tpu.matmul %101, %97, %cst_67 {dimension_numbers = #tpu.dot_dimension_numbers<[1], [0], [0], [1], [0, 0, 1, 1], [], []>} : vector<64x2xf32>, vector<2x64xf32>, vector<64x64xf32> -> vector<64x64xf32>
    %104 = arith.mulf %103, %99 : vector<64x64xf32>
    %cst_68 = arith.constant dense<0.000000e+00> : vector<64x64xf32>
    %105 = tpu.matmul %0, %104, %cst_68 {dimension_numbers = #tpu.dot_dimension_numbers<[1], [0], [0], [1], [0, 0, 1, 1], [], []>} : vector<64x64xf32>, vector<64x64xf32>, vector<64x64xf32> -> vector<64x64xf32>
    %106 = arith.addf %102, %105 : vector<64x64xf32>
    %cst_69 = arith.constant 0.000000e+00 : f32
    %107 = vector.broadcast %cst_69 : f32 to vector<64x64xf32>
    %108 = arith.cmpf ogt, %106, %107 : vector<64x64xf32>
    %cst_70 = arith.constant 2.000000e-01 : f32
    %109 = vector.broadcast %cst_70 : f32 to vector<64x64xf32>
    %110 = arith.mulf %109, %106 : vector<64x64xf32>
    %111 = arith.select %108, %106, %110 : vector<64x64xi1>, vector<64x64xf32>
    %cst_71 = arith.constant -1.000000e+30 : f32
    %112 = vector.broadcast %cst_71 : f32 to vector<64x64xf32>
    %113 = arith.select %6, %111, %112 : vector<64x64xi1>, vector<64x64xf32>
    %cst_72 = arith.constant dense<0xFF800000> : vector<64xf32>
    %114 = vector.multi_reduction <maximumf>, %113, %cst_72 [1] : vector<64x64xf32> to vector<64xf32>
    %115 = vector.shape_cast %114 : vector<64xf32> to vector<64x1xf32>
    %116 = vector.broadcast %115 : vector<64x1xf32> to vector<64x64xf32>
    %117 = arith.subf %113, %116 : vector<64x64xf32>
    %118 = math.exp %117 : vector<64x64xf32>
    %cst_73 = arith.constant 0.000000e+00 : f32
    %119 = vector.broadcast %cst_73 : f32 to vector<64x64xf32>
    %120 = arith.select %6, %118, %119 : vector<64x64xi1>, vector<64x64xf32>
    %cst_74 = arith.constant dense<0.000000e+00> : vector<64x64xf32>
    %121 = tpu.matmul %120, %0, %cst_74 {dimension_numbers = #tpu.dot_dimension_numbers<[1], [0], [0], [1], [0, 0, 1, 1], [], []>} : vector<64x64xf32>, vector<64x64xf32>, vector<64x64xf32> -> vector<64x64xf32>
    %122 = tpu.reciprocal %121 {approx = true} : vector<64x64xf32> -> vector<64x64xf32>
    %123 = arith.mulf %120, %122 : vector<64x64xf32>
    %cst_75 = arith.constant dense<0.000000e+00> : vector<64x32xf32>
    %124 = tpu.matmul %123, %100, %cst_75 {dimension_numbers = #tpu.dot_dimension_numbers<[1], [0], [0], [1], [0, 0, 1, 1], [], []>} : vector<64x64xf32>, vector<64x32xf32>, vector<64x32xf32> -> vector<64x32xf32>
    %125 = vector.broadcast %96 : vector<1x32xf32> to vector<64x32xf32>
    %126 = arith.addf %124, %125 : vector<64x32xf32>
    %c192 = arith.constant 192 : index
    %c0_76 = arith.constant 0 : index
    %127 = vector.load %arg0[%c192, %c0_76] : memref<200x256xf32, #tpu.memory_space<vmem>>, vector<4x64xf32>
    %cst_77 = arith.constant 0.000000e+00 : f32
    %128 = vector.broadcast %cst_77 : f32 to vector<64x32xf32>
    %129 = arith.cmpf one, %126, %128 : vector<64x32xf32>
    %130 = arith.extui %129 : vector<64x32xi1> to vector<64x32xi32>
    %131 = arith.sitofp %130 : vector<64x32xi32> to vector<64x32xf32>
    %cst_78 = arith.constant dense<0.000000e+00> : vector<4x32xf32>
    %132 = tpu.matmul %127, %126, %cst_78 {dimension_numbers = #tpu.dot_dimension_numbers<[1], [0], [0], [1], [0, 0, 1, 1], [], []>} : vector<4x64xf32>, vector<64x32xf32>, vector<4x32xf32> -> vector<4x32xf32>
    %cst_79 = arith.constant dense<0.000000e+00> : vector<4x32xf32>
    %133 = tpu.matmul %127, %131, %cst_79 {dimension_numbers = #tpu.dot_dimension_numbers<[1], [0], [0], [1], [0, 0, 1, 1], [], []>} : vector<4x64xf32>, vector<64x32xf32>, vector<4x32xf32> -> vector<4x32xf32>
    %cst_80 = arith.constant 1.000000e-10 : f32
    %134 = vector.broadcast %cst_80 : f32 to vector<4x32xf32>
    %135 = arith.addf %133, %134 : vector<4x32xf32>
    %136 = tpu.reciprocal %135 {approx = true} : vector<4x32xf32> -> vector<4x32xf32>
    %137 = arith.mulf %132, %136 : vector<4x32xf32>
    %c600 = arith.constant 600 : index
    %c0_81 = arith.constant 0 : index
    %138 = vector.load %arg1[%c600, %c0_81] : memref<680x128xf32, #tpu.memory_space<vmem>>, vector<32x32xf32>
    %cst_82 = arith.constant dense<0.000000e+00> : vector<4x32xf32>
    %139 = tpu.matmul %137, %138, %cst_82 {dimension_numbers = #tpu.dot_dimension_numbers<[1], [0], [0], [1], [0, 0, 1, 1], [], []>} : vector<4x32xf32>, vector<32x32xf32>, vector<4x32xf32> -> vector<4x32xf32>
    %c632 = arith.constant 632 : index
    %c0_83 = arith.constant 0 : index
    %140 = vector.load %arg1[%c632, %c0_83] : memref<680x128xf32, #tpu.memory_space<vmem>>, vector<1x32xf32>
    %141 = vector.broadcast %140 : vector<1x32xf32> to vector<4x32xf32>
    %142 = arith.addf %139, %141 : vector<4x32xf32>
    %cst_84 = arith.constant 5.000000e-01 : f32
    %143 = vector.broadcast %cst_84 : f32 to vector<4x32xf32>
    %144 = arith.mulf %143, %142 : vector<4x32xf32>
    %cst_85 = arith.constant 4.471500e-02 : f32
    %145 = vector.broadcast %cst_85 : f32 to vector<4x32xf32>
    %146 = arith.mulf %145, %142 : vector<4x32xf32>
    %147 = arith.mulf %146, %142 : vector<4x32xf32>
    %148 = arith.mulf %147, %142 : vector<4x32xf32>
    %149 = arith.addf %142, %148 : vector<4x32xf32>
    %cst_86 = arith.constant 0.797884583 : f32
    %150 = vector.broadcast %cst_86 : f32 to vector<4x32xf32>
    %151 = arith.mulf %150, %149 : vector<4x32xf32>
    %152 = math.tanh %151 : vector<4x32xf32>
    %cst_87 = arith.constant 1.000000e+00 : f32
    %153 = vector.broadcast %cst_87 : f32 to vector<4x32xf32>
    %154 = arith.addf %153, %152 : vector<4x32xf32>
    %155 = arith.mulf %144, %154 : vector<4x32xf32>
    %c640 = arith.constant 640 : index
    %c0_88 = arith.constant 0 : index
    %156 = vector.load %arg1[%c640, %c0_88] : memref<680x128xf32, #tpu.memory_space<vmem>>, vector<32x64xf32>
    %cst_89 = arith.constant dense<0.000000e+00> : vector<4x64xf32>
    %157 = tpu.matmul %155, %156, %cst_89 {dimension_numbers = #tpu.dot_dimension_numbers<[1], [0], [0], [1], [0, 0, 1, 1], [], []>} : vector<4x32xf32>, vector<32x64xf32>, vector<4x64xf32> -> vector<4x64xf32>
    %c672 = arith.constant 672 : index
    %c0_90 = arith.constant 0 : index
    %158 = vector.load %arg1[%c672, %c0_90] : memref<680x128xf32, #tpu.memory_space<vmem>>, vector<1x64xf32>
    %159 = vector.broadcast %158 : vector<1x64xf32> to vector<4x64xf32>
    %160 = arith.addf %157, %159 : vector<4x64xf32>
    %c736 = arith.constant 736 : index
    %c0_91 = arith.constant 0 : index
    %161 = vector.load %arg2[%c736, %c0_91] : memref<816x256xf32, #tpu.memory_space<vmem>>, vector<64x128xf32>
    %cst_92 = arith.constant dense<0.000000e+00> : vector<4x128xf32>
    %162 = tpu.matmul %160, %161, %cst_92 {dimension_numbers = #tpu.dot_dimension_numbers<[1], [0], [0], [1], [0, 0, 1, 1], [], []>} : vector<4x64xf32>, vector<64x128xf32>, vector<4x128xf32> -> vector<4x128xf32>
    %c800 = arith.constant 800 : index
    %c0_93 = arith.constant 0 : index
    %163 = vector.load %arg2[%c800, %c0_93] : memref<816x256xf32, #tpu.memory_space<vmem>>, vector<4x128xf32>
    %164 = arith.mulf %162, %163 : vector<4x128xf32>
    %c808 = arith.constant 808 : index
    %c0_94 = arith.constant 0 : index
    %165 = vector.load %arg2[%c808, %c0_94] : memref<816x256xf32, #tpu.memory_space<vmem>>, vector<2x4xf32>
    %cst_95 = arith.constant dense<0.000000e+00> : vector<2x128xf32>
    %166 = tpu.matmul %165, %164, %cst_95 {dimension_numbers = #tpu.dot_dimension_numbers<[1], [0], [0], [1], [0, 0, 1, 1], [], []>} : vector<2x4xf32>, vector<4x128xf32>, vector<2x128xf32> -> vector<2x128xf32>
    %c0_96 = arith.constant 0 : index
    %c0_97 = arith.constant 0 : index
    %167 = vector.load %arg3[%c0_96, %c0_97] : memref<2x128xf32, #tpu.memory_space<vmem>>, vector<2x128xf32>
    tpu.vector_store %arg3[%c0_96, %c0_97], %166 {strides = array<i32>} : memref<2x128xf32, #tpu.memory_space<vmem>>, vector<2x128xf32>,
    return
  }
}

</mosaic_0001>

<bundles_post_ra>
// kernel: my_gnn_forward.1
= control target key start
LH: loop header
LB: loop body
LE: loop exit
PB: predicated region body
PF: predicated region fallthrough
CT: control target
= control target key end

     0   :  { %vm7976_vm0 = vcmask 261120   ;;  %vm7978_vm1 = vcmask 64512   ;;  %vm7977_vm2 = vcmask 523264   ;;  %s7972_s1 = inlined_call_operand.vmem [shape: f32[680,128], index: 1, kind: input, shape index: {}]   ;;  %s7973_s0 = inlined_call_operand.vmem [shape: f32[200,256], index: 0, kind: input, shape index: {}]   ;;  %s7974_s2 = inlined_call_operand.vmem [shape: f32[816,256], index: 2, kind: input, shape index: {}]   ;;  %s7975_s3 = inlined_call_operand.vmem [shape: f32[2,128], index: 3, kind: output, shape index: {}]  }
   0x1   :  { %v78_v0 = vld [vmem:[%s7972_s1] sm:$0xff]  ;;  %v79_v1 = vld [vmem:[%s7972_s1 + $0x8] sm:$0xff]  ;;  %v80_v2 = vld [vmem:[%s7972_s1 + $0x10] sm:$0xff] }
   0x2   :  { %v4860_v3 = vpack.c.bf16 %v79_v1, %v78_v0  ;;  %v81_v4 = vld [vmem:[%s7972_s1 + $0x18] sm:$0xff]  ;;  %v70_v5 = vld [vmem:[%s7973_s0] sm:$0xff]  ;;  %v83_v8 = vld [vmem:[%s7972_s1 + $0x128] sm:$0xff] }
   0x3   :  { %v4864_v6 = vpack.c.bf16 %v81_v4, %v80_v2  ;;  %4456 = vmatprep.mubr.msk.f32.mxu0 %vm7976_vm0, %v70_v5  ;;  %v82_v7 = vld [vmem:[%s7972_s1 + $0x120] sm:$0xff]  ;;  %v84_v9 = vld [vmem:[%s7972_s1 + $0x130] sm:$0xff]  ;;  %v85_v11 = vld [vmem:[%s7972_s1 + $0x138] sm:$0xff] }
   0x4   :  { %4861 = vmatprep.subr.bf16.mxu0 %v4860_v3  ;;  %v4868_v10 = vpack.c.bf16 %v83_v8, %v82_v7  ;;  %v4872_v12 = vpack.c.bf16 %v85_v11, %v84_v9  ;;  %v86_v13 = vld [vmem:[%s7972_s1 + $0x140] sm:$0xff]  ;;  %v87_v14 = vld [vmem:[%s7972_s1 + $0x148] sm:$0xff]  ;;  %v71_v15 = vld [vmem:[%s7973_s0 + $0x10] sm:$0xff] }
   0x5   :  { %4863 = vmatpush3.bf16.msra.mxu0 %v4860_v3  ;;  %v72_v16 = vld [vmem:[%s7973_s0 + $0x20] sm:$0xff]  ;;  %v4876_v17 = vpack.c.bf16 %v87_v14, %v86_v13  ;;  %v88_v18 = vld [vmem:[%s7972_s1 + $0x150] sm:$0xff]  ;;  %v89_v19 = vld [vmem:[%s7972_s1 + $0x158] sm:$0xff] }
   0x6   :  { %4865 = vmatprep.subr.bf16.mxu0 %v4864_v6  ;;  %4869 = vmatprep.subr.bf16.mxu1 %v4868_v10  ;;  %v73_v20 = vld [vmem:[%s7973_s0 + $0x30] sm:$0xff]  ;;  %v74_v21 = vld [vmem:[%s7973_s0 + $0x40] sm:$0xff]  ;;  %v4880_v22 = vpack.c.bf16 %v89_v19, %v88_v18  ;;  %v91_v24 = vld [vmem:[%s7972_s1 + $0x168] sm:$0xff] }
   0x7   :  { %4871 = vmatpush3.bf16.msra.mxu1 %v4868_v10  ;;  %v90_v23 = vld [vmem:[%s7972_s1 + $0x160] sm:$0xff]  ;;  %v75_v25 = vld [vmem:[%s7973_s0 + $0x50] sm:$0xff]  ;;  %v93_v29 = vld [vmem:[%s7972_s1 + $0x178] sm:$0xff] }
   0x8   :  { %4873 = vmatprep.subr.bf16.mxu1 %v4872_v12  ;;  %v76_v26 = vld [vmem:[%s7973_s0 + $0x60] sm:$0xff]  ;;  %v4884_v27 = vpack.c.bf16 %v91_v24, %v90_v23  ;;  %v92_v28 = vld [vmem:[%s7972_s1 + $0x170] sm:$0xff]  ;;  %v95_v33 = vld [vmem:[%s7972_s1 + $0x188] sm:$0xff] }
   0x9   :  { %4867 = vmatpush3.bf16.msra.mxu0 %v4864_v6  ;;  %v77_v30 = vld [vmem:[%s7973_s0 + $0x70] sm:$0xff]  ;;  %v4888_v31 = vpack.c.bf16 %v93_v29, %v92_v28  ;;  %v94_v32 = vld [vmem:[%s7972_s1 + $0x180] sm:$0xff]  ;;  %v97_v36 = vld [vmem:[%s7972_s1 + $0x198] sm:$0xff] }
   0xa   :  { %v4892_v34 = vpack.c.bf16 %v95_v33, %v94_v32  ;;  %v96_v35 = vld [vmem:[%s7972_s1 + $0x190] sm:$0xff]  ;;  %v100_v38 = vld [vmem:[%s7974_s2 + $0x8] sm:$0xff]  ;;  %v99_v39 = vld [vmem:[%s7974_s2] sm:$0xff] }
   0xb   :  { %4875 = vmatpush3.bf16.msra.mxu1 %v4872_v12  ;;  %v4896_v37 = vpack.c.bf16 %v97_v36, %v96_v35  ;;  %475 = vmatprep.subr.mxu0 %v100_v38  ;;  %v184_v40 = vld [vmem:[%s7974_s2 + $0x3d0] sm:$0xff]  ;;  %v183_v42 = vld [vmem:[%s7974_s2 + $0x3c0] sm:$0xff] }
   0xc   :  { %4457 = vmatmul.mubr.msk.f32.vlgmr.msra.gmra.mrb[0].mxu0 %vm7976_vm0, %v71_v15  ;;  %4877 = vmatprep.subr.bf16.mxu1 %v4876_v17  ;;  %v192_v41 = vld [vmem:[%s7974_s2 + $0x450] sm:$0xff]  ;;  %v191_v45 = vld [vmem:[%s7974_s2 + $0x440] sm:$0xff] }
   0xd   :  { %4459 = vmatprep.mubr.msk.f32.mxu0 %vm7976_vm0, %v72_v16  ;;  %476 = vmatpush1.msra.mxu0 %v99_v39  ;;  %v200_v43 = vld [vmem:[%s7974_s2 + $0x4d0] sm:$0xff]  ;;  %v199_v46 = vld [vmem:[%s7974_s2 + $0x4c0] sm:$0xff] }
   0xe   :  { %v208_v44 = vld [vmem:[%s7974_s2 + $0x550] sm:$0xff]  ;;  %v207_v47 = vld [vmem:[%s7974_s2 + $0x540] sm:$0xff] }
   0xf   :  { %4879 = vmatpush3.bf16.msra.mxu1 %v4876_v17  ;;  %v186_v52 = vld [vmem:[%s7974_s2 + $0x3f0] sm:$0xff]  ;;  %v185_v58 = vld [vmem:[%s7974_s2 + $0x3e0] sm:$0xff] }
  0x10   :  { %4460 = vmatmul.mubr.msk.f32.gmra.mrb[2].mxu0 %vm7976_vm0, %v73_v20  ;;  %4881 = vmatprep.subr.bf16.mxu1 %v4880_v22  ;;  %v194_v53 = vld [vmem:[%s7974_s2 + $0x470] sm:$0xff]  ;;  %v193_v63 = vld [vmem:[%s7974_s2 + $0x460] sm:$0xff] }
  0x11   :  { %4462 = vmatprep.mubr.msk.f32.mxu0 %vm7976_vm0, %v74_v21  ;;  %v202_v60 = vld [vmem:[%s7974_s2 + $0x4f0] sm:$0xff]  ;;  %v201_v0 = vld [vmem:[%s7974_s2 + $0x4e0] sm:$0xff] }
  0x12   :  { %v210_v62 = vld [vmem:[%s7974_s2 + $0x570] sm:$0xff]  ;;  %v209_v1 = vld [vmem:[%s7974_s2 + $0x560] sm:$0xff] }
  0x13   :  { %4883 = vmatpush3.bf16.msra.mxu1 %v4880_v22  ;;  %v188_v10 = vld [vmem:[%s7974_s2 + $0x410] sm:$0xff]  ;;  %v187_v16 = vld [vmem:[%s7974_s2 + $0x400] sm:$0xff] }
  0x14   :  { %4463 = vmatmul.mubr.msk.f32.gmra.mrb[4].mxu0 %vm7976_vm0, %v75_v25  ;;  %4885 = vmatprep.subr.bf16.mxu1 %v4884_v27  ;;  %v196_v11 = vld [vmem:[%s7974_s2 + $0x490] sm:$0xff]  ;;  %v195_v21 = vld [vmem:[%s7974_s2 + $0x480] sm:$0xff] }
  0x15   :  { %4465 = vmatprep.mubr.msk.f32.mxu0 %vm7976_vm0, %v76_v26  ;;  %v204_v18 = vld [vmem:[%s7974_s2 + $0x510] sm:$0xff]  ;;  %v203_v22 = vld [vmem:[%s7974_s2 + $0x500] sm:$0xff] }
  0x16   :  { %v212_v20 = vld [vmem:[%s7974_s2 + $0x590] sm:$0xff]  ;;  %v211_v23 = vld [vmem:[%s7974_s2 + $0x580] sm:$0xff] }
  0x17   :  { %4887 = vmatpush3.bf16.msra.mxu1 %v4884_v27  ;;  %v190_v32 = vld [vmem:[%s7974_s2 + $0x430] sm:$0xff]  ;;  %v189_v38 = vld [vmem:[%s7974_s2 + $0x420] sm:$0xff] }
  0x18   :  { %4466 = vmatmul.mubr.msk.f32.gmra.mrb[6].mxu0 %vm7976_vm0, %v77_v30  ;;  %4889 = vmatprep.subr.bf16.mxu1 %v4888_v31  ;;  %v198_v33 = vld [vmem:[%s7974_s2 + $0x4b0] sm:$0xff] }
  0x1b   :  { %4891 = vmatpush3.bf16.msra.mxu1 %v4888_v31 }
  0x1c   :  { %4893 = vmatprep.subr.bf16.mxu1 %v4892_v34 }
  0x1f   :  { %4895 = vmatpush3.bf16.msra.mxu1 %v4892_v34 }
  0x20   :  { %4897 = vmatprep.subr.bf16.mxu1 %v4896_v37 }
  0x23   :  { %4899 = vmatpush3.bf16.msra.mxu1 %v4896_v37 }
  0xdf   :  { %v4458_v48 = vpop.f32.mrb[0].mxu0 }
  0xe0   :  { %v5777_v49 = vmul.f32 %v4458_v48, %v184_v40  ;;  %v5779_v50 = vmul.f32 %v4458_v48, %v192_v41  ;;  %v306_v51 = vpop.f32.mrb[1].mxu0  ;;  %v5787_v54 = vmul.f32 %v4458_v48, %v200_v43  ;;  %v5789_v55 = vmul.f32 %v4458_v48, %v208_v44  ;;  %v206_v40 = vld [vmem:[%s7974_s2 + $0x530] sm:$0xff]  ;;  %v197_v43 = vld [vmem:[%s7974_s2 + $0x4a0] sm:$0xff] }
  0xe1   :  { %v5791_v56 = vmul.f32 %v306_v51, %v183_v42  ;;  %v5793_v57 = vmul.f32 %v306_v51, %v191_v45  ;;  %4500 = vmatprep.mubr.f32.mxu1 %v306_v51  ;;  %v5798_v59 = vmul.f32 %v306_v51, %v199_v46  ;;  %v5803_v61 = vmul.f32 %v306_v51, %v207_v47  ;;  %v214_v42 = vld [vmem:[%s7974_s2 + $0x5b0] sm:$0xff]  ;;  %v205_v44 = vld [vmem:[%s7974_s2 + $0x520] sm:$0xff] }
  0xe2   :  { %4501 = vmatmul.mubr.f32.vlgmr.msra.gmra.mrb[0].mxu1 %v4458_v48  ;;  %v213_v45 = vld [vmem:[%s7974_s2 + $0x5a0] sm:$0xff]  ;;  %v109_v48 = vld [vmem:[%s7974_s2 + $0x70] sm:$0xff] }
  0xe3   :  { %v4461_v2 = vpop.f32.mrb[2].mxu0  ;;  %v4980_v3 = vpack.c.bf16 %v5787_v54, %v5798_v59  ;;  %v4982_v4 = vpack.c.bf16 %v5777_v49, %v5791_v56  ;;  %v18_v54 = vld [vmem:[%s7974_s2 + $0x180] sm:$0xff]  ;;  %v19_v59 = vld [vmem:[%s7974_s2 + $0x190] sm:$0xff] }
  0xe4   :  { %v5825_v7 = vmul.f32 %v4461_v2, %v186_v52  ;;  %v5827_v8 = vmul.f32 %v4461_v2, %v194_v53  ;;  %v316_v9 = vpop.f32.mrb[3].mxu0  ;;  %v5835_v12 = vmul.f32 %v4461_v2, %v202_v60  ;;  %v5837_v13 = vmul.f32 %v4461_v2, %v210_v62 }
  0xe5   :  { %v5839_v14 = vmul.f32 %v316_v9, %v185_v58  ;;  %v5841_v15 = vmul.f32 %v316_v9, %v193_v63  ;;  %4503 = vmatprep.mubr.f32.mxu1 %v316_v9  ;;  %v5846_v17 = vmul.f32 %v316_v9, %v201_v0  ;;  %v5851_v19 = vmul.f32 %v316_v9, %v209_v1 }
  0xe6   :  { %4504 = vmatmul.mubr.f32.gmra.mrb[2].mxu1 %v4461_v2 }
  0xe7   :  { %v4464_v24 = vpop.f32.mrb[4].mxu0  ;;  %v4984_v25 = vpack.c.bf16 %v5835_v12, %v5846_v17  ;;  %v4986_v26 = vpack.c.bf16 %v5825_v7, %v5839_v14  ;;  %v8026_v7 = vpack.c.bf16 %v5789_v55, %v5803_v61  ;;  %v8027_v12 = vpack.c.bf16 %v5779_v50, %v5793_v57  ;;  %v119_v17 = vld [vmem:[%s7974_s2 + $0x1c0] sm:$0xff] }
  0xe8   :  { %v5873_v29 = vmul.f32 %v4464_v24, %v188_v10  ;;  %v5875_v30 = vmul.f32 %v4464_v24, %v196_v11  ;;  %v326_v31 = vpop.f32.mrb[5].mxu0  ;;  %v5883_v34 = vmul.f32 %v4464_v24, %v204_v18  ;;  %v5885_v35 = vmul.f32 %v4464_v24, %v212_v20  ;;  %v107_v10 = vld [vmem:[%s7974_s2 + $0x60] sm:$0xff] }
  0xe9   :  { %v5887_v36 = vmul.f32 %v326_v31, %v187_v16  ;;  %v5889_v37 = vmul.f32 %v326_v31, %v195_v21  ;;  %4506 = vmatprep.mubr.f32.mxu1 %v326_v31  ;;  %v5894_v39 = vmul.f32 %v326_v31, %v203_v22  ;;  %v5899_v41 = vmul.f32 %v326_v31, %v211_v23 }
  0xea   :  { %4507 = vmatmul.mubr.f32.gmra.mrb[4].mxu1 %v4464_v24  ;;  %v7979_v20 = vmov 0.0   ;;  %v8028_v14 = vpack.c.bf16 %v5837_v13, %v5851_v19  ;;  %v8029_v55 = vpack.c.bf16 %v5827_v8, %v5841_v15  ;;  %v120_v13 = vld [vmem:[%s7974_s2 + $0x1c8] sm:$0xff]  ;;  %v122_v15 = vld [vmem:[%s7974_s2 + $0x1d8] sm:$0xff] }
  0xeb   :  { %v4467_v46 = vpop.f32.mrb[6].mxu0  ;;  %v4988_v47 = vpack.c.bf16 %v5883_v34, %v5894_v39  ;;  %539 = vmatprep.mubr.f32.mxu0 %v7979_v20  ;;  %v8023_v49 = vpack.c.bf16 %v5873_v29, %v5887_v36  ;;  %v8030_v61 = vpack.c.bf16 %v5885_v35, %v5899_v41  ;;  %v8031_v50 = vpack.c.bf16 %v5875_v30, %v5889_v37  ;;  %v126_v29 = vld [vmem:[%s7974_s2 + $0x1f8] sm:$0xff]  ;;  %v123_v35 = vld [vmem:[%s7974_s2 + $0x1e0] sm:$0xff]  ;;  %v125_v36 = vld [vmem:[%s7974_s2 + $0x1f0] sm:$0xff] }
  0xec   :  { %v5921_v53 = vmul.f32 %v4467_v46, %v190_v32  ;;  %v5923_v58 = vmul.f32 %v4467_v46, %v198_v33  ;;  %v336_v60 = vpop.f32.mrb[7].mxu0  ;;  %v5925_v62 = vmul.f32 %v4467_v46, %v206_v40  ;;  %v5927_v63 = vmul.f32 %v4467_v46, %v214_v42  ;;  %v128_v37 = vld [vmem:[%s7974_s2 + $0x208] sm:$0xff]  ;;  %v130_v39 = vld [vmem:[%s7974_s2 + $0x218] sm:$0xff] }
  0xed   :  { %v5929_v0 = vmul.f32 %v336_v60, %v189_v38  ;;  %v5931_v1 = vmul.f32 %v336_v60, %v197_v43  ;;  %4509 = vmatprep.mubr.f32.mxu1 %v336_v60  ;;  %v5933_v2 = vmul.f32 %v336_v60, %v205_v44  ;;  %v5935_v9 = vmul.f32 %v336_v60, %v213_v45  ;;  %v103_v43 = vld [vmem:[%s7974_s2 + $0x40] sm:$0xff]  ;;  %v105_v44 = vld [vmem:[%s7974_s2 + $0x50] sm:$0xff]  ;;  %v104_v45 = vld [vmem:[%s7974_s2 + $0x48] sm:$0xff] }
  0xee   :  { %4510 = vmatmul.mubr.f32.gmra.mrb[6].mxu1 %v4467_v46  ;;  %v106_v46 = vld [vmem:[%s7974_s2 + $0x58] sm:$0xff]  ;;  %v6160_v19 = vpack.c.bf16 %v122_v15, %v120_v13  ;;  %v6189_v41 = vpack.c.bf16 %v125_v36, %v123_v35  ;;  %v159_v13 = vld [vmem:[%s7974_s2 + $0x300] sm:$0xff]  ;;  %v161_v15 = vld [vmem:[%s7974_s2 + $0x310] sm:$0xff] }
  0xef   :  { %693 = vmatprep.mubr.f32.mxu1 %v7979_v20  ;;  %v8024_v56 = vpack.c.bf16 %v5925_v62, %v5933_v2  ;;  %v8032_v57 = vpack.c.bf16 %v5927_v63, %v5935_v9  ;;  %v8033_v8 = vpack.c.bf16 %v5923_v58, %v5931_v1  ;;  %v129_v58 = vld [vmem:[%s7974_s2 + $0x210] sm:$0xff]  ;;  %v132_v62 = vld [vmem:[%s7974_s2 + $0x228] sm:$0xff]  ;;  %v134_v63 = vld [vmem:[%s7974_s2 + $0x238] sm:$0xff] }
  0xf0   :  { %4917 = vmatprep.subr.bf16.mxu0 %v6160_v19  ;;  %v6210_v1 = vpack.c.bf16 %v134_v63, %v132_v62  ;;  %v131_v2 = vld [vmem:[%s7974_s2 + $0x220] sm:$0xff]  ;;  %v133_v9 = vld [vmem:[%s7974_s2 + $0x230] sm:$0xff] }
  0xf1   :  { %v163_v35 = vld [vmem:[%s7974_s2 + $0x320] sm:$0xff]  ;;  %v165_v36 = vld [vmem:[%s7974_s2 + $0x330] sm:$0xff] }
 0x1b5   :  { %v5947_v21 = vpop.f32.mrb[0].mxu1 }
 0x1b6   :  { %v5949_v22 = vpop.f32.mrb[1].mxu1 }
 0x1b7   :  { %3937 = vmatmul.mubr.msk.f32.vlgmr.msra.gmra.mrb[8].mxu0 %vm7978_vm1, %v5949_v22 }
 0x1b8   :  { %545 = vmatprep.mubr.f32.mxu0 %v7979_v20 }
 0x1b9   :  { %v5954_v23 = vpop.f32.mrb[2].mxu1 }
 0x1ba   :  { %v5956_v24 = vpop.f32.mrb[3].mxu1 }
 0x1bb   :  { %3938 = vmatmul.mubr.msk.f32.gmra.mrb[10].mxu0 %vm7978_vm1, %v5947_v21 }
 0x1bc   :  { %551 = vmatprep.mubr.f32.mxu0 %v7979_v20 }
 0x1bd   :  { %v5961_v31 = vpop.f32.mrb[4].mxu1 }
 0x1be   :  { %v5963_v32 = vpop.f32.mrb[5].mxu1 }
 0x1bf   :  { %3939 = vmatmul.mubr.msk.f32.gmra.mrb[12].mxu0 %vm7978_vm1, %v5956_v24 }
 0x1c0   :  { %557 = vmatprep.mubr.f32.mxu0 %v7979_v20 }
 0x1c1   :  { %v5968_v33 = vpop.f32.mrb[6].mxu1 }
 0x1c2   :  { %v5970_v38 = vpop.f32.mrb[7].mxu1 }
 0x1c3   :  { %3940 = vmatmul.mubr.msk.f32.gmra.mrb[14].mxu0 %vm7978_vm1, %v5954_v23 }
 0x1c4   :  { %563 = vmatprep.mubr.f32.mxu0 %v7979_v20 }
 0x1c7   :  { %3941 = vmatmul.mubr.msk.f32.gmra.mrb[16].mxu0 %vm7978_vm1, %v5963_v32 }
 0x1c8   :  { %569 = vmatprep.mubr.f32.mxu0 %v7979_v20 }
 0x1cb   :  { %3942 = vmatmul.mubr.msk.f32.gmra.mrb[18].mxu0 %vm7978_vm1, %v5961_v31 }
 0x1cc   :  { %575 = vmatprep.mubr.f32.mxu0 %v7979_v20 }
 0x1cf   :  { %3943 = vmatmul.mubr.msk.f32.gmra.mrb[20].mxu0 %vm7978_vm1, %v5970_v38 }
 0x1d0   :  { %581 = vmatprep.mubr.f32.mxu0 %v7979_v20 }
 0x1d3   :  { %3944 = vmatmul.mubr.msk.f32.gmra.mrb[22].mxu0 %vm7978_vm1, %v5968_v33 }
 0x28a   :  { %v541_v40 = vpop.f32.mrb[8].mxu0 }
 0x28b   :  { %v543_v42 = vpop.f32.mrb[9].mxu0  ;;  %v588_v18 = vmul.f32 %v541_v40, %v103_v43  ;;  %v108_v40 = vld [vmem:[%s7974_s2 + $0x68] sm:$0xff] }
 0x28c   :  { %v589_v51 = vmul.f32 %v543_v42, %v104_v45 }
 0x28e   :  { %v547_v60 = vpop.f32.mrb[10].mxu0 }
 0x28f   :  { %v590_v16 = vmul.f32 %v547_v60, %v105_v44  ;;  %v549_v52 = vpop.f32.mrb[11].mxu0  ;;  %v111_v60 = vld [vmem:[%s7974_s2 + $0x80] sm:$0xff] }
 0x290   :  { %v591_v28 = vmul.f32 %v549_v52, %v106_v46 }
 0x291   :  { %v4902_v27 = vpack.c.bf16 %v590_v16, %v588_v18 }
 0x292   :  { %v4900_v6 = vpack.c.bf16 %v591_v28, %v589_v51  ;;  %v553_v5 = vpop.f32.mrb[12].mxu0  ;;  %v110_v28 = vld [vmem:[%s7974_s2 + $0x78] sm:$0xff] }
 0x293   :  { %v555_v11 = vpop.f32.mrb[13].mxu0  ;;  %v592_v52 = vmul.f32 %v553_v5, %v107_v10  ;;  %v112_v5 = vld [vmem:[%s7974_s2 + $0x88] sm:$0xff] }
 0x294   :  { %4901 = vmatprep.subr.bf16.mxu1 %v4900_v6  ;;  %v593_v42 = vmul.f32 %v555_v11, %v108_v40 }
 0x295   :  { %4903 = vmatpush1.bf16.msra.mxu1 %v4902_v27  ;;  %v113_v27 = vld [vmem:[%s7974_s2 + $0x90] sm:$0xff] }
 0x296   :  { %v559_v51 = vpop.f32.mrb[14].mxu0 }
 0x297   :  { %v594_v16 = vmul.f32 %v559_v51, %v109_v48  ;;  %v561_v18 = vpop.f32.mrb[15].mxu0  ;;  %v114_v48 = vld [vmem:[%s7974_s2 + $0x98] sm:$0xff] }
 0x298   :  { %v595_v43 = vmul.f32 %v561_v18, %v110_v28 }
 0x299   :  { %v4906_v6 = vpack.c.bf16 %v594_v16, %v592_v52 }
 0x29a   :  { %v4904_v44 = vpack.c.bf16 %v595_v43, %v593_v42  ;;  %v565_v45 = vpop.f32.mrb[16].mxu0 }
 0x29b   :  { %v567_v46 = vpop.f32.mrb[17].mxu0  ;;  %v596_v11 = vmul.f32 %v565_v45, %v111_v60  ;;  %v116_v45 = vld [vmem:[%s7974_s2 + $0xa8] sm:$0xff] }
 0x29c   :  { %4905 = vmatprep.subr.bf16.mxu1 %v4904_v44  ;;  %v597_v51 = vmul.f32 %v567_v46, %v112_v5  ;;  %v115_v44 = vld [vmem:[%s7974_s2 + $0xa0] sm:$0xff]  ;;  %v118_v46 = vld [vmem:[%s7974_s2 + $0xb8] sm:$0xff] }
 0x29d   :  { %4907 = vmatpush1.bf16.msra.mxu1 %v4906_v6  ;;  %v117_v6 = vld [vmem:[%s7974_s2 + $0xb0] sm:$0xff] }
 0x29e   :  { %v571_v10 = vpop.f32.mrb[18].mxu0 }
 0x29f   :  { %v598_v40 = vmul.f32 %v571_v10, %v113_v27  ;;  %v573_v28 = vpop.f32.mrb[19].mxu0 }
 0x2a0   :  { %v599_v52 = vmul.f32 %v573_v28, %v114_v48 }
 0x2a1   :  { %v4910_v16 = vpack.c.bf16 %v598_v40, %v596_v11 }
 0x2a2   :  { %v4908_v18 = vpack.c.bf16 %v599_v52, %v597_v51  ;;  %v577_v42 = vpop.f32.mrb[20].mxu0  ;;  %v102_v51 = vld [vmem:[%s7974_s2 + $0x18] sm:$0xff]  ;;  %v14_v52 = vld [vmem:[%s7974_s2 + $0x140] sm:$0xff] }
 0x2a3   :  { %v579_v43 = vpop.f32.mrb[21].mxu0  ;;  %v600_v27 = vmul.f32 %v577_v42, %v115_v44  ;;  %v16_v42 = vld [vmem:[%s7974_s2 + $0x160] sm:$0xff]  ;;  %v21_v44 = vld [vmem:[%s7974_s2 + $0x1b0] sm:$0xff] }
 0x2a4   :  { %4909 = vmatprep.subr.bf16.mxu1 %v4908_v18  ;;  %v601_v10 = vmul.f32 %v579_v43, %v116_v45  ;;  %v15_v18 = vld [vmem:[%s7974_s2 + $0x150] sm:$0xff] }
 0x2a5   :  { %4911 = vmatpush1.bf16.msra.mxu1 %v4910_v16  ;;  %v101_v16 = vld [vmem:[%s7974_s2 + $0x10] sm:$0xff] }
 0x2a6   :  { %v583_v60 = vpop.f32.mrb[22].mxu0  ;;  %v17_v43 = vld [vmem:[%s7974_s2 + $0x170] sm:$0xff] }
 0x2a7   :  { %v602_v5 = vmul.f32 %v583_v60, %v117_v6  ;;  %v585_v48 = vpop.f32.mrb[23].mxu0  ;;  %v141_v60 = vld [vmem:[%s7974_s2 + $0x270] sm:$0xff] }
 0x2a8   :  { %v603_v11 = vmul.f32 %v585_v48, %v118_v46  ;;  %v139_v46 = vld [vmem:[%s7974_s2 + $0x260] sm:$0xff] }
 0x2a9   :  { %v4914_v40 = vpack.c.bf16 %v602_v5, %v600_v27  ;;  %v144_v27 = vld [vmem:[%s7974_s2 + $0x288] sm:$0xff]  ;;  %v146_v5 = vld [vmem:[%s7974_s2 + $0x298] sm:$0xff]  ;;  %v6261_v48 = vpack.c.bf16 %v141_v60, %v139_v46 }
 0x2aa   :  { %v4912_v28 = vpack.c.bf16 %v603_v11, %v601_v10  ;;  %v6264_v10 = vpack.c.bf16 %v146_v5, %v144_v27  ;;  %v143_v11 = vld [vmem:[%s7974_s2 + $0x280] sm:$0xff] }
 0x2ac   :  { %4913 = vmatprep.subr.bf16.mxu1 %v4912_v28  ;;  %v148_v28 = vld [vmem:[%s7974_s2 + $0x2a8] sm:$0xff] }
 0x2ad   :  { %4915 = vmatpush1.bf16.msra.mxu1 %v4914_v40  ;;  %v145_v40 = vld [vmem:[%s7974_s2 + $0x290] sm:$0xff] }
 0x2ae   :  { %742 = vmatprep.subr.mxu1 %v102_v51  ;;  %v150_v51 = vld [vmem:[%s7974_s2 + $0x2b8] sm:$0xff] }
 0x2b0   :  { %3945 = vmatmul.mubr.msk.f32.vlgmr.msra.gmra.mrb[8].mxu1 %vm7977_vm2, %v14_v52  ;;  %v6279_v52 = vpack.c.bf16 %v145_v40, %v143_v11 }
 0x2b1   :  { %743 = vmatpush1.msra.mxu1 %v101_v16  ;;  %699 = vmatprep.mubr.f32.mxu1 %v7979_v20  ;;  %v6282_v16 = vpack.c.bf16 %v150_v51, %v148_v28  ;;  %v6409_v28 = vld [vmem:[%s7973_s0 + $0xa8] sm:$0xff] }
 0x2b2   :  { %4981 = vmatprep.subr.bf16.mxu1 %v4980_v3  ;;  %v20_v3 = vld [vmem:[%s7974_s2 + $0x1a0] sm:$0xff]  ;;  %8040 = vst [vmem:[#allocation8_spill] sm:$0xff] %v6409_v28  ;;  %vm43_vm14 = vcmp.gt.f32.partialorder %v6409_v28, 0.0 }
 0x2b4   :  { %3946 = vmatmul.mubr.msk.f32.gmra.mrb[10].mxu1 %vm7977_vm2, %v15_v18  ;;  %v147_v18 = vld [vmem:[%s7974_s2 + $0x2a0] sm:$0xff] }
 0x2b5   :  { %705 = vmatprep.mubr.f32.mxu1 %v7979_v20 }
 0x2b8   :  { %3947 = vmatmul.mubr.msk.f32.gmra.mrb[12].mxu1 %vm7977_vm2, %v16_v42  ;;  %v149_v42 = vld [vmem:[%s7974_s2 + $0x2b0] sm:$0xff] }
 0x2b9   :  { %711 = vmatprep.mubr.f32.mxu1 %v7979_v20 }
 0x2bc   :  { %3948 = vmatmul.mubr.msk.f32.gmra.mrb[14].mxu1 %vm7977_vm2, %v17_v43  ;;  %v152_v43 = vld [vmem:[%s7974_s2 + $0x2c8] sm:$0xff] }
 0x2bd   :  { %717 = vmatprep.mubr.f32.mxu1 %v7979_v20 }
 0x2c0   :  { %3949 = vmatmul.mubr.msk.f32.gmra.mrb[16].mxu1 %vm7977_vm2, %v18_v54  ;;  %v154_v54 = vld [vmem:[%s7974_s2 + $0x2d8] sm:$0xff] }
 0x2c1   :  { %723 = vmatprep.mubr.f32.mxu1 %v7979_v20 }
 0x2c4   :  { %3950 = vmatmul.mubr.msk.f32.gmra.mrb[18].mxu1 %vm7977_vm2, %v19_v59  ;;  %v6297_v59 = vpack.c.bf16 %v149_v42, %v147_v18 }
 0x2c5   :  { %729 = vmatprep.mubr.f32.mxu1 %v7979_v20 }
 0x2c8   :  { %3951 = vmatmul.mubr.msk.f32.gmra.mrb[20].mxu1 %vm7977_vm2, %v20_v3  ;;  %v6300_v3 = vpack.c.bf16 %v154_v54, %v152_v43  ;;  %v6419_v43 = vld [vmem:[%s7973_s0 + $0xb0] sm:$0xff] }
 0x2c9   :  { %735 = vmatprep.mubr.f32.mxu1 %v7979_v20  ;;  %8041 = vst [vmem:[#allocation9_spill] sm:$0xff] %v6419_v43  ;;  %vm44_vm15 = vcmp.gt.f32.partialorder %v6419_v43, 0.0 }
 0x2cc   :  { %3952 = vmatmul.mubr.msk.f32.gmra.mrb[22].mxu1 %vm7977_vm2, %v21_v44  ;;  %v151_v44 = vld [vmem:[%s7974_s2 + $0x2c0] sm:$0xff] }
 0x2cd   :  { %806 = vmatprep.mubr.f32.mxu1 %v7979_v20 }
 0x2d0   :  { %3953 = vmatmul.mubr.msk.f32.vlgmr.msra.gmra.mrb[8].mxu1 %vm7978_vm1, %v5949_v22  ;;  %v138_v22 = vld [vmem:[%s7974_s2 + $0x258] sm:$0xff] }
 0x2d1   :  { %4983 = vmatpush3.bf16.msra.mxu1 %v4982_v4  ;;  %812 = vmatprep.mubr.f32.mxu1 %v7979_v20  ;;  %v8025_v4 = vpack.c.bf16 %v5921_v53, %v5929_v0  ;;  %v127_v53 = vld [vmem:[%s7974_s2 + $0x200] sm:$0xff] }
 0x2d2   :  { %4985 = vmatprep.subr.bf16.mxu1 %v4984_v25  ;;  %v121_v25 = vld [vmem:[%s7974_s2 + $0x1d0] sm:$0xff]  ;;  %v6207_v0 = vpack.c.bf16 %v129_v58, %v127_v53  ;;  %v6375_v53 = vld [vmem:[%s7973_s0 + $0x88] sm:$0xff] }
 0x2d3   :  { %v6171_v30 = vpack.c.bf16 %v121_v25, %v119_v17  ;;  %v164_v17 = vld [vmem:[%s7974_s2 + $0x328] sm:$0xff]  ;;  %v166_v25 = vld [vmem:[%s7974_s2 + $0x338] sm:$0xff]  ;;  %vm39_vm6 = vcmp.gt.f32.partialorder %v6375_v53, 0.0 }
 0x2d4   :  { %3954 = vmatmul.mubr.msk.f32.gmra.mrb[10].mxu1 %vm7978_vm1, %v5947_v21  ;;  %v136_v21 = vld [vmem:[%s7974_s2 + $0x248] sm:$0xff] }
 0x2d5   :  { %4987 = vmatpush3.bf16.msra.mxu1 %v4986_v26  ;;  %818 = vmatprep.mubr.f32.mxu1 %v7979_v20  ;;  %v124_v26 = vld [vmem:[%s7974_s2 + $0x1e8] sm:$0xff] }
 0x2d6   :  { %4989 = vmatprep.subr.bf16.mxu1 %v4988_v47  ;;  %v6173_v34 = vpack.c.bf16 %v126_v29, %v124_v26  ;;  %4919 = vmatpush1.bf16.msra.mxu0 %v6171_v30  ;;  %v6192_v47 = vpack.c.bf16 %v130_v39, %v128_v37  ;;  %v6351_v26 = vpack.c.bf16 %v161_v15, %v159_v13  ;;  %v6370_v39 = vld [vmem:[%s7973_s0 + $0x80] sm:$0xff] }
 0x2d7   :  { %v6354_v29 = vpack.c.bf16 %v166_v25, %v164_v17  ;;  %v6363_v37 = vpack.c.bf16 %v165_v36, %v163_v35  ;;  %vm38_vm4 = vcmp.gt.f32.partialorder %v6370_v39, 0.0  ;;  %v6441_v15 = vld [vmem:[%s7973_s0 + $0xc0] sm:$0xff] }
 0x2d8   :  { %3955 = vmatmul.mubr.msk.f32.gmra.mrb[12].mxu1 %vm7978_vm1, %v5956_v24  ;;  %4921 = vmatprep.subr.bf16.mxu0 %v6173_v34  ;;  %v6228_v24 = vpack.c.bf16 %v138_v22, %v136_v21  ;;  %8036 = vst [vmem:[#allocation4_spill] sm:$0xff] %v6351_v26  ;;  %v6387_v22 = vld [vmem:[%s7973_s0 + $0x98] sm:$0xff]  ;;  %8043 = vst [vmem:[#allocation11_spill] sm:$0xff] %v6441_v15 }
 0x2d9   :  { %4991 = vmatpush3.bf16.msra.mxu1 %v8023_v49  ;;  %824 = vmatprep.mubr.f32.mxu1 %v7979_v20  ;;  %v153_v49 = vld [vmem:[%s7974_s2 + $0x2d0] sm:$0xff]  ;;  %8037 = vst [vmem:[#allocation5_spill] sm:$0xff] %v6354_v29  ;;  %8038 = vst [vmem:[#allocation6_spill] sm:$0xff] %v6363_v37  ;;  %vm41_vm10 = vcmp.gt.f32.partialorder %v6387_v22, 0.0 }
 0x2da   :  { %4993 = vmatprep.subr.bf16.mxu1 %v8024_v56  ;;  %4923 = vmatpush1.bf16.msra.mxu0 %v6189_v41  ;;  %v156_v56 = vld [vmem:[%s7974_s2 + $0x2e8] sm:$0xff] }
 0x2db   :  { %4925 = vmatprep.subr.bf16.mxu0 %v6192_v47 }
 0x2dc   :  { %3956 = vmatmul.mubr.msk.f32.gmra.mrb[14].mxu1 %vm7978_vm1, %v5954_v23  ;;  %v6225_v23 = vpack.c.bf16 %v133_v9, %v131_v2  ;;  %v6381_v2 = vld [vmem:[%s7973_s0 + $0x90] sm:$0xff] }
 0x2dd   :  { %4995 = vmatpush3.bf16.msra.mxu1 %v8025_v4  ;;  %830 = vmatprep.mubr.f32.mxu1 %v7979_v20  ;;  %v158_v4 = vld [vmem:[%s7974_s2 + $0x2f8] sm:$0xff]  ;;  %vm40_vm7 = vcmp.gt.f32.partialorder %v6381_v2, 0.0 }
 0x2de   :  { %4997 = vmatprep.subr.bf16.mxu1 %v8026_v7  ;;  %4927 = vmatpush1.bf16.msra.mxu0 %v6207_v0  ;;  %v6315_v7 = vpack.c.bf16 %v153_v49, %v151_v44 }
 0x2df   :  { %4929 = vmatprep.subr.bf16.mxu0 %v6210_v1 }
 0x2e0   :  { %3957 = vmatmul.mubr.msk.f32.gmra.mrb[16].mxu1 %vm7978_vm1, %v5963_v32  ;;  %v137_v32 = vld [vmem:[%s7974_s2 + $0x250] sm:$0xff] }
 0x2e1   :  { %4999 = vmatpush3.bf16.msra.mxu1 %v8027_v12  ;;  %836 = vmatprep.mubr.f32.mxu1 %v7979_v20  ;;  %v6318_v12 = vpack.c.bf16 %v158_v4, %v156_v56 }
 0x2e2   :  { %5001 = vmatprep.subr.bf16.mxu1 %v8028_v14  ;;  %4931 = vmatpush1.bf16.msra.mxu0 %v6225_v23  ;;  %v155_v14 = vld [vmem:[%s7974_s2 + $0x2e0] sm:$0xff] }
 0x2e3   :  { %4933 = vmatprep.subr.bf16.mxu0 %v6228_v24 }
 0x2e4   :  { %3958 = vmatmul.mubr.msk.f32.gmra.mrb[18].mxu1 %vm7978_vm1, %v5961_v31  ;;  %v135_v31 = vld [vmem:[%s7974_s2 + $0x240] sm:$0xff] }
 0x2e5   :  { %5003 = vmatpush3.bf16.msra.mxu1 %v8029_v55  ;;  %842 = vmatprep.mubr.f32.mxu1 %v7979_v20  ;;  %v6243_v6 = vpack.c.bf16 %v137_v32, %v135_v31  ;;  %v157_v55 = vld [vmem:[%s7974_s2 + $0x2f0] sm:$0xff] }
 0x2e6   :  { %5005 = vmatprep.subr.bf16.mxu1 %v8030_v61  ;;  %v160_v61 = vld [vmem:[%s7974_s2 + $0x308] sm:$0xff] }
 0x2e7   :  { %4935 = vmatpush1.bf16.msra.mxu0 %v6243_v6 }
 0x2e8   :  { %3959 = vmatmul.mubr.msk.f32.gmra.mrb[20].mxu1 %vm7978_vm1, %v5970_v38  ;;  %v142_v38 = vld [vmem:[%s7974_s2 + $0x278] sm:$0xff] }
 0x2e9   :  { %5007 = vmatpush3.bf16.msra.mxu1 %v8031_v50  ;;  %848 = vmatprep.mubr.f32.mxu1 %v7979_v20  ;;  %v162_v50 = vld [vmem:[%s7974_s2 + $0x318] sm:$0xff] }
 0x2ea   :  { %5009 = vmatprep.subr.bf16.mxu1 %v8032_v57  ;;  %v6333_v57 = vpack.c.bf16 %v157_v55, %v155_v14  ;;  %v6431_v55 = vld [vmem:[%s7973_s0 + $0xb8] sm:$0xff] }
 0x2eb   :  { %8042 = vst [vmem:[#allocation10_spill] sm:$0xff] %v6431_v55 }
 0x2ec   :  { %3960 = vmatmul.mubr.msk.f32.gmra.mrb[22].mxu1 %vm7978_vm1, %v5968_v33  ;;  %v140_v33 = vld [vmem:[%s7974_s2 + $0x268] sm:$0xff]  ;;  %8034 = vst [vmem:[#allocation2_spill] sm:$0xff] %v6333_v57 }
 0x2ed   :  { %5011 = vmatpush3.bf16.msra.mxu1 %v8033_v8  ;;  %v6246_v45 = vpack.c.bf16 %v142_v38, %v140_v33  ;;  %v6336_v8 = vpack.c.bf16 %v162_v50, %v160_v61  ;;  %v6397_v38 = vld [vmem:[%s7973_s0 + $0xa0] sm:$0xff] }
 0x2ee   :  { %8039 = vst [vmem:[#allocation7_spill] sm:$0xff] %v6397_v38  ;;  %vm42_vm11 = vcmp.gt.f32.partialorder %v6397_v38, 0.0 }
 0x2ef   :  { %4937 = vmatprep.subr.bf16.mxu0 %v6246_v45  ;;  %8035 = vst [vmem:[#allocation3_spill] sm:$0xff] %v6336_v8 }
 0x2f0   :  { %4939 = vmatpush1.bf16.msra.mxu0 %v6261_v48 }
 0x2f1   :  { %4941 = vmatprep.subr.bf16.mxu0 %v6264_v10 }
 0x2f4   :  { %4943 = vmatpush1.bf16.msra.mxu0 %v6279_v52 }
 0x2f5   :  { %4945 = vmatprep.subr.bf16.mxu0 %v6282_v16 }
 0x2f8   :  { %4947 = vmatpush1.bf16.msra.mxu0 %v6297_v59 }
 0x2f9   :  { %4949 = vmatprep.subr.bf16.mxu0 %v6300_v3 }
 0x2fc   :  { %4951 = vmatpush1.bf16.msra.mxu0 %v6315_v7 }
 0x2fd   :  { %4953 = vmatprep.subr.bf16.mxu0 %v6318_v12 }
 0x300   :  { %4955 = vmatpush1.bf16.msra.mxu0 %v6333_v57 }
 0x301   :  { %4957 = vmatprep.subr.bf16.mxu0 %v6336_v8  ;;  %v182_v8 = vld [vmem:[%s7974_s2 + $0x3b8] sm:$0xff] }
 0x304   :  { %4959 = vmatpush1.bf16.msra.mxu0 %v6351_v26  ;;  %v180_v26 = vld [vmem:[%s7974_s2 + $0x3a8] sm:$0xff] }
 0x305   :  { %4961 = vmatprep.subr.bf16.mxu0 %v6354_v29 }
 0x308   :  { %4963 = vmatpush1.bf16.msra.mxu0 %v6363_v37 }
 0x3a3   :  { %v808_v58 = vpop.f32.mrb[8].mxu1 }
 0x3a4   :  { %vm855_vm3 = vcmp.gt.f32.partialorder %v808_v58, 0.0  ;;  %v871_v62 = vmul.f32 0.2, %v808_v58  ;;  %v810_v63 = vpop.f32.mrb[9].mxu1 }
 0x3a5   :  { %vm856_vm5 = vcmp.gt.f32.partialorder %v810_v63, 0.0  ;;  %v872_v9 = vmul.f32 0.2, %v810_v63 }
 0x3a6   :  { %v887_v21 = vsel %vm855_vm3, %v808_v58, %v871_v62 }
 0x3a7   :  { %v814_v31 = vpop.f32.mrb[10].mxu1  ;;  %v888_v32 = vsel %vm856_vm5, %v810_v63, %v872_v9  ;;  %v6391_v33 = vsel %vm38_vm4, %v887_v21, -1e+30  ;;  %v6453_v63 = vld [vmem:[%s7973_s0 + $0xc8] sm:$0xff] }
 0x3a8   :  { %vm857_vm8 = vcmp.gt.f32.partialorder %v814_v31, 0.0  ;;  %v873_v46 = vmul.f32 0.2, %v814_v31  ;;  %v816_v60 = vpop.f32.mrb[11].mxu1  ;;  %v6401_v27 = vsel %vm39_vm6, %v888_v32, -1e+30 }
 0x3a9   :  { %vm858_vm9 = vcmp.gt.f32.partialorder %v816_v60, 0.0  ;;  %v874_v5 = vmul.f32 0.2, %v816_v60  ;;  %v919_v11 = vmax.f32 %v6391_v33, %v6401_v27  ;;  %8044 = vst [vmem:[#allocation12_spill] sm:$0xff] %v6453_v63  ;;  %v6463_v32 = vld [vmem:[%s7973_s0 + $0xd0] sm:$0xff] }
 0x3aa   :  { %v889_v40 = vsel %vm857_vm8, %v814_v31, %v873_v46  ;;  %vm45_vm8 = vcmp.gt.f32.partialorder %v6431_v55, 0.0  ;;  %8045 = vst [vmem:[#allocation13_spill] sm:$0xff] %v6463_v32 }
 0x3ab   :  { %v820_v51 = vpop.f32.mrb[12].mxu1  ;;  %920 = vmax.xlane.f32.xlu0 %v919_v11  ;;  %v890_v18 = vsel %vm858_vm9, %v816_v60, %v874_v5  ;;  %v6413_v42 = vsel %vm40_vm7, %v889_v40, -1e+30  ;;  %vm8022_vm9 = vcmp.gt.f32.partialorder %v6441_v15, 0.0 }
 0x3ac   :  { %vm859_vm12 = vcmp.gt.f32.partialorder %v820_v51, 0.0  ;;  %v875_v54 = vmul.f32 0.2, %v820_v51  ;;  %v822_v44 = vpop.f32.mrb[13].mxu1  ;;  %v6423_v49 = vsel %vm41_vm10, %v890_v18, -1e+30 }
 0x3ad   :  { %vm860_vm13 = vcmp.gt.f32.partialorder %v822_v44, 0.0  ;;  %v876_v56 = vmul.f32 0.2, %v822_v44  ;;  %v922_v4 = vmax.f32 %v6413_v42, %v6423_v49  ;;  %v6475_v18 = vld [vmem:[%s7973_s0 + $0xd8] sm:$0xff] }
 0x3ae   :  { %v891_v14 = vsel %vm859_vm12, %v820_v51, %v875_v54  ;;  %8046 = vst [vmem:[#allocation14_spill] sm:$0xff] %v6475_v18  ;;  %vm49_vm0 = vcmp.gt.f32.partialorder %v6475_v18, 0.0 }
 0x3af   :  { %v826_v61 = vpop.f32.mrb[14].mxu1  ;;  %923 = vmax.xlane.f32.xlu0 %v922_v4  ;;  %v892_v50 = vsel %vm860_vm13, %v822_v44, %v876_v56  ;;  %v6435_v13 = vsel %vm42_vm11, %v891_v14, -1e+30  ;;  %v6485_v4 = vld [vmem:[%s7973_s0 + $0xe0] sm:$0xff]  ;;  %v168_v14 = vld [vmem:[%s7974_s2 + $0x348] sm:$0xff] }
 0x3b0   :  { %vm861_vm3 = vcmp.gt.f32.partialorder %v826_v61, 0.0  ;;  %v877_v17 = vmul.f32 0.2, %v826_v61  ;;  %v828_v25 = vpop.f32.mrb[15].mxu1  ;;  %v6445_v35 = vsel %vm43_vm14, %v892_v50, -1e+30 }
 0x3b1   :  { %vm862_vm5 = vcmp.gt.f32.partialorder %v828_v25, 0.0  ;;  %v878_v36 = vmul.f32 0.2, %v828_v25  ;;  %v925_v58 = vmax.f32 %v6435_v13, %v6445_v35  ;;  %8047 = vst [vmem:[#allocation15_spill] sm:$0xff] %v6485_v4  ;;  %vm7985_vm2 = vcmp.gt.f32.partialorder %v6485_v4, 0.0 }
 0x3b2   :  { %v893_v62 = vsel %vm861_vm3, %v826_v61, %v877_v17  ;;  %vm47_vm3 = vcmp.gt.f32.partialorder %v6453_v63, 0.0  ;;  %v170_v61 = vld [vmem:[%s7974_s2 + $0x358] sm:$0xff] }
 0x3b3   :  { %v832_v9 = vpop.f32.mrb[16].mxu1  ;;  %926 = vmax.xlane.f32.xlu1 %v925_v58  ;;  %v894_v21 = vsel %vm862_vm5, %v828_v25, %v878_v36  ;;  %v6457_v31 = vsel %vm44_vm15, %v893_v62, -1e+30  ;;  %vm7984_vm5 = vcmp.gt.f32.partialorder %v6463_v32, 0.0  ;;  %v6497_v36 = vpack.c.bf16 %v170_v61, %v168_v14  ;;  %v172_v14 = vld [vmem:[%s7974_s2 + $0x368] sm:$0xff]  ;;  %v174_v61 = vld [vmem:[%s7974_s2 + $0x378] sm:$0xff] }
 0x3b4   :  { %vm863_vm12 = vcmp.gt.f32.partialorder %v832_v9, 0.0  ;;  %v879_v46 = vmul.f32 0.2, %v832_v9  ;;  %v834_v60 = vpop.f32.mrb[17].mxu1  ;;  %v6467_v5 = vsel %vm45_vm8, %v894_v21, -1e+30 }
 0x3b5   :  { %vm864_vm13 = vcmp.gt.f32.partialorder %v834_v60, 0.0  ;;  %v880_v11 = vmul.f32 0.2, %v834_v60  ;;  %v928_v40 = vmax.f32 %v6457_v31, %v6467_v5  ;;  %8048 = vst [vmem:[#allocation16_spill] sm:$0xff] %v6497_v36  ;;  %v169_v21 = vld [vmem:[%s7974_s2 + $0x350] sm:$0xff]  ;;  %4965 = vmatprep.subr.bf16.mxu0 %v6497_v36 }
 0x3b6   :  { %v895_v51 = vsel %vm863_vm12, %v832_v9, %v879_v46  ;;  %v167_v9 = vld [vmem:[%s7974_s2 + $0x340] sm:$0xff] }
 0x3b7   :  { %v838_v54 = vpop.f32.mrb[18].mxu1  ;;  %929 = vmax.xlane.f32.xlu1 %v928_v40  ;;  %v896_v44 = vsel %vm864_vm13, %v834_v60, %v880_v11  ;;  %v6480_v56 = vsel %vm8022_vm9, %v895_v51, -1e+30  ;;  %v6511_v60 = vld [vmem:[%s7973_s0 + $0xe8] sm:$0xff]  ;;  %v6515_v11 = vpack.c.bf16 %v169_v21, %v167_v9 }
 0x3b8   :  { %vm865_vm12 = vcmp.gt.f32.partialorder %v838_v54, 0.0  ;;  %v881_v50 = vmul.f32 0.2, %v838_v54  ;;  %v840_v17 = vpop.f32.mrb[19].mxu1  ;;  %v6495_v25 = vsel %vm47_vm3, %v896_v44, -1e+30 }
 0x3b9   :  { %vm866_vm13 = vcmp.gt.f32.partialorder %v840_v17, 0.0  ;;  %v882_v58 = vmul.f32 0.2, %v840_v17  ;;  %v931_v62 = vmax.f32 %v6480_v56, %v6495_v25  ;;  %8049 = vst [vmem:[#allocation17_spill] sm:$0xff] %v6511_v60  ;;  %8050 = vst [vmem:[#allocation18_spill] sm:$0xff] %v6515_v11  ;;  %4967 = vmatpush1.bf16.msra.mxu0 %v6515_v11  ;;  %vm51_vm1 = vcmp.gt.f32.partialorder %v6511_v60, 0.0 }
 0x3ba   :  { %v897_v46 = vsel %vm865_vm12, %v838_v54, %v881_v50  ;;  %v6524_v54 = vld [vmem:[%s7973_s0 + $0xf0] sm:$0xff] }
 0x3bb   :  { %v844_v40 = vpop.f32.mrb[20].mxu1  ;;  %932 = vmax.xlane.f32.xlu0 %v931_v62  ;;  %v898_v51 = vsel %vm866_vm13, %v840_v17, %v882_v58  ;;  %v6519_v44 = vsel %vm7984_vm5, %v897_v46, -1e+30  ;;  %8051 = vst [vmem:[#allocation19_spill] sm:$0xff] %v6524_v54  ;;  %v6537_v62 = vpack.c.bf16 %v174_v61, %v172_v14  ;;  %v171_v46 = vld [vmem:[%s7974_s2 + $0x360] sm:$0xff]  ;;  %v6551_v14 = vld [vmem:[%s7973_s0 + $0xf8] sm:$0xff] }
 0x3bc   :  { %vm867_vm12 = vcmp.gt.f32.partialorder %v844_v40, 0.0  ;;  %v883_v50 = vmul.f32 0.2, %v844_v40  ;;  %v846_v17 = vpop.f32.mrb[21].mxu1  ;;  %v6534_v58 = vsel %vm49_vm0, %v898_v51, -1e+30 }
 0x3bd   :  { %8052 = vst [vmem:[#allocation20_spill] sm:$0xff] %v6537_v62  ;;  %vm868_vm13 = vcmp.gt.f32.partialorder %v846_v17, 0.0  ;;  %v884_v9 = vmul.f32 0.2, %v846_v17  ;;  %v934_v21 = vmax.f32 %v6519_v44, %v6534_v58  ;;  %v173_v51 = vld [vmem:[%s7974_s2 + $0x370] sm:$0xff]  ;;  %8053 = vst [vmem:[#allocation21_spill] sm:$0xff] %v6551_v14  ;;  %4969 = vmatprep.subr.bf16.mxu0 %v6537_v62 }
 0x3be   :  { %v899_v20 = vsel %vm867_vm12, %v844_v40, %v883_v50  ;;  %v6554_v61 = vpack.c.bf16 %v173_v51, %v171_v46  ;;  %vm7997_vm5 = vcmp.gt.f32.partialorder %v6524_v54, 0.0  ;;  %v176_v40 = vld [vmem:[%s7974_s2 + $0x388] sm:$0xff]  ;;  %v178_v50 = vld [vmem:[%s7974_s2 + $0x398] sm:$0xff]  ;;  %v175_v62 = vld [vmem:[%s7974_s2 + $0x380] sm:$0xff] }
 0x3bf   :  { %v850_v11 = vpop.f32.mrb[22].mxu1  ;;  %935 = vmax.xlane.f32.xlu1 %v934_v21  ;;  %v900_v36 = vsel %vm868_vm13, %v846_v17, %v884_v9  ;;  %v6558_v37 = vsel %vm7985_vm2, %v899_v20, -1e+30  ;;  %v6572_v20 = vpack.c.bf16 %v178_v50, %v176_v40  ;;  %vm7996_vm2 = vcmp.gt.f32.partialorder %v6551_v14, 0.0  ;;  %v5592_v54 = vld [vmem:[%s7974_s2 + $0x530] sm:$0xff] }
 0x3c0   :  { %8054 = vst [vmem:[#allocation22_spill] sm:$0xff] %v6554_v61  ;;  %vm869_vm12 = vcmp.gt.f32.partialorder %v850_v11, 0.0  ;;  %v885_v46 = vmul.f32 0.2, %v850_v11  ;;  %v852_v51 = vpop.f32.mrb[23].mxu1  ;;  %4971 = vmatpush1.bf16.msra.mxu0 %v6554_v61 }
 0x3c1   :  { %v6569_v17 = vsel %vm51_vm1, %v900_v36, -1e+30  ;;  %8055 = vst [vmem:[#allocation23_spill] sm:$0xff] %v6572_v20  ;;  %vm870_vm13 = vcmp.gt.f32.partialorder %v852_v51, 0.0  ;;  %v886_v9 = vmul.f32 0.2, %v852_v51  ;;  %4973 = vmatprep.subr.bf16.mxu0 %v6572_v20 }
 0x3c2   :  { %v937_v21 = vmax.f32 %v6558_v37, %v6569_v17  ;;  %v177_v36 = vld [vmem:[%s7974_s2 + $0x390] sm:$0xff]  ;;  %v901_v29 = vsel %vm869_vm12, %v850_v11, %v885_v46  ;;  %vm8059_vm12 = vcmp.gt.f32.partialorder %v6463_v32, 0.0 }
 0x3c3   :  { %v6584_v40 = vpack.c.bf16 %v177_v36, %v175_v62  ;;  %v902_v50 = vsel %vm870_vm13, %v852_v51, %v886_v9  ;;  %v6588_v61 = vsel %vm7997_vm5, %v901_v29, -1e+30  ;;  %v6601_v62 = vpack.c.bf16 %v182_v8, %v180_v26  ;;  %v179_v29 = vld [vmem:[%s7974_s2 + $0x3a0] sm:$0xff]  ;;  %v181_v46 = vld [vmem:[%s7974_s2 + $0x3b0] sm:$0xff] }
 0x3c4   :  { %938 = vmax.xlane.f32.xlu0 %v937_v21  ;;  %v6598_v11 = vsel %vm7996_vm2, %v902_v50, -1e+30  ;;  %v6611_v9 = vpack.c.bf16 %v181_v46, %v179_v29  ;;  %vm8060_vm13 = vcmp.gt.f32.partialorder %v6485_v4, 0.0  ;;  %v5590_v4 = vld [vmem:[%s7974_s2 + $0x430] sm:$0xff] }
 0x3c5   :  { %8056 = vst [vmem:[#allocation24_spill] sm:$0xff] %v6584_v40  ;;  %4975 = vmatpush1.bf16.msra.mxu0 %v6584_v40  ;;  %8057 = vst [vmem:[#allocation25_spill] sm:$0xff] %v6601_v62  ;;  %v940_v51 = vmax.f32 %v6588_v61, %v6598_v11 }
 0x3c6   :  { %8058 = vst [vmem:[#allocation26_spill] sm:$0xff] %v6611_v9  ;;  %4977 = vmatprep.subr.bf16.mxu0 %v6601_v62 }
 0x3c7   :  { %941 = vmax.xlane.f32.xlu1 %v940_v51 }
 0x3c9   :  { %4979 = vmatpush1.bf16.msra.mxu0 %v6611_v9 }
 0x438   :  { %v921_v8 = vpop.xlane.xlu0 %920 }
 0x439   :  { %v943_v26 = vsub.f32 %v6391_v33, %v921_v8  ;;  %v944_v21 = vsub.f32 %v6401_v27, %v921_v8 }
 0x43b   :  { %v959_v36 = vmul.f32 1.442695, %v943_v26  ;;  %v961_v50 = vmul.f32 1.442695, %v944_v21 }
 0x43c   :  { %v924_v40 = vpop.xlane.xlu0 %923 }
 0x43d   :  { %5368 = vpow2.f32 %v959_v36  ;;  %v945_v20 = vsub.f32 %v6413_v42, %v924_v40  ;;  %v946_v57 = vsub.f32 %v6423_v49, %v924_v40 }
 0x43e   :  { %5370 = vpow2.f32 %v961_v50 }
 0x43f   :  { %v963_v29 = vmul.f32 1.442695, %v945_v20  ;;  %v965_v46 = vmul.f32 1.442695, %v946_v57 }
 0x440   :  { %v927_v62 = vpop.xlane.xlu1 %926 }
 0x441   :  { %5372 = vpow2.f32 %v963_v29  ;;  %v947_v51 = vsub.f32 %v6435_v13, %v927_v62  ;;  %v948_v9 = vsub.f32 %v6445_v35, %v927_v62 }
 0x442   :  { %5374 = vpow2.f32 %v965_v46 }
 0x443   :  { %v967_v33 = vmul.f32 1.442695, %v947_v51  ;;  %v969_v27 = vmul.f32 1.442695, %v948_v9 }
 0x444   :  { %v930_v8 = vpop.xlane.xlu1 %929 }
 0x445   :  { %5376 = vpow2.f32 %v967_v33  ;;  %v949_v26 = vsub.f32 %v6457_v31, %v930_v8  ;;  %v950_v42 = vsub.f32 %v6467_v5, %v930_v8 }
 0x446   :  { %5378 = vpow2.f32 %v969_v27 }
 0x447   :  { %v6623_v49 = vpop.eup %5368  ;;  %v971_v20 = vmul.f32 1.442695, %v949_v26  ;;  %v973_v57 = vmul.f32 1.442695, %v950_v42 }
 0x448   :  { %v6625_v40 = vpop.eup %5370  ;;  %v933_v21 = vpop.xlane.xlu0 %932 }
 0x449   :  { %5380 = vpow2.f32 %v971_v20  ;;  %3961 = vmatprep.mubr.msk.f32.mxu0 %vm39_vm6, %v6625_v40  ;;  %v951_v13 = vsub.f32 %v6480_v56, %v933_v21  ;;  %v952_v35 = vsub.f32 %v6495_v25, %v933_v21 }
 0x44a   :  { %5382 = vpow2.f32 %v973_v57  ;;  %3962 = vmatmul.mubr.msk.f32.vlgmr.msra.gmra.mrb[24].mxu0 %vm38_vm4, %v6623_v49 }
 0x44b   :  { %v6635_v31 = vpop.eup %5372  ;;  %v975_v5 = vmul.f32 1.442695, %v951_v13  ;;  %v977_v62 = vmul.f32 1.442695, %v952_v35 }
 0x44c   :  { %v6637_v9 = vpop.eup %5374  ;;  %v936_v36 = vpop.xlane.xlu1 %935 }
 0x44d   :  { %5384 = vpow2.f32 %v975_v5  ;;  %v953_v50 = vsub.f32 %v6519_v44, %v936_v36  ;;  %v954_v29 = vsub.f32 %v6534_v58, %v936_v36  ;;  %3963 = vmatprep.mubr.msk.f32.mxu0 %vm41_vm10, %v6637_v9 }
 0x44e   :  { %5386 = vpow2.f32 %v977_v62  ;;  %3964 = vmatmul.mubr.msk.f32.gmra.mrb[26].mxu0 %vm40_vm7, %v6635_v31 }
 0x44f   :  { %v6647_v56 = vpop.eup %5376  ;;  %v979_v25 = vmul.f32 1.442695, %v953_v50  ;;  %v981_v46 = vmul.f32 1.442695, %v954_v29  ;;  %v1333_v29 = vld [vmem:[%s7972_s1 + $0x20] sm:$0xff] }
 0x450   :  { %v6649_v51 = vpop.eup %5378 }
 0x451   :  { %v939_v33 = vpop.xlane.xlu0 %938  ;;  %5388 = vpow2.f32 %v979_v25  ;;  %3965 = vmatprep.mubr.msk.f32.mxu0 %vm43_vm14, %v6649_v51  ;;  %v1334_v25 = vld [vmem:[%s7972_s1 + $0x28] sm:$0xff] }
 0x452   :  { %v955_v44 = vsub.f32 %v6558_v37, %v939_v33  ;;  %v956_v58 = vsub.f32 %v6569_v17, %v939_v33  ;;  %5390 = vpow2.f32 %v981_v46  ;;  %3966 = vmatmul.mubr.msk.f32.gmra.mrb[28].mxu0 %vm42_vm11, %v6647_v56  ;;  %v1335_v46 = vld [vmem:[%s7972_s1 + $0x30] sm:$0xff]  ;;  %v5012_v33 = vpack.c.bf16 %v1334_v25, %v1333_v29 }
 0x453   :  { %v6659_v27 = vpop.eup %5380  ;;  %v991_v29 = vsel %vm38_vm4, %v6623_v49, 0.0  ;;  %v994_v49 = vsel %vm41_vm10, %v6637_v9, 0.0 }
 0x454   :  { %v983_v8 = vmul.f32 1.442695, %v955_v44  ;;  %v985_v26 = vmul.f32 1.442695, %v956_v58  ;;  %v6661_v42 = vpop.eup %5382  ;;  %v942_v20 = vpop.xlane.xlu1 %941  ;;  %v1336_v44 = vld [vmem:[%s7972_s1 + $0x38] sm:$0xff]  ;;  %5013 = vmatprep.subr.bf16.mxu0 %v5012_v33 }
 0x455   :  { %v957_v57 = vsub.f32 %v6588_v61, %v942_v20  ;;  %v958_v21 = vsub.f32 %v6598_v11, %v942_v20  ;;  %3967 = vmatprep.mubr.msk.f32.mxu0 %vm45_vm8, %v6661_v42  ;;  %v5016_v58 = vpack.c.bf16 %v1336_v44, %v1335_v46  ;;  %5015 = vmatpush3.bf16.msra.mxu0 %v5012_v33  ;;  %v992_v44 = vsel %vm39_vm6, %v6625_v40, 0.0 }
 0x456   :  { %5392 = vpow2.f32 %v983_v8  ;;  %3968 = vmatmul.mubr.msk.f32.gmra.mrb[30].mxu0 %vm44_vm15, %v6659_v27 }
 0x457   :  { %5394 = vpow2.f32 %v985_v26  ;;  %v6671_v37 = vpop.eup %5384  ;;  %v987_v17 = vmul.f32 1.442695, %v957_v57  ;;  %v989_v13 = vmul.f32 1.442695, %v958_v21  ;;  %5017 = vmatprep.subr.bf16.mxu0 %v5016_v58 }
 0x458   :  { %v6673_v35 = vpop.eup %5386 }
 0x459   :  { %5396 = vpow2.f32 %v987_v17  ;;  %3969 = vmatprep.mubr.msk.f32.mxu0 %vm47_vm3, %v6673_v35  ;;  %5019 = vmatpush3.bf16.msra.mxu0 %v5016_v58 }
 0x45a   :  { %5398 = vpow2.f32 %v989_v13  ;;  %3970 = vmatmul.mubr.msk.f32.gmra.mrb[32].mxu0 %vm8022_vm9, %v6671_v37 }
 0x45b   :  { %v6681_v61 = vpop.eup %5388 }
 0x45c   :  { %v6683_v11 = vpop.eup %5390 }
 0x45d   :  { %3971 = vmatprep.mubr.msk.f32.mxu0 %vm49_vm0, %v6683_v11 }
 0x45e   :  { %3972 = vmatmul.mubr.msk.f32.gmra.mrb[34].mxu0 %vm8059_vm12, %v6681_v61 }
 0x460   :  { %v6691_v5 = vpop.eup %5392 }
 0x461   :  { %v6693_v62 = vpop.eup %5394 }
 0x462   :  { %3973 = vmatprep.mubr.msk.f32.mxu0 %vm51_vm1, %v6693_v62 }
 0x463   :  { %3974 = vmatmul.mubr.msk.f32.gmra.mrb[36].mxu0 %vm8060_vm13, %v6691_v5  ;;  %v6701_v36 = vpop.eup %5396 }
 0x464   :  { %v6703_v50 = vpop.eup %5398 }
 0x465   :  { %3975 = vmatprep.mubr.msk.f32.mxu0 %vm7996_vm2, %v6703_v50 }
 0x467   :  { %3976 = vmatmul.mubr.msk.f32.gmra.mrb[38].mxu0 %vm7997_vm5, %v6701_v36 }
 0x51d   :  { %v1073_v8 = vpop.f32.mrb[24].mxu0 }
 0x51e   :  { %5400 = vrcp.f32 %v1073_v8  ;;  %v1075_v26 = vpop.f32.mrb[25].mxu0 }
 0x51f   :  { %5402 = vrcp.f32 %v1075_v26 }
 0x521   :  { %v1079_v20 = vpop.f32.mrb[26].mxu0 }
 0x522   :  { %5404 = vrcp.f32 %v1079_v20  ;;  %v1081_v57 = vpop.f32.mrb[27].mxu0  ;;  %v993_v20 = vsel %vm40_vm7, %v6635_v31, 0.0 }
 0x523   :  { %5406 = vrcp.f32 %v1081_v57 }
 0x525   :  { %v1085_v21 = vpop.f32.mrb[28].mxu0 }
 0x526   :  { %5408 = vrcp.f32 %v1085_v21  ;;  %v1087_v17 = vpop.f32.mrb[29].mxu0 }
 0x527   :  { %5410 = vrcp.f32 %v1087_v17 }
 0x528   :  { %v5401_v13 = vpop.eup %5400 }
 0x529   :  { %v5403_v25 = vpop.eup %5402  ;;  %v1136_v46 = vmul.f32 %v5401_v13, %v991_v29  ;;  %v1091_v33 = vpop.f32.mrb[30].mxu0 }
 0x52a   :  { %5412 = vrcp.f32 %v1091_v33  ;;  %v1093_v58 = vpop.f32.mrb[31].mxu0  ;;  %v1137_v8 = vmul.f32 %v5403_v25, %v992_v44  ;;  %v995_v25 = vsel %vm42_vm11, %v6647_v56, 0.0 }
 0x52b   :  { %5414 = vrcp.f32 %v1093_v58 }
 0x52c   :  { %v5405_v26 = vpop.eup %5404  ;;  %1252 = vmatprep.mubr.f32.mxu1 %v1137_v8 }
 0x52d   :  { %v5407_v57 = vpop.eup %5406  ;;  %v1097_v21 = vpop.f32.mrb[32].mxu0  ;;  %1253 = vmatmul.mubr.f32.vlgmr.msra.gmra.mrb[24].mxu1 %v1136_v46  ;;  %v1138_v17 = vmul.f32 %v5405_v26, %v993_v20  ;;  %v996_v46 = vsel %vm43_vm14, %v6649_v51, 0.0  ;;  %v997_v26 = vsel %vm44_vm15, %v6659_v27, 0.0 }
 0x52e   :  { %5416 = vrcp.f32 %v1097_v21  ;;  %v1099_v40 = vpop.f32.mrb[33].mxu0  ;;  %v1139_v13 = vmul.f32 %v5407_v57, %v994_v49  ;;  %v998_v57 = vsel %vm45_vm8, %v6661_v42, 0.0 }
 0x52f   :  { %5418 = vrcp.f32 %v1099_v40  ;;  %v999_v40 = vsel %vm8022_vm9, %v6671_v37, 0.0  ;;  %v1002_v37 = vsel %vm49_vm0, %v6683_v11, 0.0  ;;  %v1005_v11 = vsel %vm7997_vm5, %v6701_v36, 0.0  ;;  %v1339_v36 = vld [vmem:[%s7972_s1 + $0x50] sm:$0xff] }
 0x530   :  { %v5409_v29 = vpop.eup %5408  ;;  %1257 = vmatprep.mubr.f32.mxu1 %v1139_v13 }
 0x531   :  { %v5411_v33 = vpop.eup %5410  ;;  %v1103_v31 = vpop.f32.mrb[34].mxu0  ;;  %1258 = vmatmul.mubr.f32.gmra.mrb[26].mxu1 %v1138_v17  ;;  %v1140_v44 = vmul.f32 %v5409_v29, %v995_v25  ;;  %v1000_v29 = vsel %vm47_vm3, %v6673_v35, 0.0 }
 0x532   :  { %5420 = vrcp.f32 %v1103_v31  ;;  %v1105_v9 = vpop.f32.mrb[35].mxu0  ;;  %v1141_v58 = vmul.f32 %v5411_v33, %v996_v46  ;;  %v1001_v46 = vsel %vm8059_vm12, %v6681_v61, 0.0  ;;  %v1004_v61 = vsel %vm51_vm1, %v6693_v62, 0.0  ;;  %v1337_v62 = vld [vmem:[%s7972_s1 + $0x40] sm:$0xff] }
 0x533   :  { %5422 = vrcp.f32 %v1105_v9 }
 0x534   :  { %v5413_v8 = vpop.eup %5412  ;;  %1262 = vmatprep.mubr.f32.mxu1 %v1141_v58 }
 0x535   :  { %v5415_v20 = vpop.eup %5414  ;;  %1263 = vmatmul.mubr.f32.gmra.mrb[28].mxu1 %v1140_v44  ;;  %v1142_v21 = vmul.f32 %v5413_v8, %v997_v26  ;;  %v1003_v8 = vsel %vm8060_vm13, %v6691_v5, 0.0  ;;  %v1006_v5 = vsel %vm7996_vm2, %v6703_v50, 0.0  ;;  %v1340_v50 = vld [vmem:[%s7972_s1 + $0x58] sm:$0xff] }
 0x536   :  { %v1109_v56 = vpop.f32.mrb[36].mxu0  ;;  %v1143_v49 = vmul.f32 %v5415_v20, %v998_v57 }
 0x537   :  { %5424 = vrcp.f32 %v1109_v56  ;;  %v1111_v51 = vpop.f32.mrb[37].mxu0 }
 0x538   :  { %5426 = vrcp.f32 %v1111_v51  ;;  %v5417_v17 = vpop.eup %5416  ;;  %1267 = vmatprep.mubr.f32.mxu1 %v1143_v49 }
 0x539   :  { %v5419_v13 = vpop.eup %5418  ;;  %1268 = vmatmul.mubr.f32.gmra.mrb[30].mxu1 %v1142_v21  ;;  %v1144_v25 = vmul.f32 %v5417_v17, %v999_v40  ;;  %v1338_v17 = vld [vmem:[%s7972_s1 + $0x48] sm:$0xff] }
 0x53a   :  { %v1115_v27 = vpop.f32.mrb[38].mxu0  ;;  %v1145_v33 = vmul.f32 %v5419_v13, %v1000_v29  ;;  %v5020_v40 = vpack.c.bf16 %v1338_v17, %v1337_v62  ;;  %v5024_v13 = vpack.c.bf16 %v1340_v50, %v1339_v36  ;;  %v1342_v29 = vld [vmem:[%s7972_s1 + $0x68] sm:$0xff]  ;;  %v1356_v62 = vld [vmem:[%s7972_s1 + $0x1d8] sm:$0xff] }
 0x53b   :  { %5428 = vrcp.f32 %v1115_v27  ;;  %v1117_v42 = vpop.f32.mrb[39].mxu0  ;;  %v1341_v27 = vld [vmem:[%s7972_s1 + $0x60] sm:$0xff]  ;;  %v1358_v36 = vld [vmem:[%s7972_s1 + $0x1e8] sm:$0xff] }
 0x53c   :  { %5430 = vrcp.f32 %v1117_v42  ;;  %v5421_v31 = vpop.eup %5420  ;;  %1272 = vmatprep.mubr.f32.mxu1 %v1145_v33  ;;  %5021 = vmatprep.subr.bf16.mxu0 %v5020_v40  ;;  %v1343_v42 = vld [vmem:[%s7972_s1 + $0x70] sm:$0xff]  ;;  %v1344_v33 = vld [vmem:[%s7972_s1 + $0x78] sm:$0xff] }
 0x53d   :  { %v5423_v44 = vpop.eup %5422  ;;  %1273 = vmatmul.mubr.f32.gmra.mrb[32].mxu1 %v1144_v25  ;;  %v1146_v9 = vmul.f32 %v5421_v31, %v1001_v46  ;;  %5023 = vmatpush3.bf16.msra.mxu0 %v5020_v40  ;;  %v5028_v25 = vpack.c.bf16 %v1342_v29, %v1341_v27  ;;  %v5032_v31 = vpack.c.bf16 %v1344_v33, %v1343_v42  ;;  %v1345_v46 = vld [vmem:[%s7972_s1 + $0x80] sm:$0xff]  ;;  %v1360_v27 = vld [vmem:[%s7972_s1 + $0x1f8] sm:$0xff]  ;;  %v1362_v42 = vld [vmem:[%s7972_s1 + $0x208] sm:$0xff] }
 0x53e   :  { %v1147_v58 = vmul.f32 %v5423_v44, %v1002_v37  ;;  %5025 = vmatprep.subr.bf16.mxu0 %v5024_v13  ;;  %v1346_v44 = vld [vmem:[%s7972_s1 + $0x88] sm:$0xff]  ;;  %v1357_v40 = vld [vmem:[%s7972_s1 + $0x1e0] sm:$0xff] }
 0x53f   :  { %v5036_v37 = vpack.c.bf16 %v1346_v44, %v1345_v46  ;;  %v5060_v50 = vpack.c.bf16 %v1358_v36, %v1357_v40  ;;  %v1364_v46 = vld [vmem:[%s7972_s1 + $0x218] sm:$0xff] }
 0x540   :  { %1277 = vmatprep.mubr.f32.mxu1 %v1147_v58  ;;  %v1348_v58 = vld [vmem:[%s7972_s1 + $0x98] sm:$0xff] }
 0x541   :  { %v5425_v35 = vpop.eup %5424  ;;  %1278 = vmatmul.mubr.f32.gmra.mrb[34].mxu1 %v1146_v9  ;;  %5027 = vmatpush3.bf16.msra.mxu0 %v5024_v13  ;;  %v1347_v9 = vld [vmem:[%s7972_s1 + $0x90] sm:$0xff] }
 0x542   :  { %v5427_v26 = vpop.eup %5426  ;;  %v1148_v20 = vmul.f32 %v5425_v35, %v1003_v8  ;;  %5029 = vmatprep.subr.bf16.mxu0 %v5028_v25  ;;  %v5040_v35 = vpack.c.bf16 %v1348_v58, %v1347_v9  ;;  %v5564_v8 = vld [vmem:[%s7974_s2 + $0x8] sm:$0xff]  ;;  %v1359_v13 = vld [vmem:[%s7972_s1 + $0x1f0] sm:$0xff]  ;;  %v6861_v9 = vld [vmem:[%s7972_s1 + $0x240] ss:$0 sm:$0xff] }
 0x543   :  { %v1149_v56 = vmul.f32 %v5427_v26, %v1004_v61  ;;  %v1349_v26 = vld [vmem:[%s7972_s1 + $0x1a0] sm:$0xff]  ;;  %v1350_v61 = vld [vmem:[%s7972_s1 + $0x1a8] sm:$0xff]  ;;  %v5064_v29 = vpack.c.bf16 %v1360_v27, %v1359_v13 }
 0x545   :  { %v5429_v57 = vpop.eup %5428  ;;  %1282 = vmatprep.mubr.f32.mxu1 %v1149_v56  ;;  %5031 = vmatpush3.bf16.msra.mxu0 %v5028_v25  ;;  %v5044_v56 = vpack.c.bf16 %v1350_v61, %v1349_v26  ;;  %v1361_v25 = vld [vmem:[%s7972_s1 + $0x200] sm:$0xff] }
 0x546   :  { %v5431_v21 = vpop.eup %5430  ;;  %1283 = vmatmul.mubr.f32.gmra.mrb[36].mxu1 %v1148_v20  ;;  %v1150_v51 = vmul.f32 %v5429_v57, %v1005_v11  ;;  %5033 = vmatprep.subr.bf16.mxu0 %v5032_v31  ;;  %v1351_v20 = vld [vmem:[%s7972_s1 + $0x1b0] sm:$0xff]  ;;  %v1352_v57 = vld [vmem:[%s7972_s1 + $0x1b8] sm:$0xff]  ;;  %v5068_v33 = vpack.c.bf16 %v1362_v42, %v1361_v25 }
 0x547   :  { %v1151_v49 = vmul.f32 %v5431_v21, %v1006_v5  ;;  %v5048_v11 = vpack.c.bf16 %v1352_v57, %v1351_v20  ;;  %v1353_v21 = vld [vmem:[%s7972_s1 + $0x1c0] sm:$0xff]  ;;  %v1354_v5 = vld [vmem:[%s7972_s1 + $0x1c8] sm:$0xff]  ;;  %5045 = vmatprep.subr.bf16.mxu1 %v5044_v56 }
 0x548   :  { %5047 = vmatpush3.bf16.msra.mxu1 %v5044_v56 }
 0x549   :  { %1287 = vmatprep.mubr.f32.mxu1 %v1151_v49  ;;  %5035 = vmatpush3.bf16.msra.mxu0 %v5032_v31  ;;  %v1355_v49 = vld [vmem:[%s7972_s1 + $0x1d0] sm:$0xff] }
 0x54a   :  { %1288 = vmatmul.mubr.f32.gmra.mrb[38].mxu1 %v1150_v51  ;;  %5037 = vmatprep.subr.bf16.mxu0 %v5036_v37  ;;  %v5052_v51 = vpack.c.bf16 %v1354_v5, %v1353_v21  ;;  %v5056_v17 = vpack.c.bf16 %v1356_v62, %v1355_v49  ;;  %v1363_v31 = vld [vmem:[%s7972_s1 + $0x210] sm:$0xff] }
 0x54b   :  { %5049 = vmatprep.subr.bf16.mxu1 %v5048_v11  ;;  %v5072_v44 = vpack.c.bf16 %v1364_v46, %v1363_v31 }
 0x54c   :  { %5051 = vmatpush3.bf16.msra.mxu1 %v5048_v11 }
 0x54d   :  { %5039 = vmatpush3.bf16.msra.mxu0 %v5036_v37  ;;  %5053 = vmatprep.subr.bf16.mxu1 %v5052_v51 }
 0x54e   :  { %5041 = vmatprep.subr.bf16.mxu0 %v5040_v35 }
 0x550   :  { %5055 = vmatpush3.bf16.msra.mxu1 %v5052_v51 }
 0x551   :  { %5043 = vmatpush3.bf16.msra.mxu0 %v5040_v35  ;;  %5057 = vmatprep.subr.bf16.mxu1 %v5056_v17 }
 0x552   :  { %1600 = vmatprep.subr.mxu0 %v5564_v8 }
 0x554   :  { %5059 = vmatpush3.bf16.msra.mxu1 %v5056_v17 }
 0x555   :  { %5061 = vmatprep.subr.bf16.mxu1 %v5060_v50 }
 0x558   :  { %5063 = vmatpush3.bf16.msra.mxu1 %v5060_v50 }
 0x559   :  { %5065 = vmatprep.subr.bf16.mxu1 %v5064_v29 }
 0x55c   :  { %5067 = vmatpush3.bf16.msra.mxu1 %v5064_v29 }
 0x55d   :  { %5069 = vmatprep.subr.bf16.mxu1 %v5068_v33 }
 0x560   :  { %5071 = vmatpush3.bf16.msra.mxu1 %v5068_v33 }
 0x561   :  { %5073 = vmatprep.subr.bf16.mxu1 %v5072_v44 }
 0x564   :  { %5075 = vmatpush3.bf16.msra.mxu1 %v5072_v44 }
 0x600   :  { %v4179_v37 = vpop.f32.mrb[24].mxu1 }
 0x601   :  { %v4180_v58 = vpop.f32.mrb[25].mxu1 }
 0x602   :  { %v4181_v35 = vadd.f32 %v4180_v58, %v4179_v37 }
 0x604   :  { %v1255_v8 = vadd.f32 %v4181_v35, %v6861_v9  ;;  %v4182_v26 = vpop.f32.mrb[26].mxu1 }
 0x605   :  { %v4183_v61 = vpop.f32.mrb[27].mxu1 }
 0x606   :  { %v1301_v20 = vmul.f32 1.442695, %v1255_v8  ;;  %v4184_v56 = vadd.f32 %v4183_v61, %v4182_v26  ;;  %vm1293_vm12 = vcmp.gt.f32.partialorder %v1255_v8, 0.0 }
 0x608   :  { %5432 = vpow2.f32 %v1301_v20  ;;  %v1260_v57 = vadd.f32 %v4184_v56, %v6861_v9  ;;  %v4185_v11 = vpop.f32.mrb[28].mxu1 }
 0x609   :  { %v4186_v21 = vpop.f32.mrb[29].mxu1 }
 0x60a   :  { %v1303_v5 = vmul.f32 1.442695, %v1260_v57  ;;  %v4187_v51 = vadd.f32 %v4186_v21, %v4185_v11  ;;  %vm1294_vm13 = vcmp.gt.f32.partialorder %v1260_v57, 0.0 }
 0x60c   :  { %5434 = vpow2.f32 %v1303_v5  ;;  %v1265_v49 = vadd.f32 %v4187_v51, %v6861_v9  ;;  %v4188_v62 = vpop.f32.mrb[30].mxu1 }
 0x60d   :  { %v4189_v17 = vpop.f32.mrb[31].mxu1 }
 0x60e   :  { %v1305_v40 = vmul.f32 1.442695, %v1265_v49  ;;  %v4190_v36 = vadd.f32 %v4189_v17, %v4188_v62 }
 0x610   :  { %5436 = vpow2.f32 %v1305_v40  ;;  %v1270_v50 = vadd.f32 %v4190_v36, %v6861_v9  ;;  %v4191_v13 = vpop.f32.mrb[32].mxu1 }
 0x611   :  { %v4192_v27 = vpop.f32.mrb[33].mxu1 }
 0x612   :  { %v5433_v29 = vpop.eup %5432  ;;  %v1307_v25 = vmul.f32 1.442695, %v1270_v50  ;;  %v4193_v42 = vadd.f32 %v4192_v27, %v4191_v13 }
 0x613   :  { %v3978_v33 = vadd.f32 -1.0, %v5433_v29 }
 0x614   :  { %5438 = vpow2.f32 %v1307_v25  ;;  %v1275_v31 = vadd.f32 %v4193_v42, %v6861_v9  ;;  %v4194_v46 = vpop.f32.mrb[34].mxu1 }
 0x615   :  { %v4195_v44 = vpop.f32.mrb[35].mxu1  ;;  %v1325_v37 = vsel %vm1293_vm12, %v1255_v8, %v3978_v33  ;;  %v5565_v8 = vld [vmem:[%s7974_s2] sm:$0xff]  ;;  %vm1295_vm12 = vcmp.gt.f32.partialorder %v1265_v49, 0.0 }
 0x616   :  { %v5435_v58 = vpop.eup %5434  ;;  %v1309_v35 = vmul.f32 1.442695, %v1275_v31  ;;  %v4196_v26 = vadd.f32 %v4195_v44, %v4194_v46  ;;  %4544 = vmatprep.mubr.f32.mxu0 %v1325_v37  ;;  %vm1297_vm2 = vcmp.gt.f32.partialorder %v1275_v31, 0.0 }
 0x617   :  { %v3979_v61 = vadd.f32 -1.0, %v5435_v58 }
 0x618   :  { %5440 = vpow2.f32 %v1309_v35  ;;  %v1280_v20 = vadd.f32 %v4196_v26, %v6861_v9 }
 0x619   :  { %v4197_v56 = vpop.f32.mrb[36].mxu1  ;;  %v1326_v21 = vsel %vm1294_vm13, %v1260_v57, %v3979_v61  ;;  %vm1296_vm13 = vcmp.gt.f32.partialorder %v1270_v50, 0.0 }
 0x61a   :  { %v4198_v11 = vpop.f32.mrb[37].mxu1  ;;  %v5437_v5 = vpop.eup %5436  ;;  %v1311_v51 = vmul.f32 1.442695, %v1280_v20  ;;  %4545 = vmatmul.mubr.f32.vlgmr.msra.gmra.mrb[40].mxu0 %v1326_v21 }
 0x61b   :  { %v4199_v62 = vadd.f32 %v4198_v11, %v4197_v56  ;;  %v3980_v17 = vadd.f32 -1.0, %v5437_v5  ;;  %1601 = vmatpush1.msra.mxu0 %v5565_v8  ;;  %v8061_v5 = vmov 0.0  }
 0x61c   :  { %5442 = vpow2.f32 %v1311_v51  ;;  %5093 = vmatprep.subr.bf16.mxu0 %v6160_v19 }
 0x61d   :  { %v1285_v40 = vadd.f32 %v4199_v62, %v6861_v9  ;;  %v4200_v36 = vpop.f32.mrb[38].mxu1  ;;  %v1327_v27 = vsel %vm1295_vm12, %v1265_v49, %v3980_v17  ;;  %vm1298_vm12 = vcmp.gt.f32.partialorder %v1280_v20, 0.0 }
 0x61e   :  { %v4201_v13 = vpop.f32.mrb[39].mxu1  ;;  %v5439_v57 = vpop.eup %5438  ;;  %4547 = vmatprep.mubr.f32.mxu0 %v1327_v27 }
 0x61f   :  { %v1313_v29 = vmul.f32 1.442695, %v1285_v40  ;;  %v4202_v25 = vadd.f32 %v4201_v13, %v4200_v36  ;;  %v3981_v42 = vadd.f32 -1.0, %v5439_v57  ;;  %vm1299_vm5 = vcmp.gt.f32.partialorder %v1285_v40, 0.0  ;;  %v5569_v13 = vld [vmem:[%s7974_s2 + $0x550] sm:$0xff]  ;;  %v5570_v57 = vld [vmem:[%s7974_s2 + $0x3c0] sm:$0xff] }
 0x621   :  { %5444 = vpow2.f32 %v1313_v29  ;;  %v1290_v33 = vadd.f32 %v4202_v25, %v6861_v9  ;;  %v1328_v46 = vsel %vm1296_vm13, %v1270_v50, %v3981_v42  ;;  %v5571_v25 = vld [vmem:[%s7974_s2 + $0x440] sm:$0xff] }
 0x622   :  { %v5441_v44 = vpop.eup %5440  ;;  %4548 = vmatmul.mubr.f32.gmra.mrb[42].mxu0 %v1328_v46 }
 0x623   :  { %v1315_v37 = vmul.f32 1.442695, %v1290_v33  ;;  %v3982_v58 = vadd.f32 -1.0, %v5441_v44  ;;  %vm1300_vm13 = vcmp.gt.f32.partialorder %v1290_v33, 0.0  ;;  %v5573_v44 = vld [vmem:[%s7974_s2 + $0x540] sm:$0xff] }
 0x625   :  { %5446 = vpow2.f32 %v1315_v37  ;;  %v1329_v35 = vsel %vm1297_vm2, %v1275_v31, %v3982_v58  ;;  %v5566_v31 = vld [vmem:[%s7974_s2 + $0x3d0] sm:$0xff]  ;;  %vm8062_vm2 = vcmask 64512  }
 0x626   :  { %v5443_v19 = vpop.eup %5442  ;;  %4550 = vmatprep.mubr.f32.mxu0 %v1329_v35 }
 0x627   :  { %v3983_v49 = vadd.f32 -1.0, %v5443_v19 }
 0x629   :  { %v1330_v26 = vsel %vm1298_vm12, %v1280_v20, %v3983_v49  ;;  %v5567_v20 = vld [vmem:[%s7974_s2 + $0x450] sm:$0xff]  ;;  %vm8064_vm12 = vmmov %vm8062_vm2 }
 0x62a   :  { %4551 = vmatmul.mubr.f32.gmra.mrb[44].mxu0 %v1330_v26 }
 0x62b   :  { %v5445_v61 = vpop.eup %5444 }
 0x62c   :  { %v3984_v56 = vadd.f32 -1.0, %v5445_v61  ;;  %v5574_v61 = vld [vmem:[%s7974_s2 + $0x3f0] sm:$0xff] }
 0x62e   :  { %v1331_v11 = vsel %vm1299_vm5, %v1285_v40, %v3984_v56  ;;  %v5568_v40 = vld [vmem:[%s7974_s2 + $0x4d0] sm:$0xff]  ;;  %vm8063_vm5 = vmmov %vm8062_vm2 }
 0x62f   :  { %v5447_v9 = vpop.eup %5446  ;;  %4553 = vmatprep.mubr.f32.mxu0 %v1331_v11  ;;  %v5575_v11 = vld [vmem:[%s7974_s2 + $0x470] sm:$0xff] }
 0x630   :  { %v3985_v50 = vadd.f32 -1.0, %v5447_v9 }
 0x632   :  { %v1332_v21 = vsel %vm1300_vm13, %v1290_v33, %v3985_v50  ;;  %v5572_v33 = vld [vmem:[%s7974_s2 + $0x4c0] sm:$0xff]  ;;  %vm8065_vm13 = vmmov %vm8062_vm2 }
 0x633   :  { %4554 = vmatmul.mubr.f32.gmra.mrb[46].mxu0 %v1332_v21  ;;  %v5576_v21 = vld [vmem:[%s7974_s2 + $0x4f0] sm:$0xff] }
 0x634   :  { %1664 = vmatprep.mubr.f32.mxu0 %v8061_v5 }
 0x6ed   :  { %v4546_v51 = vpop.f32.mrb[40].mxu0 }
 0x6ee   :  { %v6879_v62 = vmul.f32 %v5566_v31, %v4546_v51  ;;  %v6884_v17 = vmul.f32 %v5567_v20, %v4546_v51  ;;  %v1432_v8 = vpop.f32.mrb[41].mxu0  ;;  %v6889_v36 = vmul.f32 %v5568_v40, %v4546_v51  ;;  %v6894_v27 = vmul.f32 %v5569_v13, %v4546_v51  ;;  %v5577_v31 = vld [vmem:[%s7974_s2 + $0x570] sm:$0xff]  ;;  %v5579_v13 = vld [vmem:[%s7974_s2 + $0x460] sm:$0xff] }
 0x6ef   :  { %v6899_v29 = vmul.f32 %v5570_v57, %v1432_v8  ;;  %v6904_v42 = vmul.f32 %v5571_v25, %v1432_v8  ;;  %4588 = vmatprep.mubr.f32.mxu1 %v1432_v8  ;;  %v6909_v46 = vmul.f32 %v5572_v33, %v1432_v8  ;;  %v6914_v37 = vmul.f32 %v5573_v44, %v1432_v8  ;;  %v5578_v8 = vld [vmem:[%s7974_s2 + $0x3e0] sm:$0xff] }
 0x6f0   :  { %4589 = vmatmul.mubr.f32.vlgmr.msra.gmra.mrb[40].mxu1 %v4546_v51  ;;  %v5580_v25 = vld [vmem:[%s7974_s2 + $0x4e0] sm:$0xff] }
 0x6f1   :  { %v5581_v44 = vld [vmem:[%s7974_s2 + $0x560] sm:$0xff] }
 0x6f5   :  { %v4549_v26 = vpop.f32.mrb[42].mxu0 }
 0x6f6   :  { %v6927_v56 = vmul.f32 %v5574_v61, %v4549_v26  ;;  %v6932_v9 = vmul.f32 %v5575_v11, %v4549_v26  ;;  %v1442_v50 = vpop.f32.mrb[43].mxu0  ;;  %v6937_v51 = vmul.f32 %v5576_v21, %v4549_v26  ;;  %v6942_v20 = vmul.f32 %v5577_v31, %v4549_v26  ;;  %v5584_v31 = vld [vmem:[%s7974_s2 + $0x510] sm:$0xff] }
 0x6f7   :  { %v6947_v40 = vmul.f32 %v5578_v8, %v1442_v50  ;;  %v6952_v57 = vmul.f32 %v5579_v13, %v1442_v50  ;;  %4591 = vmatprep.mubr.f32.mxu1 %v1442_v50  ;;  %v6957_v33 = vmul.f32 %v5580_v25, %v1442_v50  ;;  %v6962_v61 = vmul.f32 %v5581_v44, %v1442_v50  ;;  %v5582_v25 = vld [vmem:[%s7974_s2 + $0x410] sm:$0xff] }
 0x6f8   :  { %4592 = vmatmul.mubr.f32.gmra.mrb[42].mxu1 %v4549_v26  ;;  %v5583_v26 = vld [vmem:[%s7974_s2 + $0x490] sm:$0xff] }
 0x6f9   :  { %v5585_v8 = vld [vmem:[%s7974_s2 + $0x590] sm:$0xff] }
 0x6fd   :  { %v4552_v13 = vpop.f32.mrb[44].mxu0 }
 0x6fe   :  { %v6975_v50 = vmul.f32 %v5582_v25, %v4552_v13  ;;  %v6980_v44 = vmul.f32 %v5583_v26, %v4552_v13  ;;  %v1452_v49 = vpop.f32.mrb[45].mxu0  ;;  %v6985_v19 = vmul.f32 %v5584_v31, %v4552_v13  ;;  %v6990_v21 = vmul.f32 %v5585_v8, %v4552_v13  ;;  %v5586_v25 = vld [vmem:[%s7974_s2 + $0x400] sm:$0xff] }
 0x6ff   :  { %v6995_v11 = vmul.f32 %v5586_v25, %v1452_v49  ;;  %v5587_v26 = vld [vmem:[%s7974_s2 + $0x480] sm:$0xff]  ;;  %4594 = vmatprep.mubr.f32.mxu1 %v1452_v49 }
 0x700   :  { %v7000_v35 = vmul.f32 %v5587_v26, %v1452_v49  ;;  %v5588_v31 = vld [vmem:[%s7974_s2 + $0x500] sm:$0xff]  ;;  %4595 = vmatmul.mubr.f32.gmra.mrb[44].mxu1 %v4552_v13  ;;  %v5591_v13 = vld [vmem:[%s7974_s2 + $0x4b0] sm:$0xff] }
 0x701   :  { %v7005_v58 = vmul.f32 %v5588_v31, %v1452_v49  ;;  %v5589_v8 = vld [vmem:[%s7974_s2 + $0x580] sm:$0xff]  ;;  %v5593_v31 = vld [vmem:[%s7974_s2 + $0x5b0] sm:$0xff] }
 0x702   :  { %v7010_v14 = vmul.f32 %v5589_v8, %v1452_v49 }
 0x706   :  { %v4555_v60 = vpop.f32.mrb[46].mxu0 }
 0x707   :  { %v7023_v49 = vmul.f32 %v5590_v4, %v4555_v60  ;;  %v7028_v8 = vmul.f32 %v5591_v13, %v4555_v60  ;;  %v1462_v26 = vpop.f32.mrb[47].mxu0  ;;  %v7033_v25 = vmul.f32 %v5592_v54, %v4555_v60  ;;  %v7038_v18 = vmul.f32 %v5593_v31, %v4555_v60  ;;  %v5594_v4 = vld [vmem:[%s7974_s2 + $0x420] sm:$0xff] }
 0x708   :  { %v7043_v32 = vmul.f32 %v5594_v4, %v1462_v26  ;;  %v5595_v13 = vld [vmem:[%s7974_s2 + $0x4a0] sm:$0xff]  ;;  %4597 = vmatprep.mubr.f32.mxu1 %v1462_v26 }
 0x709   :  { %v7048_v63 = vmul.f32 %v5595_v13, %v1462_v26  ;;  %v5596_v54 = vld [vmem:[%s7974_s2 + $0x520] sm:$0xff]  ;;  %4598 = vmatmul.mubr.f32.gmra.mrb[46].mxu1 %v4555_v60 }
 0x70a   :  { %v7053_v15 = vmul.f32 %v5596_v54, %v1462_v26  ;;  %v5597_v31 = vld [vmem:[%s7974_s2 + $0x5a0] sm:$0xff]  ;;  %1793 = vmatprep.mubr.f32.mxu1 %v8061_v5  ;;  %v5170_v13 = vpack.c.bf16 %v7023_v49, %v7043_v32  ;;  %v8103_v32 = vpack.c.bf16 %v6932_v9, %v6952_v57 }
 0x70b   :  { %v7058_v55 = vmul.f32 %v5597_v31, %v1462_v26 }
 0x70c   :  { %v5168_v4 = vpack.c.bf16 %v7033_v25, %v7053_v15  ;;  %v8100_v15 = vpack.c.bf16 %v6884_v17, %v6904_v42  ;;  %v8106_v17 = vpack.c.bf16 %v6980_v44, %v7000_v35 }
 0x70d   :  { %v5184_v43 = vpack.c.bf16 %v7038_v18, %v7058_v55 }
 0x7c3   :  { %v7069_v28 = vpop.f32.mrb[40].mxu1 }
 0x7c4   :  { %v7071_v38 = vpop.f32.mrb[41].mxu1 }
 0x7c5   :  { %3986 = vmatmul.mubr.msk.f32.vlgmr.msra.gmra.mrb[48].mxu0 %vm8062_vm2, %v7071_v38 }
 0x7c6   :  { %1670 = vmatprep.mubr.f32.mxu0 %v8061_v5  ;;  %5095 = vmatpush1.bf16.msra.mxu0 %v6171_v30 }
 0x7c7   :  { %5097 = vmatprep.subr.bf16.mxu0 %v6173_v34 }
 0x7c9   :  { %3987 = vmatmul.mubr.msk.f32.gmra.mrb[50].mxu0 %vm8063_vm5, %v7069_v28  ;;  %vm8066_vm5 = vmmov %vm8062_vm2 }
 0x7ca   :  { %1676 = vmatprep.mubr.f32.mxu0 %v8061_v5  ;;  %5099 = vmatpush1.bf16.msra.mxu0 %v6189_v41 }
 0x7cb   :  { %v7082_v60 = vpop.f32.mrb[42].mxu1  ;;  %5101 = vmatprep.subr.bf16.mxu0 %v6192_v47 }
 0x7cc   :  { %v7085_v26 = vpop.f32.mrb[43].mxu1 }
 0x7cd   :  { %3988 = vmatmul.mubr.msk.f32.gmra.mrb[52].mxu0 %vm8064_vm12, %v7085_v26  ;;  %vm8067_vm12 = vmmov %vm8062_vm2 }
 0x7ce   :  { %1682 = vmatprep.mubr.f32.mxu0 %v8061_v5  ;;  %5103 = vmatpush1.bf16.msra.mxu0 %v6207_v0  ;;  %v8069_v0 = vld [vmem:[#allocation2_spill] sm:$0xff] }
 0x7cf   :  { %5105 = vmatprep.subr.bf16.mxu0 %v6210_v1  ;;  %v8070_v1 = vld [vmem:[#allocation3_spill] sm:$0xff] }
 0x7d1   :  { %3989 = vmatmul.mubr.msk.f32.gmra.mrb[54].mxu0 %vm8065_vm13, %v7082_v60  ;;  %vm8068_vm13 = vmmov %vm8062_vm2 }
 0x7d2   :  { %1688 = vmatprep.mubr.f32.mxu0 %v8061_v5  ;;  %5107 = vmatpush1.bf16.msra.mxu0 %v6225_v23  ;;  %v8071_v23 = vld [vmem:[#allocation4_spill] sm:$0xff] }
 0x7d3   :  { %v7096_v30 = vpop.f32.mrb[44].mxu1  ;;  %5109 = vmatprep.subr.bf16.mxu0 %v6228_v24  ;;  %v8072_v24 = vld [vmem:[#allocation5_spill] sm:$0xff] }
 0x7d4   :  { %v7099_v34 = vpop.f32.mrb[45].mxu1 }
 0x7d5   :  { %3990 = vmatmul.mubr.msk.f32.gmra.mrb[56].mxu0 %vm8062_vm2, %v7099_v34  ;;  %vm8082_vm2 = vcmask 523264  }
 0x7d6   :  { %1694 = vmatprep.mubr.f32.mxu0 %v8061_v5  ;;  %5111 = vmatpush1.bf16.msra.mxu0 %v6243_v6  ;;  %v8073_v6 = vld [vmem:[#allocation6_spill] sm:$0xff] }
 0x7d7   :  { %5113 = vmatprep.subr.bf16.mxu0 %v6246_v45  ;;  %v8074_v45 = vld [vmem:[#allocation16_spill] sm:$0xff] }
 0x7d9   :  { %3991 = vmatmul.mubr.msk.f32.gmra.mrb[58].mxu0 %vm8066_vm5, %v7096_v30  ;;  %vm8084_vm5 = vmmov %vm8082_vm2 }
 0x7da   :  { %1700 = vmatprep.mubr.f32.mxu0 %v8061_v5  ;;  %5115 = vmatpush1.bf16.msra.mxu0 %v6261_v48  ;;  %v8075_v48 = vld [vmem:[#allocation18_spill] sm:$0xff] }
 0x7db   :  { %5117 = vmatprep.subr.bf16.mxu0 %v6264_v10  ;;  %v8076_v10 = vld [vmem:[#allocation20_spill] sm:$0xff] }
 0x7dc   :  { %v7110_v41 = vpop.f32.mrb[46].mxu1 }
 0x7dd   :  { %v7113_v47 = vpop.f32.mrb[47].mxu1 }
 0x7de   :  { %3992 = vmatmul.mubr.msk.f32.gmra.mrb[60].mxu0 %vm8067_vm12, %v7113_v47  ;;  %vm8085_vm12 = vmmov %vm8082_vm2 }
 0x7df   :  { %1706 = vmatprep.mubr.f32.mxu0 %v8061_v5  ;;  %5119 = vmatpush1.bf16.msra.mxu0 %v6279_v52  ;;  %v8077_v52 = vld [vmem:[#allocation22_spill] sm:$0xff] }
 0x7e0   :  { %5121 = vmatprep.subr.bf16.mxu0 %v6282_v16  ;;  %v8078_v16 = vld [vmem:[#allocation23_spill] sm:$0xff] }
 0x7e2   :  { %3993 = vmatmul.mubr.msk.f32.gmra.mrb[62].mxu0 %vm8068_vm13, %v7110_v41  ;;  %vm8086_vm13 = vmmov %vm8082_vm2 }
 0x7e3   :  { %5123 = vmatpush1.bf16.msra.mxu0 %v6297_v59  ;;  %v8079_v59 = vld [vmem:[#allocation24_spill] sm:$0xff] }
 0x7e4   :  { %5125 = vmatprep.subr.bf16.mxu0 %v6300_v3  ;;  %v8080_v3 = vld [vmem:[#allocation25_spill] sm:$0xff] }
 0x7e7   :  { %5127 = vmatpush1.bf16.msra.mxu0 %v6315_v7  ;;  %v8081_v7 = vld [vmem:[#allocation26_spill] sm:$0xff] }
 0x7e8   :  { %5129 = vmatprep.subr.bf16.mxu0 %v6318_v12 }
 0x7eb   :  { %5131 = vmatpush1.bf16.msra.mxu0 %v8069_v0 }
 0x7ec   :  { %5133 = vmatprep.subr.bf16.mxu0 %v8070_v1  ;;  %v5598_v1 = vld [vmem:[%s7974_s2 + $0x40] sm:$0xff] }
 0x7ef   :  { %5135 = vmatpush1.bf16.msra.mxu0 %v8071_v23 }
 0x7f0   :  { %5137 = vmatprep.subr.bf16.mxu0 %v8072_v24  ;;  %v5599_v24 = vld [vmem:[%s7974_s2 + $0x50] sm:$0xff] }
 0x7f3   :  { %5139 = vmatpush1.bf16.msra.mxu0 %v8073_v6 }
 0x7f4   :  { %5141 = vmatprep.subr.bf16.mxu0 %v8074_v45 }
 0x7f7   :  { %5143 = vmatpush1.bf16.msra.mxu0 %v8075_v48  ;;  %v5600_v48 = vld [vmem:[%s7974_s2 + $0x48] sm:$0xff] }
 0x7f8   :  { %5145 = vmatprep.subr.bf16.mxu0 %v8076_v10 }
 0x7fb   :  { %5147 = vmatpush1.bf16.msra.mxu0 %v8077_v52  ;;  %v5601_v52 = vld [vmem:[%s7974_s2 + $0x58] sm:$0xff] }
 0x7fc   :  { %5149 = vmatprep.subr.bf16.mxu0 %v8078_v16 }
 0x7ff   :  { %5151 = vmatpush1.bf16.msra.mxu0 %v8079_v59 }
 0x800   :  { %5153 = vmatprep.subr.bf16.mxu0 %v8080_v3 }
 0x803   :  { %5155 = vmatpush1.bf16.msra.mxu0 %v8081_v7 }
 0x898   :  { %v1666_v12 = vpop.f32.mrb[48].mxu0 }
 0x899   :  { %v1668_v31 = vpop.f32.mrb[49].mxu0  ;;  %v1713_v23 = vmul.f32 %v5598_v1, %v1666_v12 }
 0x89a   :  { %v1714_v10 = vmul.f32 %v5600_v48, %v1668_v31  ;;  %v5603_v31 = vld [vmem:[%s7974_s2 + $0x70] sm:$0xff] }
 0x89c   :  { %v1672_v0 = vpop.f32.mrb[50].mxu0 }
 0x89d   :  { %v1715_v6 = vmul.f32 %v5599_v24, %v1672_v0  ;;  %v1674_v45 = vpop.f32.mrb[51].mxu0  ;;  %v5602_v0 = vld [vmem:[%s7974_s2 + $0x60] sm:$0xff] }
 0x89e   :  { %v1716_v16 = vmul.f32 %v5601_v52, %v1674_v45  ;;  %v5605_v45 = vld [vmem:[%s7974_s2 + $0x78] sm:$0xff] }
 0x89f   :  { %v5078_v59 = vpack.c.bf16 %v1715_v6, %v1713_v23  ;;  %v5604_v23 = vld [vmem:[%s7974_s2 + $0x68] sm:$0xff] }
 0x8a0   :  { %v5076_v3 = vpack.c.bf16 %v1716_v16, %v1714_v10  ;;  %v1678_v7 = vpop.f32.mrb[52].mxu0 }
 0x8a1   :  { %v1680_v12 = vpop.f32.mrb[53].mxu0  ;;  %v1717_v24 = vmul.f32 %v5602_v0, %v1678_v7 }
 0x8a2   :  { %5077 = vmatprep.subr.bf16.mxu1 %v5076_v3  ;;  %v1718_v6 = vmul.f32 %v5604_v23, %v1680_v12  ;;  %v5607_v12 = vld [vmem:[%s7974_s2 + $0x90] sm:$0xff] }
 0x8a3   :  { %5079 = vmatpush1.bf16.msra.mxu1 %v5078_v59 }
 0x8a4   :  { %v1684_v1 = vpop.f32.mrb[54].mxu0 }
 0x8a5   :  { %v1719_v48 = vmul.f32 %v5603_v31, %v1684_v1  ;;  %v1686_v54 = vpop.f32.mrb[55].mxu0  ;;  %v5606_v1 = vld [vmem:[%s7974_s2 + $0x80] sm:$0xff] }
 0x8a6   :  { %v1720_v10 = vmul.f32 %v5605_v45, %v1686_v54  ;;  %v5608_v54 = vld [vmem:[%s7974_s2 + $0x88] sm:$0xff] }
 0x8a7   :  { %v5082_v52 = vpack.c.bf16 %v1719_v48, %v1717_v24  ;;  %v5609_v48 = vld [vmem:[%s7974_s2 + $0x98] sm:$0xff] }
 0x8a8   :  { %v5080_v16 = vpack.c.bf16 %v1720_v10, %v1718_v6  ;;  %v1690_v59 = vpop.f32.mrb[56].mxu0 }
 0x8a9   :  { %v1692_v3 = vpop.f32.mrb[57].mxu0  ;;  %v1721_v0 = vmul.f32 %v5606_v1, %v1690_v59 }
 0x8aa   :  { %5081 = vmatprep.subr.bf16.mxu1 %v5080_v16  ;;  %v1722_v24 = vmul.f32 %v5608_v54, %v1692_v3  ;;  %v5611_v3 = vld [vmem:[%s7974_s2 + $0xb0] sm:$0xff] }
 0x8ab   :  { %5083 = vmatpush1.bf16.msra.mxu1 %v5082_v52 }
 0x8ac   :  { %v1696_v7 = vpop.f32.mrb[58].mxu0 }
 0x8ad   :  { %v1723_v31 = vmul.f32 %v5607_v12, %v1696_v7  ;;  %v1698_v23 = vpop.f32.mrb[59].mxu0  ;;  %v5610_v7 = vld [vmem:[%s7974_s2 + $0xa0] sm:$0xff] }
 0x8ae   :  { %v1724_v6 = vmul.f32 %v5609_v48, %v1698_v23  ;;  %v5613_v23 = vld [vmem:[%s7974_s2 + $0xb8] sm:$0xff] }
 0x8af   :  { %v5086_v45 = vpack.c.bf16 %v1723_v31, %v1721_v0  ;;  %v5612_v0 = vld [vmem:[%s7974_s2 + $0xa8] sm:$0xff] }
 0x8b0   :  { %v5084_v10 = vpack.c.bf16 %v1724_v6, %v1722_v24 }
 0x8b1   :  { %v1702_v52 = vpop.f32.mrb[60].mxu0 }
 0x8b2   :  { %v1704_v16 = vpop.f32.mrb[61].mxu0  ;;  %5085 = vmatprep.subr.bf16.mxu1 %v5084_v10  ;;  %v1725_v1 = vmul.f32 %v5610_v7, %v1702_v52  ;;  %v7193_v10 = vld [vmem:[%s7974_s2 + $0x140] sm:$0xff]  ;;  %v5616_v52 = vld [vmem:[%s7974_s2 + $0x10] sm:$0xff] }
 0x8b3   :  { %5087 = vmatpush1.bf16.msra.mxu1 %v5086_v45  ;;  %v1726_v31 = vmul.f32 %v5612_v0, %v1704_v16  ;;  %v5614_v45 = vld [vmem:[%s7974_s2 + $0x18] sm:$0xff]  ;;  %v8083_v16 = vpack.c.bf16 %v6889_v36, %v6909_v46  ;;  %v7215_v7 = vld [vmem:[%s7974_s2 + $0x160] sm:$0xff]  ;;  %v7223_v36 = vld [vmem:[%s7974_s2 + $0x170] sm:$0xff]  ;;  %v8092_v0 = vpack.c.bf16 %v6937_v51, %v6957_v33 }
 0x8b4   :  { %v7231_v46 = vld [vmem:[%s7974_s2 + $0x180] sm:$0xff] }
 0x8b5   :  { %v1708_v59 = vpop.f32.mrb[62].mxu0 }
 0x8b6   :  { %v1727_v12 = vmul.f32 %v5611_v3, %v1708_v59  ;;  %v1710_v54 = vpop.f32.mrb[63].mxu0  ;;  %v7207_v59 = vld [vmem:[%s7974_s2 + $0x150] sm:$0xff]  ;;  %v7247_v3 = vld [vmem:[%s7974_s2 + $0x1a0] sm:$0xff] }
 0x8b7   :  { %v1728_v24 = vmul.f32 %v5613_v23, %v1710_v54  ;;  %v8091_v54 = vpack.c.bf16 %v6879_v62, %v6899_v29  ;;  %v8097_v62 = vpack.c.bf16 %v6975_v50, %v6995_v11  ;;  %v8101_v29 = vpack.c.bf16 %v6942_v20, %v6962_v61 }
 0x8b8   :  { %v5090_v48 = vpack.c.bf16 %v1727_v12, %v1725_v1  ;;  %v7239_v1 = vld [vmem:[%s7974_s2 + $0x190] sm:$0xff] }
 0x8b9   :  { %v5088_v6 = vpack.c.bf16 %v1728_v24, %v1726_v31  ;;  %v7255_v12 = vld [vmem:[%s7974_s2 + $0x1b0] sm:$0xff]  ;;  %v8094_v31 = vpack.c.bf16 %v6927_v56, %v6947_v40 }
 0x8bb   :  { %5089 = vmatprep.subr.bf16.mxu1 %v5088_v6 }
 0x8bc   :  { %5091 = vmatpush1.bf16.msra.mxu1 %v5090_v48 }
 0x8bd   :  { %1842 = vmatprep.subr.mxu1 %v5614_v45 }
 0x8bf   :  { %3994 = vmatmul.mubr.msk.f32.vlgmr.msra.gmra.mrb[48].mxu1 %vm8082_vm2, %v7193_v10 }
 0x8c0   :  { %1843 = vmatpush1.msra.mxu1 %v5616_v52  ;;  %1799 = vmatprep.mubr.f32.mxu1 %v8061_v5 }
 0x8c1   :  { %5157 = vmatprep.subr.bf16.mxu1 %v8083_v16 }
 0x8c3   :  { %3995 = vmatmul.mubr.msk.f32.gmra.mrb[50].mxu1 %vm8084_vm5, %v7207_v59  ;;  %vm8087_vm5 = vmmov %vm8082_vm2 }
 0x8c4   :  { %1805 = vmatprep.mubr.f32.mxu1 %v8061_v5 }
 0x8c7   :  { %3996 = vmatmul.mubr.msk.f32.gmra.mrb[52].mxu1 %vm8085_vm12, %v7215_v7  ;;  %vm8088_vm12 = vmmov %vm8082_vm2 }
 0x8c8   :  { %1811 = vmatprep.mubr.f32.mxu1 %v8061_v5 }
 0x8cb   :  { %3997 = vmatmul.mubr.msk.f32.gmra.mrb[54].mxu1 %vm8086_vm13, %v7223_v36  ;;  %vm8089_vm13 = vmmov %vm8082_vm2 }
 0x8cc   :  { %1817 = vmatprep.mubr.f32.mxu1 %v8061_v5 }
 0x8cf   :  { %3998 = vmatmul.mubr.msk.f32.gmra.mrb[56].mxu1 %vm8082_vm2, %v7231_v46  ;;  %vm8090_vm2 = vcmask 64512  }
 0x8d0   :  { %1823 = vmatprep.mubr.f32.mxu1 %v8061_v5 }
 0x8d3   :  { %3999 = vmatmul.mubr.msk.f32.gmra.mrb[58].mxu1 %vm8087_vm5, %v7239_v1  ;;  %vm8093_vm5 = vmmov %vm8090_vm2 }
 0x8d4   :  { %1829 = vmatprep.mubr.f32.mxu1 %v8061_v5 }
 0x8d7   :  { %4000 = vmatmul.mubr.msk.f32.gmra.mrb[60].mxu1 %vm8088_vm12, %v7247_v3  ;;  %vm8096_vm12 = vmmov %vm8090_vm2 }
 0x8d8   :  { %1835 = vmatprep.mubr.f32.mxu1 %v8061_v5 }
 0x8db   :  { %4001 = vmatmul.mubr.msk.f32.gmra.mrb[62].mxu1 %vm8089_vm13, %v7255_v12  ;;  %vm8098_vm13 = vmmov %vm8090_vm2 }
 0x8dc   :  { %1906 = vmatprep.mubr.f32.mxu1 %v8061_v5 }
 0x8df   :  { %4002 = vmatmul.mubr.msk.f32.vlgmr.msra.gmra.mrb[48].mxu1 %vm8090_vm2, %v7071_v38  ;;  %v8095_v38 = vpack.c.bf16 %v6985_v19, %v7005_v58 }
 0x8e0   :  { %5159 = vmatpush3.bf16.msra.mxu1 %v8091_v54  ;;  %1912 = vmatprep.mubr.f32.mxu1 %v8061_v5 }
 0x8e1   :  { %5161 = vmatprep.subr.bf16.mxu1 %v8092_v0 }
 0x8e3   :  { %4003 = vmatmul.mubr.msk.f32.gmra.mrb[50].mxu1 %vm8093_vm5, %v7069_v28  ;;  %v8099_v28 = vpack.c.bf16 %v6894_v27, %v6914_v37  ;;  %vm8102_vm5 = vmmov %vm8090_vm2  ;;  %v8104_v27 = vpack.c.bf16 %v6990_v21, %v7010_v14  ;;  %v8108_v14 = vpack.c.bf16 %v7028_v8, %v7048_v63 }
 0x8e4   :  { %5163 = vmatpush3.bf16.msra.mxu1 %v8094_v31  ;;  %1918 = vmatprep.mubr.f32.mxu1 %v8061_v5 }
 0x8e5   :  { %5165 = vmatprep.subr.bf16.mxu1 %v8095_v38 }
 0x8e7   :  { %4004 = vmatmul.mubr.msk.f32.gmra.mrb[52].mxu1 %vm8096_vm12, %v7085_v26  ;;  %vm8105_vm12 = vmmov %vm8090_vm2 }
 0x8e8   :  { %5167 = vmatpush3.bf16.msra.mxu1 %v8097_v62  ;;  %1924 = vmatprep.mubr.f32.mxu1 %v8061_v5 }
 0x8e9   :  { %5169 = vmatprep.subr.bf16.mxu1 %v5168_v4 }
 0x8eb   :  { %4005 = vmatmul.mubr.msk.f32.gmra.mrb[54].mxu1 %vm8098_vm13, %v7082_v60  ;;  %vm8107_vm13 = vmmov %vm8090_vm2 }
 0x8ec   :  { %5171 = vmatpush3.bf16.msra.mxu1 %v5170_v13  ;;  %1930 = vmatprep.mubr.f32.mxu1 %v8061_v5 }
 0x8ed   :  { %5173 = vmatprep.subr.bf16.mxu1 %v8099_v28 }
 0x8ef   :  { %4006 = vmatmul.mubr.msk.f32.gmra.mrb[56].mxu1 %vm8090_vm2, %v7099_v34 }
 0x8f0   :  { %5175 = vmatpush3.bf16.msra.mxu1 %v8100_v15  ;;  %1936 = vmatprep.mubr.f32.mxu1 %v8061_v5 }
 0x8f1   :  { %5177 = vmatprep.subr.bf16.mxu1 %v8101_v29 }
 0x8f3   :  { %4007 = vmatmul.mubr.msk.f32.gmra.mrb[58].mxu1 %vm8102_vm5, %v7096_v30 }
 0x8f4   :  { %5179 = vmatpush3.bf16.msra.mxu1 %v8103_v32  ;;  %1942 = vmatprep.mubr.f32.mxu1 %v8061_v5  ;;  %v8113_v32 = vld [vmem:[#allocation11_spill] sm:$0xff] }
 0x8f5   :  { %5181 = vmatprep.subr.bf16.mxu1 %v8104_v27 }
 0x8f7   :  { %4008 = vmatmul.mubr.msk.f32.gmra.mrb[60].mxu1 %vm8105_vm12, %v7113_v47 }
 0x8f8   :  { %5183 = vmatpush3.bf16.msra.mxu1 %v8106_v17  ;;  %1948 = vmatprep.mubr.f32.mxu1 %v8061_v5 }
 0x8f9   :  { %5185 = vmatprep.subr.bf16.mxu1 %v5184_v43 }
 0x8fb   :  { %4009 = vmatmul.mubr.msk.f32.gmra.mrb[62].mxu1 %vm8107_vm13, %v7110_v41 }
 0x8fc   :  { %5187 = vmatpush3.bf16.msra.mxu1 %v8108_v14 }
 0x9b2   :  { %v1908_v42 = vpop.f32.mrb[48].mxu1 }
 0x9b3   :  { %vm1955_vm2 = vcmp.gt.f32.partialorder %v1908_v42, 0.0  ;;  %v1971_v37 = vmul.f32 0.2, %v1908_v42  ;;  %v1910_v58 = vpop.f32.mrb[49].mxu1 }
 0x9b4   :  { %vm1956_vm5 = vcmp.gt.f32.partialorder %v1910_v58, 0.0  ;;  %v1972_v35 = vmul.f32 0.2, %v1910_v58 }
 0x9b5   :  { %v1987_v19 = vsel %vm1955_vm2, %v1908_v42, %v1971_v37 }
 0x9b6   :  { %v1914_v56 = vpop.f32.mrb[50].mxu1  ;;  %v1988_v9 = vsel %vm1956_vm5, %v1910_v58, %v1972_v35  ;;  %v7330_v55 = vsel %vm38_vm4, %v1987_v19, -1e+30 }
 0x9b7   :  { %vm1957_vm12 = vcmp.gt.f32.partialorder %v1914_v56, 0.0  ;;  %v1973_v43 = vmul.f32 0.2, %v1914_v56  ;;  %v1916_v18 = vpop.f32.mrb[51].mxu1  ;;  %v7334_v63 = vsel %vm39_vm6, %v1988_v9, -1e+30 }
 0x9b8   :  { %vm1958_vm13 = vcmp.gt.f32.partialorder %v1916_v18, 0.0  ;;  %v1974_v51 = vmul.f32 0.2, %v1916_v18  ;;  %v2019_v20 = vmax.f32 %v7330_v55, %v7334_v63 }
 0x9b9   :  { %v1989_v40 = vsel %vm1957_vm12, %v1914_v56, %v1973_v43  ;;  %v8115_v43 = vld [vmem:[#allocation13_spill] sm:$0xff] }
 0x9ba   :  { %2020 = vmax.xlane.f32.xlu0 %v2019_v20  ;;  %v1920_v57 = vpop.f32.mrb[52].mxu1  ;;  %v1990_v33 = vsel %vm1958_vm13, %v1916_v18, %v1974_v51  ;;  %v7340_v61 = vsel %vm40_vm7, %v1989_v40, -1e+30 }
 0x9bb   :  { %vm1959_vm2 = vcmp.gt.f32.partialorder %v1920_v57, 0.0  ;;  %v1975_v11 = vmul.f32 0.2, %v1920_v57  ;;  %v1922_v21 = vpop.f32.mrb[53].mxu1  ;;  %v7344_v50 = vsel %vm41_vm10, %v1990_v33, -1e+30 }
 0x9bc   :  { %vm1960_vm5 = vcmp.gt.f32.partialorder %v1922_v21, 0.0  ;;  %v1976_v44 = vmul.f32 0.2, %v1922_v21  ;;  %v2022_v25 = vmax.f32 %v7340_v61, %v7344_v50 }
 0x9bd   :  { %v1991_v49 = vsel %vm1959_vm2, %v1920_v57, %v1975_v11 }
 0x9be   :  { %2023 = vmax.xlane.f32.xlu1 %v2022_v25  ;;  %v1926_v8 = vpop.f32.mrb[54].mxu1  ;;  %v1992_v4 = vsel %vm1960_vm5, %v1922_v21, %v1976_v44  ;;  %v7350_v60 = vsel %vm42_vm11, %v1991_v49, -1e+30  ;;  %v8118_v49 = vld [vmem:[#allocation15_spill] sm:$0xff] }
 0x9bf   :  { %vm1961_vm12 = vcmp.gt.f32.partialorder %v1926_v8, 0.0  ;;  %v1977_v26 = vmul.f32 0.2, %v1926_v8  ;;  %v1928_v30 = vpop.f32.mrb[55].mxu1  ;;  %v7354_v41 = vsel %vm43_vm14, %v1992_v4, -1e+30 }
 0x9c0   :  { %vm1962_vm13 = vcmp.gt.f32.partialorder %v1928_v30, 0.0  ;;  %v1978_v47 = vmul.f32 0.2, %v1928_v30  ;;  %v2025_v23 = vmax.f32 %v7350_v60, %v7354_v41 }
 0x9c1   :  { %v1993_v24 = vsel %vm1961_vm12, %v1926_v8, %v1977_v26 }
 0x9c2   :  { %2026 = vmax.xlane.f32.xlu0 %v2025_v23  ;;  %v1932_v48 = vpop.f32.mrb[56].mxu1  ;;  %v1994_v6 = vsel %vm1962_vm13, %v1928_v30, %v1978_v47  ;;  %v7360_v52 = vsel %vm44_vm15, %v1993_v24, -1e+30  ;;  %v2437_v30 = vld [vmem:[%s7972_s1 + $0xc0] sm:$0xff] }
 0x9c3   :  { %vm1963_vm2 = vcmp.gt.f32.partialorder %v1932_v48, 0.0  ;;  %v1979_v16 = vmul.f32 0.2, %v1932_v48  ;;  %v1934_v54 = vpop.f32.mrb[57].mxu1  ;;  %v7364_v31 = vsel %vm45_vm8, %v1994_v6, -1e+30 }
 0x9c4   :  { %vm1964_vm5 = vcmp.gt.f32.partialorder %v1934_v54, 0.0  ;;  %v1980_v38 = vmul.f32 0.2, %v1934_v54  ;;  %v2028_v62 = vmax.f32 %v7360_v52, %v7364_v31 }
 0x9c5   :  { %v1995_v28 = vsel %vm1963_vm2, %v1932_v48, %v1979_v16  ;;  %vm8116_vm2 = vcmp.gt.f32.partialorder %v8115_v43, 0.0  ;;  %v8121_v16 = vld [vmem:[#allocation19_spill] sm:$0xff] }
 0x9c6   :  { %2029 = vmax.xlane.f32.xlu1 %v2028_v62  ;;  %v1938_v15 = vpop.f32.mrb[58].mxu1  ;;  %v1996_v29 = vsel %vm1964_vm5, %v1934_v54, %v1980_v38  ;;  %v7370_v27 = vsel %vm8022_vm9, %v1995_v28, -1e+30  ;;  %v8123_v38 = vld [vmem:[#allocation21_spill] sm:$0xff] }
 0x9c7   :  { %vm1965_vm12 = vcmp.gt.f32.partialorder %v1938_v15, 0.0  ;;  %v1981_v17 = vmul.f32 0.2, %v1938_v15  ;;  %v1940_v14 = vpop.f32.mrb[59].mxu1  ;;  %v7374_v37 = vsel %vm47_vm3, %v1996_v29, -1e+30 }
 0x9c8   :  { %vm1966_vm13 = vcmp.gt.f32.partialorder %v1940_v14, 0.0  ;;  %v1982_v58 = vmul.f32 0.2, %v1940_v14  ;;  %v2031_v35 = vmax.f32 %v7370_v27, %v7374_v37 }
 0x9c9   :  { %v1997_v19 = vsel %vm1965_vm12, %v1938_v15, %v1981_v17  ;;  %vm8119_vm12 = vcmp.gt.f32.partialorder %v8118_v49, 0.0 }
 0x9ca   :  { %2032 = vmax.xlane.f32.xlu0 %v2031_v35  ;;  %v1944_v56 = vpop.f32.mrb[60].mxu1  ;;  %v1998_v9 = vsel %vm1966_vm13, %v1940_v14, %v1982_v58  ;;  %v7380_v18 = vsel %vm8116_vm2, %v1997_v19, -1e+30 }
 0x9cb   :  { %vm1967_vm5 = vcmp.gt.f32.partialorder %v1944_v56, 0.0  ;;  %v1983_v51 = vmul.f32 0.2, %v1944_v56  ;;  %v1946_v20 = vpop.f32.mrb[61].mxu1  ;;  %v7384_v57 = vsel %vm49_vm0, %v1998_v9, -1e+30 }
 0x9cc   :  { %vm1968_vm9 = vcmp.gt.f32.partialorder %v1946_v20, 0.0  ;;  %v1984_v33 = vmul.f32 0.2, %v1946_v20  ;;  %v2034_v11 = vmax.f32 %v7380_v18, %v7384_v57 }
 0x9cd   :  { %v1999_v21 = vsel %vm1967_vm5, %v1944_v56, %v1983_v51  ;;  %vm8124_vm5 = vcmp.gt.f32.partialorder %v8123_v38, 0.0  ;;  %v2439_v38 = vld [vmem:[%s7972_s1 + $0xd0] sm:$0xff] }
 0x9ce   :  { %2035 = vmax.xlane.f32.xlu1 %v2034_v11  ;;  %v1950_v44 = vpop.f32.mrb[62].mxu1  ;;  %v2000_v25 = vsel %vm1968_vm9, %v1946_v20, %v1984_v33  ;;  %v7390_v8 = vsel %vm8119_vm12, %v1999_v21, -1e+30  ;;  %vm8122_vm9 = vcmp.gt.f32.partialorder %v8121_v16, 0.0  ;;  %vm8125_vm12 = vcmp.gt.f32.partialorder %v8113_v32, 0.0 }
 0x9cf   :  { %vm1969_vm13 = vcmp.gt.f32.partialorder %v1950_v44, 0.0  ;;  %v1985_v4 = vmul.f32 0.2, %v1950_v44  ;;  %v1952_v26 = vpop.f32.mrb[63].mxu1  ;;  %v7394_v47 = vsel %vm51_vm1, %v2000_v25, -1e+30 }
 0x9d0   :  { %vm1970_vm2 = vcmp.gt.f32.partialorder %v1952_v26, 0.0  ;;  %v1986_v23 = vmul.f32 0.2, %v1952_v26  ;;  %v2037_v24 = vmax.f32 %v7390_v8, %v7394_v47 }
 0x9d1   :  { %v2001_v48 = vsel %vm1969_vm13, %v1950_v44, %v1985_v4  ;;  %vm8126_vm13 = vcmp.gt.f32.partialorder %v8115_v43, 0.0 }
 0x9d2   :  { %2038 = vmax.xlane.f32.xlu0 %v2037_v24  ;;  %v2002_v6 = vsel %vm1970_vm2, %v1952_v26, %v1986_v23  ;;  %v7400_v54 = vsel %vm8122_vm9, %v2001_v48, -1e+30  ;;  %vm8127_vm2 = vcmp.gt.f32.partialorder %v8118_v49, 0.0  ;;  %vm8128_vm9 = vmmov %vm8124_vm5 }
 0x9d3   :  { %v7404_v62 = vsel %vm8124_vm5, %v2002_v6, -1e+30  ;;  %vm8129_vm5 = vcmp.gt.f32.partialorder %v8121_v16, 0.0 }
 0x9d4   :  { %v2040_v28 = vmax.f32 %v7400_v54, %v7404_v62 }
 0x9d6   :  { %2041 = vmax.xlane.f32.xlu1 %v2040_v28 }
 0xa47   :  { %v2021_v15 = vpop.xlane.xlu0 %2020 }
 0xa48   :  { %v2043_v29 = vsub.f32 %v7330_v55, %v2021_v15  ;;  %v2044_v17 = vsub.f32 %v7334_v63, %v2021_v15 }
 0xa4a   :  { %v2059_v14 = vmul.f32 1.442695, %v2043_v29  ;;  %v2061_v58 = vmul.f32 1.442695, %v2044_v17 }
 0xa4b   :  { %v2024_v35 = vpop.xlane.xlu1 %2023 }
 0xa4c   :  { %5448 = vpow2.f32 %v2059_v14  ;;  %v2045_v19 = vsub.f32 %v7340_v61, %v2024_v35  ;;  %v2046_v56 = vsub.f32 %v7344_v50, %v2024_v35 }
 0xa4d   :  { %5450 = vpow2.f32 %v2061_v58 }
 0xa4e   :  { %v2063_v9 = vmul.f32 1.442695, %v2045_v19  ;;  %v2065_v51 = vmul.f32 1.442695, %v2046_v56 }
 0xa4f   :  { %v2027_v20 = vpop.xlane.xlu0 %2026 }
 0xa50   :  { %5452 = vpow2.f32 %v2063_v9  ;;  %v2047_v33 = vsub.f32 %v7350_v60, %v2027_v20  ;;  %v2048_v11 = vsub.f32 %v7354_v41, %v2027_v20 }
 0xa51   :  { %5454 = vpow2.f32 %v2065_v51 }
 0xa52   :  { %v2067_v55 = vmul.f32 1.442695, %v2047_v33  ;;  %v2069_v63 = vmul.f32 1.442695, %v2048_v11 }
 0xa53   :  { %v2030_v21 = vpop.xlane.xlu1 %2029 }
 0xa54   :  { %5456 = vpow2.f32 %v2067_v55  ;;  %v2049_v44 = vsub.f32 %v7360_v52, %v2030_v21  ;;  %v2050_v61 = vsub.f32 %v7364_v31, %v2030_v21 }
 0xa55   :  { %5458 = vpow2.f32 %v2069_v63 }
 0xa56   :  { %v7416_v50 = vpop.eup %5448  ;;  %v2071_v25 = vmul.f32 1.442695, %v2049_v44  ;;  %v2073_v4 = vmul.f32 1.442695, %v2050_v61  ;;  %v2433_v61 = vld [vmem:[%s7972_s1 + $0xa0] sm:$0xff] }
 0xa57   :  { %v7418_v26 = vpop.eup %5450  ;;  %v2033_v23 = vpop.xlane.xlu0 %2032 }
 0xa58   :  { %5460 = vpow2.f32 %v2071_v25  ;;  %4010 = vmatprep.mubr.msk.f32.mxu0 %vm39_vm6, %v7418_v26  ;;  %v2051_v60 = vsub.f32 %v7370_v27, %v2033_v23  ;;  %v2052_v41 = vsub.f32 %v7374_v37, %v2033_v23  ;;  %v2434_v25 = vld [vmem:[%s7972_s1 + $0xa8] sm:$0xff] }
 0xa59   :  { %5462 = vpow2.f32 %v2073_v4  ;;  %4011 = vmatmul.mubr.msk.f32.vlgmr.msra.gmra.mrb[64].mxu0 %vm38_vm4, %v7416_v50  ;;  %v2435_v4 = vld [vmem:[%s7972_s1 + $0xb0] sm:$0xff]  ;;  %v5188_v23 = vpack.c.bf16 %v2434_v25, %v2433_v61 }
 0xa5a   :  { %v7428_v52 = vpop.eup %5452  ;;  %v2075_v31 = vmul.f32 1.442695, %v2051_v60  ;;  %v2077_v24 = vmul.f32 1.442695, %v2052_v41  ;;  %v2436_v60 = vld [vmem:[%s7972_s1 + $0xb8] sm:$0xff] }
 0xa5b   :  { %v7430_v48 = vpop.eup %5454  ;;  %v2036_v6 = vpop.xlane.xlu1 %2035  ;;  %v5192_v41 = vpack.c.bf16 %v2436_v60, %v2435_v4  ;;  %5189 = vmatprep.subr.bf16.mxu0 %v5188_v23 }
 0xa5c   :  { %5464 = vpow2.f32 %v2075_v31  ;;  %4012 = vmatprep.mubr.msk.f32.mxu0 %vm41_vm10, %v7430_v48  ;;  %v2053_v27 = vsub.f32 %v7380_v18, %v2036_v6  ;;  %v2054_v37 = vsub.f32 %v7384_v57, %v2036_v6  ;;  %5191 = vmatpush3.bf16.msra.mxu0 %v5188_v23 }
 0xa5d   :  { %5466 = vpow2.f32 %v2077_v24  ;;  %4013 = vmatmul.mubr.msk.f32.gmra.mrb[66].mxu0 %vm40_vm7, %v7428_v52  ;;  %5193 = vmatprep.subr.bf16.mxu0 %v5192_v41 }
 0xa5e   :  { %v7440_v28 = vpop.eup %5456  ;;  %v2079_v15 = vmul.f32 1.442695, %v2053_v27  ;;  %v2081_v29 = vmul.f32 1.442695, %v2054_v37 }
 0xa5f   :  { %v7442_v17 = vpop.eup %5458  ;;  %v2039_v14 = vpop.xlane.xlu0 %2038  ;;  %v2095_v4 = vsel %vm42_vm11, %v7440_v28, 0.0 }
 0xa60   :  { %5468 = vpow2.f32 %v2079_v15  ;;  %4014 = vmatprep.mubr.msk.f32.mxu0 %vm43_vm14, %v7442_v17  ;;  %v2055_v18 = vsub.f32 %v7390_v8, %v2039_v14  ;;  %v2056_v57 = vsub.f32 %v7394_v47, %v2039_v14  ;;  %5195 = vmatpush3.bf16.msra.mxu0 %v5192_v41  ;;  %v2091_v14 = vsel %vm38_vm4, %v7416_v50, 0.0  ;;  %vm8130_vm4 = vmmov %vm8125_vm12 }
 0xa61   :  { %5470 = vpow2.f32 %v2081_v29  ;;  %4015 = vmatmul.mubr.msk.f32.gmra.mrb[68].mxu0 %vm42_vm11, %v7440_v28  ;;  %v2094_v50 = vsel %vm41_vm10, %v7430_v48, 0.0  ;;  %v2096_v23 = vsel %vm43_vm14, %v7442_v17, 0.0  ;;  %vm8134_vm10 = vmmov %vm8128_vm9 }
 0xa62   :  { %v7452_v58 = vpop.eup %5460  ;;  %v2083_v35 = vmul.f32 1.442695, %v2055_v18  ;;  %v2085_v19 = vmul.f32 1.442695, %v2056_v57 }
 0xa63   :  { %v7454_v56 = vpop.eup %5462  ;;  %v2042_v9 = vpop.xlane.xlu1 %2041 }
 0xa64   :  { %5472 = vpow2.f32 %v2083_v35  ;;  %4016 = vmatprep.mubr.msk.f32.mxu0 %vm45_vm8, %v7454_v56  ;;  %v2057_v8 = vsub.f32 %v7400_v54, %v2042_v9  ;;  %v2058_v47 = vsub.f32 %v7404_v62, %v2042_v9 }
 0xa65   :  { %5474 = vpow2.f32 %v2085_v19  ;;  %4017 = vmatmul.mubr.msk.f32.gmra.mrb[70].mxu0 %vm44_vm15, %v7452_v58  ;;  %v2092_v19 = vsel %vm39_vm6, %v7418_v26, 0.0  ;;  %vm8131_vm6 = vmmov %vm8126_vm13 }
 0xa66   :  { %v7464_v51 = vpop.eup %5464  ;;  %v2087_v20 = vmul.f32 1.442695, %v2057_v8  ;;  %v2089_v33 = vmul.f32 1.442695, %v2058_v47 }
 0xa67   :  { %v7466_v11 = vpop.eup %5466 }
 0xa68   :  { %5476 = vpow2.f32 %v2087_v20  ;;  %4018 = vmatprep.mubr.msk.f32.mxu0 %vm47_vm3, %v7466_v11  ;;  %v2093_v20 = vsel %vm40_vm7, %v7428_v52, 0.0  ;;  %vm8132_vm7 = vmmov %vm8127_vm2 }
 0xa69   :  { %5478 = vpow2.f32 %v2089_v33  ;;  %4019 = vmatmul.mubr.msk.f32.gmra.mrb[72].mxu0 %vm8125_vm12, %v7464_v51 }
 0xa6a   :  { %v7474_v54 = vpop.eup %5468 }
 0xa6b   :  { %v7476_v62 = vpop.eup %5470 }
 0xa6c   :  { %4020 = vmatprep.mubr.msk.f32.mxu0 %vm49_vm0, %v7476_v62 }
 0xa6d   :  { %4021 = vmatmul.mubr.msk.f32.gmra.mrb[74].mxu0 %vm8126_vm13, %v7474_v54 }
 0xa6e   :  { %v7484_v55 = vpop.eup %5472 }
 0xa6f   :  { %v7486_v63 = vpop.eup %5474 }
 0xa70   :  { %4022 = vmatprep.mubr.msk.f32.mxu0 %vm51_vm1, %v7486_v63  ;;  %v2104_v43 = vsel %vm51_vm1, %v7486_v63, 0.0  ;;  %v2438_v63 = vld [vmem:[%s7972_s1 + $0xc8] sm:$0xff] }
 0xa71   :  { %4023 = vmatmul.mubr.msk.f32.gmra.mrb[76].mxu0 %vm8127_vm2, %v7484_v55  ;;  %v5196_v16 = vpack.c.bf16 %v2438_v63, %v2437_v30  ;;  %vm2723_vm2 = vcmask 1041408  }
 0xa72   :  { %v7494_v21 = vpop.eup %5476 }
 0xa73   :  { %v7496_v44 = vpop.eup %5478  ;;  %5197 = vmatprep.subr.bf16.mxu0 %v5196_v16 }
 0xa74   :  { %4024 = vmatprep.mubr.msk.f32.mxu0 %vm8128_vm9, %v7496_v44  ;;  %v2106_v49 = vsel %vm8134_vm10, %v7496_v44, 0.0  ;;  %5199 = vmatpush3.bf16.msra.mxu0 %v5196_v16  ;;  %vm8135_vm9 = vcmask 261120  }
 0xa75   :  { %4025 = vmatmul.mubr.msk.f32.gmra.mrb[78].mxu0 %vm8129_vm5, %v7494_v21 }
 0xb2c   :  { %v2173_v31 = vpop.f32.mrb[64].mxu0 }
 0xb2d   :  { %5480 = vrcp.f32 %v2173_v31  ;;  %v2175_v24 = vpop.f32.mrb[65].mxu0  ;;  %v2097_v31 = vsel %vm44_vm15, %v7452_v58, 0.0 }
 0xb2e   :  { %5482 = vrcp.f32 %v2175_v24  ;;  %v2098_v24 = vsel %vm45_vm8, %v7454_v56, 0.0 }
 0xb30   :  { %v2179_v6 = vpop.f32.mrb[66].mxu0 }
 0xb31   :  { %5484 = vrcp.f32 %v2179_v6  ;;  %v2181_v27 = vpop.f32.mrb[67].mxu0 }
 0xb32   :  { %5486 = vrcp.f32 %v2181_v27 }
 0xb34   :  { %v2185_v37 = vpop.f32.mrb[68].mxu0 }
 0xb35   :  { %5488 = vrcp.f32 %v2185_v37  ;;  %v2187_v15 = vpop.f32.mrb[69].mxu0  ;;  %v2099_v37 = vsel %vm8130_vm4, %v7464_v51, 0.0  ;;  %v2102_v51 = vsel %vm49_vm0, %v7476_v62, 0.0  ;;  %vm8133_vm0 = vmmov %vm8129_vm5 }
 0xb36   :  { %5490 = vrcp.f32 %v2187_v15  ;;  %v2100_v15 = vsel %vm47_vm3, %v7466_v11, 0.0  ;;  %v2105_v40 = vsel %vm8133_vm0, %v7494_v21, 0.0  ;;  %v2440_v21 = vld [vmem:[%s7972_s1 + $0xd8] sm:$0xff]  ;;  %vm8136_vm5 = vmmov %vm8135_vm9 }
 0xb37   :  { %v5481_v29 = vpop.eup %5480  ;;  %v5200_v44 = vpack.c.bf16 %v2440_v21, %v2439_v38  ;;  %vm8137_vm4 = vmmov %vm8136_vm5 }
 0xb38   :  { %v5483_v18 = vpop.eup %5482  ;;  %v2236_v57 = vmul.f32 %v5481_v29, %v2091_v14  ;;  %v2191_v35 = vpop.f32.mrb[70].mxu0  ;;  %vm8140_vm0 = vmmov %vm8137_vm4 }
 0xb39   :  { %5492 = vrcp.f32 %v2191_v35  ;;  %v2193_v9 = vpop.f32.mrb[71].mxu0  ;;  %v2237_v8 = vmul.f32 %v5483_v18, %v2092_v19  ;;  %v2101_v18 = vsel %vm8131_vm6, %v7474_v54, 0.0  ;;  %v2103_v35 = vsel %vm8132_vm7, %v7484_v55, 0.0  ;;  %5201 = vmatprep.subr.bf16.mxu0 %v5200_v44  ;;  %vm8138_vm6 = vmmov %vm8137_vm4 }
 0xb3a   :  { %5494 = vrcp.f32 %v2193_v9  ;;  %5203 = vmatpush3.bf16.msra.mxu0 %v5200_v44  ;;  %vm8139_vm7 = vmmov %vm8137_vm4 }
 0xb3b   :  { %v5485_v47 = vpop.eup %5484  ;;  %2352 = vmatprep.mubr.f32.mxu1 %v2237_v8  ;;  %vm8141_vm10 = vmmov %vm8140_vm0 }
 0xb3c   :  { %v5487_v33 = vpop.eup %5486  ;;  %v2197_v39 = vpop.f32.mrb[72].mxu0  ;;  %2353 = vmatmul.mubr.f32.vlgmr.msra.gmra.mrb[64].mxu1 %v2236_v57  ;;  %v2238_v61 = vmul.f32 %v5485_v47, %v2093_v20  ;;  %v2441_v20 = vld [vmem:[%s7972_s1 + $0xe0] sm:$0xff] }
 0xb3d   :  { %5496 = vrcp.f32 %v2197_v39  ;;  %v2199_v53 = vpop.f32.mrb[73].mxu0  ;;  %v2239_v26 = vmul.f32 %v5487_v33, %v2094_v50  ;;  %v2442_v33 = vld [vmem:[%s7972_s1 + $0xe8] sm:$0xff]  ;;  %v2443_v50 = vld [vmem:[%s7972_s1 + $0xf0] sm:$0xff] }
 0xb3e   :  { %5498 = vrcp.f32 %v2199_v53  ;;  %v5204_v39 = vpack.c.bf16 %v2442_v33, %v2441_v20 }
 0xb3f   :  { %v5489_v25 = vpop.eup %5488  ;;  %2357 = vmatprep.mubr.f32.mxu1 %v2239_v26  ;;  %v2445_v26 = vld [vmem:[%s7972_s1 + $0x100] sm:$0xff] }
 0xb40   :  { %v5491_v2 = vpop.eup %5490  ;;  %v2203_v52 = vpop.f32.mrb[74].mxu0  ;;  %2358 = vmatmul.mubr.f32.gmra.mrb[66].mxu1 %v2238_v61  ;;  %v2240_v22 = vmul.f32 %v5489_v25, %v2095_v4  ;;  %5205 = vmatprep.subr.bf16.mxu0 %v5204_v39  ;;  %v2444_v61 = vld [vmem:[%s7972_s1 + $0xf8] sm:$0xff]  ;;  %v2446_v25 = vld [vmem:[%s7972_s1 + $0x108] sm:$0xff] }
 0xb41   :  { %5500 = vrcp.f32 %v2203_v52  ;;  %v2205_v48 = vpop.f32.mrb[75].mxu0  ;;  %v2241_v60 = vmul.f32 %v5491_v2, %v2096_v23  ;;  %5207 = vmatpush3.bf16.msra.mxu0 %v5204_v39  ;;  %v5208_v53 = vpack.c.bf16 %v2444_v61, %v2443_v50  ;;  %v5212_v4 = vpack.c.bf16 %v2446_v25, %v2445_v26  ;;  %v2447_v2 = vld [vmem:[%s7972_s1 + $0x110] sm:$0xff]  ;;  %v2448_v52 = vld [vmem:[%s7972_s1 + $0x118] sm:$0xff] }
 0xb42   :  { %5502 = vrcp.f32 %v2205_v48  ;;  %v5216_v23 = vpack.c.bf16 %v2448_v52, %v2447_v2  ;;  %v2450_v48 = vld [vmem:[%s7972_s1 + $0x228] sm:$0xff] }
 0xb43   :  { %v5493_v41 = vpop.eup %5492  ;;  %2362 = vmatprep.mubr.f32.mxu1 %v2241_v60  ;;  %5209 = vmatprep.subr.bf16.mxu0 %v5208_v53 }
 0xb44   :  { %v5495_v13 = vpop.eup %5494  ;;  %v2209_v28 = vpop.f32.mrb[76].mxu0  ;;  %2363 = vmatmul.mubr.f32.gmra.mrb[68].mxu1 %v2240_v22  ;;  %v2242_v34 = vmul.f32 %v5493_v41, %v2097_v31  ;;  %v2449_v22 = vld [vmem:[%s7972_s1 + $0x220] sm:$0xff]  ;;  %v7609_v31 = vld [vmem:[%s7972_s1 + $0x248] ss:$0 sm:$0xff] }
 0xb45   :  { %5504 = vrcp.f32 %v2209_v28  ;;  %v2211_v17 = vpop.f32.mrb[77].mxu0  ;;  %v2243_v6 = vmul.f32 %v5495_v13, %v2098_v24  ;;  %5211 = vmatpush3.bf16.msra.mxu0 %v5208_v53  ;;  %v5220_v60 = vpack.c.bf16 %v2450_v48, %v2449_v22 }
 0xb46   :  { %5506 = vrcp.f32 %v2211_v17  ;;  %5213 = vmatprep.subr.bf16.mxu0 %v5212_v4 }
 0xb47   :  { %v5497_v27 = vpop.eup %5496  ;;  %2367 = vmatprep.mubr.f32.mxu1 %v2243_v6 }
 0xb48   :  { %v5499_v45 = vpop.eup %5498  ;;  %v2215_v58 = vpop.f32.mrb[78].mxu0  ;;  %2368 = vmatmul.mubr.f32.gmra.mrb[70].mxu1 %v2242_v34  ;;  %v2244_v0 = vmul.f32 %v5497_v27, %v2099_v37 }
 0xb49   :  { %5508 = vrcp.f32 %v2215_v58  ;;  %v2217_v56 = vpop.f32.mrb[79].mxu0  ;;  %v2245_v29 = vmul.f32 %v5499_v45, %v2100_v15  ;;  %5215 = vmatpush3.bf16.msra.mxu0 %v5212_v4 }
 0xb4a   :  { %5510 = vrcp.f32 %v2217_v56  ;;  %5217 = vmatprep.subr.bf16.mxu0 %v5216_v23 }
 0xb4b   :  { %v5501_v14 = vpop.eup %5500  ;;  %2372 = vmatprep.mubr.f32.mxu1 %v2245_v29 }
 0xb4c   :  { %v5503_v32 = vpop.eup %5502  ;;  %2373 = vmatmul.mubr.f32.gmra.mrb[72].mxu1 %v2244_v0  ;;  %v2246_v57 = vmul.f32 %v5501_v14, %v2101_v18 }
 0xb4d   :  { %v2247_v42 = vmul.f32 %v5503_v32, %v2102_v51  ;;  %5219 = vmatpush3.bf16.msra.mxu0 %v5216_v23 }
 0xb4e   :  { %5221 = vmatprep.subr.bf16.mxu0 %v5220_v60 }
 0xb4f   :  { %v5505_v11 = vpop.eup %5504  ;;  %2377 = vmatprep.mubr.f32.mxu1 %v2247_v42 }
 0xb50   :  { %v5507_v19 = vpop.eup %5506  ;;  %2378 = vmatmul.mubr.f32.gmra.mrb[74].mxu1 %v2246_v57  ;;  %v2248_v54 = vmul.f32 %v5505_v11, %v2103_v35 }
 0xb51   :  { %v2249_v9 = vmul.f32 %v5507_v19, %v2104_v43 }
 0xb53   :  { %v5509_v8 = vpop.eup %5508  ;;  %2382 = vmatprep.mubr.f32.mxu1 %v2249_v9 }
 0xb54   :  { %v5511_v62 = vpop.eup %5510  ;;  %2383 = vmatmul.mubr.f32.gmra.mrb[76].mxu1 %v2248_v54  ;;  %v2250_v55 = vmul.f32 %v5509_v8, %v2105_v40 }
 0xb55   :  { %v2251_v47 = vmul.f32 %v5511_v62, %v2106_v49  ;;  %v2451_v62 = vld [vmem:[%s7972_s1 + $0x230] sm:$0xff]  ;;  %v2452_v49 = vld [vmem:[%s7972_s1 + $0x238] sm:$0xff] }
 0xb56   :  { %v5224_v21 = vpack.c.bf16 %v2452_v49, %v2451_v62  ;;  %v2456_v49 = vld [vmem:[%s7974_s2 + $0xc0] sm:$0xff] }
 0xb57   :  { %2387 = vmatprep.mubr.f32.mxu1 %v2251_v47 }
 0xb58   :  { %2388 = vmatmul.mubr.f32.gmra.mrb[78].mxu1 %v2250_v55 }
 0xc0f   :  { %v4283_v41 = vpop.f32.mrb[64].mxu1 }
 0xc10   :  { %v4284_v13 = vpop.f32.mrb[65].mxu1 }
 0xc11   :  { %v4285_v28 = vadd.f32 %v4284_v13, %v4283_v41 }
 0xc13   :  { %v2355_v24 = vadd.f32 %v4285_v28, %v7609_v31  ;;  %v4286_v34 = vpop.f32.mrb[66].mxu1 }
 0xc14   :  { %v4287_v17 = vpop.f32.mrb[67].mxu1 }
 0xc15   :  { %v2401_v6 = vmul.f32 1.442695, %v2355_v24  ;;  %v4288_v27 = vadd.f32 %v4287_v17, %v4286_v34  ;;  %vm2393_vm1 = vcmp.gt.f32.partialorder %v2355_v24, 0.0 }
 0xc17   :  { %5512 = vpow2.f32 %v2401_v6  ;;  %v2360_v37 = vadd.f32 %v4288_v27, %v7609_v31  ;;  %v4289_v45 = vpop.f32.mrb[68].mxu1 }
 0xc18   :  { %v4290_v58 = vpop.f32.mrb[69].mxu1 }
 0xc19   :  { %v2403_v15 = vmul.f32 1.442695, %v2360_v37  ;;  %v4291_v0 = vadd.f32 %v4290_v58, %v4289_v45  ;;  %vm2394_vm11 = vcmp.gt.f32.partialorder %v2360_v37, 0.0 }
 0xc1b   :  { %5514 = vpow2.f32 %v2403_v15  ;;  %v2365_v56 = vadd.f32 %v4291_v0, %v7609_v31  ;;  %v4292_v29 = vpop.f32.mrb[70].mxu1  ;;  %v2454_v0 = vld [vmem:[%s7974_s2 + $0x20] sm:$0x3] }
 0xc1c   :  { %v4293_v14 = vpop.f32.mrb[71].mxu1  ;;  %4664 = vmatprep.subr.msk.mxu1 %vm2723_vm2, %v2454_v0 }
 0xc1d   :  { %v2405_v18 = vmul.f32 1.442695, %v2365_v56  ;;  %v4294_v32 = vadd.f32 %v4293_v14, %v4292_v29  ;;  %vm2395_vm14 = vcmp.gt.f32.partialorder %v2365_v56, 0.0  ;;  %4665 = vmatpush3.msk.msra.mxu1 %vm2723_vm2, %v2454_v0  ;;  %v7766_v0 = vld [vmem:[%s7973_s0 + $0x100] sm:$0xff] }
 0xc1f   :  { %5516 = vpow2.f32 %v2405_v18  ;;  %v2370_v51 = vadd.f32 %v4294_v32, %v7609_v31  ;;  %v4295_v57 = vpop.f32.mrb[72].mxu1 }
 0xc20   :  { %v4296_v42 = vpop.f32.mrb[73].mxu1 }
 0xc21   :  { %v5513_v11 = vpop.eup %5512  ;;  %v2407_v35 = vmul.f32 1.442695, %v2370_v51  ;;  %v4297_v19 = vadd.f32 %v4296_v42, %v4295_v57  ;;  %vm2396_vm15 = vcmp.gt.f32.partialorder %v2370_v51, 0.0 }
 0xc22   :  { %v4027_v43 = vadd.f32 -1.0, %v5513_v11 }
 0xc23   :  { %5518 = vpow2.f32 %v2407_v35  ;;  %v2375_v54 = vadd.f32 %v4297_v19, %v7609_v31  ;;  %v4298_v9 = vpop.f32.mrb[74].mxu1 }
 0xc24   :  { %v4299_v8 = vpop.f32.mrb[75].mxu1  ;;  %v2425_v40 = vsel %vm2393_vm1, %v2355_v24, %v4027_v43  ;;  %vm8142_vm1 = vmmov %vm8140_vm0 }
 0xc25   :  { %v5515_v55 = vpop.eup %5514  ;;  %v2409_v47 = vmul.f32 1.442695, %v2375_v54  ;;  %v4300_v30 = vadd.f32 %v4299_v8, %v4298_v9  ;;  %4632 = vmatprep.mubr.f32.mxu0 %v2425_v40  ;;  %vm2397_vm8 = vcmp.gt.f32.partialorder %v2375_v54, 0.0  ;;  %v5248_v40 = vpack.c.bf16 %v7223_v36, %v7215_v7 }
 0xc26   :  { %v4028_v63 = vadd.f32 -1.0, %v5515_v55  ;;  %v5256_v7 = vpack.c.bf16 %v7255_v12, %v7247_v3  ;;  %v2457_v12 = vld [vmem:[%s7974_s2 + $0xd0] sm:$0xff] }
 0xc27   :  { %5520 = vpow2.f32 %v2409_v47  ;;  %v2380_v16 = vadd.f32 %v4300_v30, %v7609_v31  ;;  %v4301_v38 = vpop.f32.mrb[76].mxu1 }
 0xc28   :  { %v4302_v44 = vpop.f32.mrb[77].mxu1  ;;  %v2426_v20 = vsel %vm2394_vm11, %v2360_v37, %v4028_v63  ;;  %vm8143_vm11 = vcmask 523264  }
 0xc29   :  { %v5517_v33 = vpop.eup %5516  ;;  %v2411_v39 = vmul.f32 1.442695, %v2380_v16  ;;  %v4303_v50 = vadd.f32 %v4302_v44, %v4301_v38  ;;  %4633 = vmatmul.mubr.f32.vlgmr.msra.gmra.mrb[80].mxu0 %v2426_v20  ;;  %vm2398_vm3 = vcmp.gt.f32.partialorder %v2380_v16, 0.0  ;;  %v2459_v38 = vld [vmem:[%s7974_s2 + $0xf0] sm:$0xff] }
 0xc2a   :  { %v4029_v61 = vadd.f32 -1.0, %v5517_v33  ;;  %5223 = vmatpush3.bf16.msra.mxu0 %v5220_v60 }
 0xc2b   :  { %5522 = vpow2.f32 %v2411_v39  ;;  %v2385_v53 = vadd.f32 %v4303_v50, %v7609_v31  ;;  %v4304_v26 = vpop.f32.mrb[78].mxu1  ;;  %5225 = vmatprep.subr.bf16.mxu0 %v5224_v21 }
 0xc2c   :  { %v4305_v25 = vpop.f32.mrb[79].mxu1  ;;  %v2427_v4 = vsel %vm2395_vm14, %v2365_v56, %v4029_v61  ;;  %vm2698_vm14 = vcmask 15360   ;;  %v2461_v61 = vld [vmem:[%s7974_s2 + $0x110] sm:$0xff] }
 0xc2d   :  { %v5519_v2 = vpop.eup %5518  ;;  %v2413_v52 = vmul.f32 1.442695, %v2385_v53  ;;  %v4306_v23 = vadd.f32 %v4305_v25, %v4304_v26  ;;  %4635 = vmatprep.mubr.f32.mxu0 %v2427_v4  ;;  %vm2399_vm12 = vcmp.gt.f32.partialorder %v2385_v53, 0.0 }
 0xc2e   :  { %v4030_v22 = vadd.f32 -1.0, %v5519_v2  ;;  %5227 = vmatpush3.bf16.msra.mxu0 %v5224_v21  ;;  %v2458_v21 = vld [vmem:[%s7974_s2 + $0xe0] sm:$0xff] }
 0xc2f   :  { %5524 = vpow2.f32 %v2413_v52  ;;  %v2390_v48 = vadd.f32 %v4306_v23, %v7609_v31  ;;  %v2463_v23 = vld [vmem:[%s7974_s2 + $0x130] sm:$0xff] }
 0xc30   :  { %v2428_v41 = vsel %vm2396_vm15, %v2370_v51, %v4030_v22  ;;  %v2462_v22 = vld [vmem:[%s7974_s2 + $0x120] sm:$0xff]  ;;  %vm8144_vm15 = vmmov %vm8143_vm11 }
 0xc31   :  { %v5521_v60 = vpop.eup %5520  ;;  %v2415_v13 = vmul.f32 1.442695, %v2390_v48  ;;  %4636 = vmatmul.mubr.f32.gmra.mrb[82].mxu0 %v2428_v41  ;;  %vm2400_vm13 = vcmp.gt.f32.partialorder %v2390_v48, 0.0 }
 0xc32   :  { %v4031_v28 = vadd.f32 -1.0, %v5521_v60 }
 0xc33   :  { %5526 = vpow2.f32 %v2415_v13 }
 0xc34   :  { %v2429_v24 = vsel %vm2397_vm8, %v2375_v54, %v4031_v28  ;;  %v5244_v54 = vpack.c.bf16 %v7207_v59, %v7193_v10  ;;  %vm8145_vm8 = vmmov %vm8143_vm11 }
 0xc35   :  { %v5523_v34 = vpop.eup %5522  ;;  %4638 = vmatprep.mubr.f32.mxu0 %v2429_v24  ;;  %v2455_v24 = vld [vmem:[%s7974_s2 + $0x30] sm:$0x3] }
 0xc36   :  { %v4032_v17 = vadd.f32 -1.0, %v5523_v34  ;;  %5245 = vmatprep.subr.bf16.mxu1 %v5244_v54  ;;  %v5624_v34 = vld [vmem:[%s7974_s2 + $0x150] sm:$0xff] }
 0xc38   :  { %v2430_v6 = vsel %vm2398_vm3, %v2380_v16, %v4032_v17  ;;  %v5625_v17 = vld [vmem:[%s7974_s2 + $0x160] sm:$0xff]  ;;  %vm8146_vm3 = vmmov %vm8145_vm8 }
 0xc39   :  { %v5525_v27 = vpop.eup %5524  ;;  %4639 = vmatmul.mubr.f32.gmra.mrb[84].mxu0 %v2430_v6  ;;  %v5626_v6 = vld [vmem:[%s7974_s2 + $0x170] sm:$0xff] }
 0xc3a   :  { %v4033_v37 = vadd.f32 -1.0, %v5525_v27  ;;  %v5627_v27 = vld [vmem:[%s7974_s2 + $0x180] sm:$0xff] }
 0xc3c   :  { %v2431_v45 = vsel %vm2399_vm12, %v2385_v53, %v4033_v37  ;;  %v2460_v53 = vld [vmem:[%s7974_s2 + $0x100] sm:$0xff]  ;;  %vm8147_vm12 = vmmov %vm8146_vm3  ;;  %v5628_v37 = vld [vmem:[%s7974_s2 + $0x190] sm:$0xff] }
 0xc3d   :  { %v5527_v31 = vpop.eup %5526  ;;  %4641 = vmatprep.mubr.f32.mxu0 %v2431_v45  ;;  %v5629_v45 = vld [vmem:[%s7974_s2 + $0x1a0] sm:$0xff] }
 0xc3e   :  { %v4034_v58 = vadd.f32 -1.0, %v5527_v31  ;;  %v5630_v31 = vld [vmem:[%s7974_s2 + $0x1b0] sm:$0xff] }
 0xc40   :  { %v2432_v15 = vsel %vm2400_vm13, %v2390_v48, %v4034_v58  ;;  %vm8148_vm13 = vmmov %vm8146_vm3  ;;  %v7761_v58 = vld [vmem:[%s7973_s0 + $0x110] sm:$0xff] }
 0xc41   :  { %4642 = vmatmul.mubr.f32.gmra.mrb[86].mxu0 %v2432_v15 }
 0xcfc   :  { %v4634_v56 = vpop.f32.mrb[80].mxu0 }
 0xcfd   :  { %v2530_v29 = vpop.f32.mrb[81].mxu0 }
 0xcfe   :  { %v7630_v14 = vpack.c.bf16 %v4634_v56, %v2530_v29  ;;  %4652 = vmatprep.mubr.msk.f32.mxu0 %vm8135_vm9, %v2530_v29 }
 0xcff   :  { %4653 = vmatmul.mubr.msk.f32.vlgmr.msra.gmra.mrb[88].mxu0 %vm8136_vm5, %v4634_v56 }
 0xd04   :  { %v4637_v18 = vpop.f32.mrb[82].mxu0 }
 0xd05   :  { %v2540_v32 = vpop.f32.mrb[83].mxu0 }
 0xd06   :  { %v7634_v51 = vpack.c.bf16 %v4637_v18, %v2540_v32  ;;  %4655 = vmatprep.mubr.msk.f32.mxu0 %vm8137_vm4, %v2540_v32  ;;  %vm63_vm4 = vcmp.gt.f32.partialorder %v7761_v58, 0.0  ;;  %v7772_v32 = vld [vmem:[%s7973_s0 + $0x130] sm:$0xff] }
 0xd07   :  { %4656 = vmatmul.mubr.msk.f32.gmra.mrb[90].mxu0 %vm8138_vm6, %v4637_v18 }
 0xd0c   :  { %v4640_v57 = vpop.f32.mrb[84].mxu0 }
 0xd0d   :  { %v2550_v42 = vpop.f32.mrb[85].mxu0 }
 0xd0e   :  { %v7638_v11 = vpack.c.bf16 %v4640_v57, %v2550_v42  ;;  %4658 = vmatprep.mubr.msk.f32.mxu0 %vm8139_vm7, %v2550_v42  ;;  %vm62_vm7 = vcmp.gt.f32.partialorder %v7766_v0, 0.0 }
 0xd0f   :  { %4659 = vmatmul.mubr.msk.f32.gmra.mrb[92].mxu0 %vm8140_vm0, %v4640_v57 }
 0xd14   :  { %v4643_v35 = vpop.f32.mrb[86].mxu0 }
 0xd15   :  { %v2560_v19 = vpop.f32.mrb[87].mxu0 }
 0xd16   :  { %v7642_v43 = vpack.c.bf16 %v4643_v35, %v2560_v19  ;;  %4661 = vmatprep.mubr.msk.f32.mxu0 %vm8141_vm10, %v2560_v19 }
 0xd17   :  { %4662 = vmatmul.mubr.msk.f32.gmra.mrb[94].mxu0 %vm8142_vm1, %v4643_v35  ;;  %vm65_vm1 = vcmp.gt.f32.partialorder %v7772_v32, 0.0 }
 0xd18   :  { %4694 = vmatprep.mubr.msk.f32.mxu0 %vm8143_vm11, %v7193_v10  ;;  %v5252_v10 = vpack.c.bf16 %v7239_v1, %v7231_v46 }
 0xdd2   :  { %v7650_v9 = vpop.f32.mrb[88].mxu0 }
 0xdd3   :  { %v7652_v8 = vpop.f32.mrb[89].mxu0 }
 0xdd4   :  { %4666 = vmatprep.mubr.msk.f32.mxu1 %vm2698_vm14, %v7652_v8 }
 0xdd5   :  { %4667 = vmatmul.mubr.msk.f32.vlgmr.msra.gmra.mrb[80].mxu1 %vm2698_vm14, %v7650_v9 }
 0xdd6   :  { %5247 = vmatpush3.bf16.msra.mxu1 %v5244_v54  ;;  %v7780_v54 = vld [vmem:[%s7973_s0 + $0x120] sm:$0xff] }
 0xdd7   :  { %5249 = vmatprep.subr.bf16.mxu1 %v5248_v40 }
 0xdda   :  { %5251 = vmatpush3.bf16.msra.mxu1 %v5248_v40  ;;  %v7662_v59 = vpop.f32.mrb[90].mxu0 }
 0xddb   :  { %v7664_v62 = vpop.f32.mrb[91].mxu0  ;;  %5253 = vmatprep.subr.bf16.mxu1 %v5252_v10 }
 0xddc   :  { %4669 = vmatprep.mubr.msk.f32.mxu1 %vm2698_vm14, %v7664_v62 }
 0xddd   :  { %4670 = vmatmul.mubr.msk.f32.gmra.mrb[82].mxu1 %vm2698_vm14, %v7662_v59 }
 0xdde   :  { %5255 = vmatpush3.bf16.msra.mxu1 %v5252_v10 }
 0xddf   :  { %5257 = vmatprep.subr.bf16.mxu1 %v5256_v7 }
 0xde2   :  { %5259 = vmatpush3.bf16.msra.mxu1 %v5256_v7  ;;  %v7672_v36 = vpop.f32.mrb[92].mxu0 }
 0xde3   :  { %5261 = vmatprep.subr.bf16.mxu1 %v7630_v14  ;;  %v7675_v46 = vpop.f32.mrb[93].mxu0 }
 0xde4   :  { %4672 = vmatprep.mubr.msk.f32.mxu1 %vm2698_vm14, %v7675_v46 }
 0xde5   :  { %4673 = vmatmul.mubr.msk.f32.gmra.mrb[84].mxu1 %vm2698_vm14, %v7672_v36 }
 0xdea   :  { %v7681_v1 = vpop.f32.mrb[94].mxu0 }
 0xdeb   :  { %v2689_v3 = vpop.f32.mrb[95].mxu0 }
 0xdec   :  { %4675 = vmatprep.mubr.msk.f32.mxu1 %vm2698_vm14, %v2689_v3 }
 0xded   :  { %4676 = vmatmul.mubr.msk.f32.gmra.mrb[86].mxu1 %vm2698_vm14, %v7681_v1 }
 0xea8   :  { %v4668_v55 = vpop.f32.mrb[80].mxu1 }
 0xea9   :  { %v2833_v47 = vmul.f32 %v4668_v55, %v2457_v12  ;;  %v2793_v30 = vpop.f32.mrb[81].mxu1  ;;  %v7798_v12 = vld [vmem:[%s7973_s0 + $0x140] sm:$0xff] }
 0xeaa   :  { %v2832_v63 = vmul.f32 %v2793_v30, %v2456_v49 }
 0xeac   :  { %v5228_v16 = vpack.c.bf16 %v2833_v47, %v2832_v63 }
 0xeae   :  { %5229 = vmatprep.subr.bf16.mxu0 %v5228_v16 }
 0xeaf   :  { %5231 = vmatpush3.bf16.msra.mxu0 %v5228_v16  ;;  %v7807_v16 = vld [vmem:[%s7973_s0 + $0x170] sm:$0xff] }
 0xeb0   :  { %v4671_v44 = vpop.f32.mrb[82].mxu1 }
 0xeb1   :  { %v2835_v20 = vmul.f32 %v4671_v44, %v2459_v38  ;;  %v2803_v33 = vpop.f32.mrb[83].mxu1  ;;  %v7814_v44 = vld [vmem:[%s7973_s0 + $0x160] sm:$0xff] }
 0xeb2   :  { %v2834_v39 = vmul.f32 %v2803_v33, %v2458_v21 }
 0xeb4   :  { %v5232_v50 = vpack.c.bf16 %v2835_v20, %v2834_v39 }
 0xeb6   :  { %5233 = vmatprep.subr.bf16.mxu0 %v5232_v50 }
 0xeb7   :  { %5235 = vmatpush3.bf16.msra.mxu0 %v5232_v50 }
 0xeb8   :  { %v4674_v26 = vpop.f32.mrb[84].mxu1 }
 0xeb9   :  { %v2837_v25 = vmul.f32 %v4674_v26, %v2461_v61  ;;  %v2813_v4 = vpop.f32.mrb[85].mxu1 }
 0xeba   :  { %v2836_v2 = vmul.f32 %v2813_v4, %v2460_v53 }
 0xebc   :  { %v5236_v52 = vpack.c.bf16 %v2837_v25, %v2836_v2 }
 0xebe   :  { %5237 = vmatprep.subr.bf16.mxu0 %v5236_v52 }
 0xebf   :  { %5239 = vmatpush3.bf16.msra.mxu0 %v5236_v52 }
 0xec0   :  { %v4677_v48 = vpop.f32.mrb[86].mxu1 }
 0xec1   :  { %v2839_v41 = vmul.f32 %v4677_v48, %v2463_v23  ;;  %v2823_v60 = vpop.f32.mrb[87].mxu1 }
 0xec2   :  { %v2838_v13 = vmul.f32 %v2823_v60, %v2462_v22 }
 0xec4   :  { %v5240_v28 = vpack.c.bf16 %v2839_v41, %v2838_v13 }
 0xec6   :  { %5241 = vmatprep.subr.bf16.mxu0 %v5240_v28 }
 0xec7   :  { %5243 = vmatpush3.bf16.msra.mxu0 %v5240_v28 }
 0xec8   :  { %4706 = vmatprep.subr.msk.mxu0 %vm2723_vm2, %v2455_v24 }
 0xeca   :  { %4695 = vmatmul.mubr.msk.f32.vlgmr.msra.gmra.mrb[96].mxu0 %vm8144_vm15, %v5624_v34  ;;  %vm64_vm15 = vcmp.gt.f32.partialorder %v7780_v54, 0.0 }
 0xecb   :  { %4697 = vmatprep.mubr.msk.f32.mxu0 %vm8145_vm8, %v5625_v17  ;;  %4707 = vmatpush3.msk.msra.mxu0 %vm2723_vm2, %v2455_v24  ;;  %vm8149_vm2 = vmmov %vm8146_vm3 }
 0xecc   :  { %vm8150_vm9 = vmmov %vm8149_vm2 }
 0xecd   :  { %vm8151_vm10 = vmmov %vm8149_vm2 }
 0xece   :  { %4698 = vmatmul.mubr.msk.f32.gmra.mrb[98].mxu0 %vm8146_vm3, %v5626_v6  ;;  %vm8153_vm3 = vmmov %vm8149_vm2 }
 0xecf   :  { %4700 = vmatprep.mubr.msk.f32.mxu0 %vm8147_vm12, %v5627_v27 }
 0xed2   :  { %4701 = vmatmul.mubr.msk.f32.gmra.mrb[100].mxu0 %vm8148_vm13, %v5628_v37 }
 0xed3   :  { %4703 = vmatprep.mubr.msk.f32.mxu0 %vm8149_vm2, %v5629_v45 }
 0xed6   :  { %4704 = vmatmul.mubr.msk.f32.gmra.mrb[102].mxu0 %vm8150_vm9, %v5630_v31  ;;  %vm66_vm9 = vcmp.gt.f32.partialorder %v7798_v12, 0.0 }
 0xed7   :  { %4708 = vmatprep.mubr.msk.f32.mxu0 %vm2698_vm14, %v7652_v8 }
 0xeda   :  { %4709 = vmatmul.mubr.msk.f32.vlgmr.msra.gmra.mrb[96].mxu0 %vm2698_vm14, %v7650_v9 }
 0xedb   :  { %4711 = vmatprep.mubr.msk.f32.mxu0 %vm2698_vm14, %v7664_v62  ;;  %v7789_v62 = vld [vmem:[%s7973_s0 + $0x150] sm:$0xff] }
 0xedc   :  { %vm67_vm12 = vcmp.gt.f32.partialorder %v7789_v62, 0.0 }
 0xede   :  { %4712 = vmatmul.mubr.msk.f32.gmra.mrb[98].mxu0 %vm2698_vm14, %v7662_v59 }
 0xedf   :  { %4714 = vmatprep.mubr.msk.f32.mxu0 %vm2698_vm14, %v7675_v46 }
 0xee2   :  { %4715 = vmatmul.mubr.msk.f32.gmra.mrb[100].mxu0 %vm2698_vm14, %v7672_v36 }
 0xee3   :  { %4717 = vmatprep.mubr.msk.f32.mxu0 %vm2698_vm14, %v2689_v3 }
 0xee6   :  { %4718 = vmatmul.mubr.msk.f32.gmra.mrb[102].mxu0 %vm2698_vm14, %v7681_v1  ;;  %vm8152_vm14 = vmmov %vm8149_vm2 }
 0xfad   :  { %v4710_v15 = vpop.f32.mrb[96].mxu0 }
 0xfae   :  { %vm3054_vm5 = vcmp.gt.f32.partialorder %v4710_v15, 0.0  ;;  %v3062_v56 = vmul.f32 0.2, %v4710_v15  ;;  %v3014_v29 = vpop.f32.mrb[97].mxu0 }
 0xfaf   :  { %vm3053_vm6 = vcmp.gt.f32.partialorder %v3014_v29, 0.0  ;;  %v3061_v18 = vmul.f32 0.2, %v3014_v29 }
 0xfb0   :  { %v3070_v57 = vsel %vm3054_vm5, %v4710_v15, %v3062_v56 }
 0xfb1   :  { %v4713_v42 = vpop.f32.mrb[98].mxu0  ;;  %v3078_v35 = vsel %vm63_vm4, %v3070_v57, -1e+30  ;;  %v3069_v19 = vsel %vm3053_vm6, %v3014_v29, %v3061_v18  ;;  %vm8154_vm6 = vmmov %vm8149_vm2 }
 0xfb2   :  { %vm3056_vm0 = vcmp.gt.f32.partialorder %v4713_v42, 0.0  ;;  %v3064_v9 = vmul.f32 0.2, %v4713_v42  ;;  %v3024_v8 = vpop.f32.mrb[99].mxu0  ;;  %v3088_v40 = vsel %vm8151_vm10, %v3078_v35, -inf }
 0xfb3   :  { %vm3055_vm11 = vcmp.gt.f32.partialorder %v3024_v8, 0.0  ;;  %v3063_v10 = vmul.f32 0.2, %v3024_v8  ;;  %3089 = vmax.xlane.f32.xlu1 %v3088_v40  ;;  %v3077_v59 = vsel %vm62_vm7, %v3069_v19, -1e+30 }
 0xfb4   :  { %v3085_v7 = vsel %vm8152_vm14, %v3077_v59, -inf  ;;  %v3072_v36 = vsel %vm3056_vm0, %v4713_v42, %v3064_v9  ;;  %vm69_vm0 = vcmp.gt.f32.partialorder %v7807_v16, 0.0  ;;  %vm8155_vm14 = vmmov %vm8149_vm2 }
 0xfb5   :  { %3086 = vmax.xlane.f32.xlu0 %v3085_v7  ;;  %v4716_v46 = vpop.f32.mrb[100].mxu0  ;;  %v3080_v1 = vsel %vm65_vm1, %v3072_v36, -1e+30  ;;  %v3071_v3 = vsel %vm3055_vm11, %v3024_v8, %v3063_v10  ;;  %vm68_vm11 = vcmp.gt.f32.partialorder %v7814_v44, 0.0 }
 0xfb6   :  { %vm3058_vm8 = vcmp.gt.f32.partialorder %v4716_v46, 0.0  ;;  %v3066_v49 = vmul.f32 0.2, %v4716_v46  ;;  %v3034_v55 = vpop.f32.mrb[101].mxu0  ;;  %v3094_v47 = vsel %vm8153_vm3, %v3080_v1, -inf  ;;  %vm8157_vm3 = vmmov %vm8149_vm2 }
 0xfb7   :  { %vm3057_vm13 = vcmp.gt.f32.partialorder %v3034_v55, 0.0  ;;  %v3065_v30 = vmul.f32 0.2, %v3034_v55  ;;  %3095 = vmax.xlane.f32.xlu1 %v3094_v47  ;;  %v3079_v63 = vsel %vm64_vm15, %v3071_v3, -1e+30 }
 0xfb8   :  { %v3091_v38 = vsel %vm8149_vm2, %v3079_v63, -inf  ;;  %v3074_v21 = vsel %vm3058_vm8, %v4716_v46, %v3066_v49  ;;  %vm8156_vm8 = vmmov %vm8149_vm2 }
 0xfb9   :  { %3092 = vmax.xlane.f32.xlu0 %v3091_v38  ;;  %v4719_v20 = vpop.f32.mrb[102].mxu0  ;;  %v3082_v33 = vsel %vm67_vm12, %v3074_v21, -1e+30  ;;  %v3073_v39 = vsel %vm3057_vm13, %v3034_v55, %v3065_v30  ;;  %vm8158_vm13 = vmmov %vm8149_vm2 }
 0xfba   :  { %vm3060_vm5 = vcmp.gt.f32.partialorder %v4719_v20, 0.0  ;;  %v3068_v50 = vmul.f32 0.2, %v4719_v20  ;;  %v3044_v61 = vpop.f32.mrb[103].mxu0  ;;  %v3100_v53 = vsel %vm8154_vm6, %v3082_v33, -inf }
 0xfbb   :  { %vm3059_vm10 = vcmp.gt.f32.partialorder %v3044_v61, 0.0  ;;  %v3067_v26 = vmul.f32 0.2, %v3044_v61  ;;  %3101 = vmax.xlane.f32.xlu1 %v3100_v53  ;;  %v3081_v25 = vsel %vm66_vm9, %v3073_v39, -1e+30 }
 0xfbc   :  { %v3097_v4 = vsel %vm8155_vm14, %v3081_v25, -inf  ;;  %v3076_v2 = vsel %vm3060_vm5, %v4719_v20, %v3068_v50  ;;  %vm8159_vm5 = vmmov %vm8149_vm2 }
 0xfbd   :  { %3098 = vmax.xlane.f32.xlu0 %v3097_v4  ;;  %v3084_v52 = vsel %vm69_vm0, %v3076_v2, -1e+30  ;;  %v3075_v23 = vsel %vm3059_vm10, %v3044_v61, %v3067_v26 }
 0xfbe   :  { %v3106_v22 = vsel %vm8156_vm8, %v3084_v52, -inf  ;;  %v3083_v48 = vsel %vm68_vm11, %v3075_v23, -1e+30 }
 0xfbf   :  { %3107 = vmax.xlane.f32.xlu1 %v3106_v22  ;;  %v3103_v41 = vsel %vm8157_vm3, %v3083_v48, -inf }
 0xfc1   :  { %3104 = vmax.xlane.f32.xlu0 %v3103_v41 }
0x1040   :  { %v3090_v60 = vpop.xlane.xlu1 %3089 }
0x1041   :  { %v3110_v13 = vsub.f32 %v3078_v35, %v3090_v60 }
0x1042   :  { %v3087_v28 = vpop.xlane.xlu0 %3086 }
0x1043   :  { %v3119_v24 = vmul.f32 1.442695, %v3110_v13  ;;  %v3109_v34 = vsub.f32 %v3077_v59, %v3087_v28  ;;  %v5632_v13 = vmov 0.0|0.0   ;;  %v4077_v28 = vld [vmem:[%s7972_s1 + $0x250] ss:$0 sm:$0xff] }
0x1044   :  { %v3096_v17 = vpop.xlane.xlu1 %3095  ;;  %5276 = vmatprep.subr.bf16.mxu0 %v5632_v13 }
0x1045   :  { %v3117_v6 = vmul.f32 1.442695, %v3109_v34  ;;  %v3112_v27 = vsub.f32 %v3080_v1, %v3096_v17  ;;  %5528 = vpow2.f32 %v3119_v24 }
0x1046   :  { %v3093_v37 = vpop.xlane.xlu0 %3092 }
0x1047   :  { %5530 = vpow2.f32 %v3117_v6  ;;  %v3123_v45 = vmul.f32 1.442695, %v3112_v27  ;;  %v3111_v31 = vsub.f32 %v3079_v63, %v3093_v37 }
0x1048   :  { %v3102_v15 = vpop.xlane.xlu1 %3101 }
0x1049   :  { %v3121_v56 = vmul.f32 1.442695, %v3111_v31  ;;  %v3114_v29 = vsub.f32 %v3082_v33, %v3102_v15  ;;  %5532 = vpow2.f32 %v3123_v45 }
0x104a   :  { %v3099_v18 = vpop.xlane.xlu0 %3098 }
0x104b   :  { %5534 = vpow2.f32 %v3121_v56  ;;  %v3127_v57 = vmul.f32 1.442695, %v3114_v29  ;;  %v3113_v42 = vsub.f32 %v3081_v25, %v3099_v18  ;;  %v5634_v56 = vmov 1.0|1.0  }
0x104c   :  { %v3108_v35 = vpop.xlane.xlu1 %3107 }
0x104d   :  { %v3125_v19 = vmul.f32 1.442695, %v3113_v42  ;;  %v3116_v9 = vsub.f32 %v3084_v52, %v3108_v35  ;;  %5536 = vpow2.f32 %v3127_v57 }
0x104e   :  { %v3105_v8 = vpop.xlane.xlu0 %3104 }
0x104f   :  { %5538 = vpow2.f32 %v3125_v19  ;;  %v3131_v40 = vmul.f32 1.442695, %v3116_v9  ;;  %v3115_v10 = vsub.f32 %v3083_v48, %v3105_v8  ;;  %v5529_v59 = vpop.eup %5528 }
0x1050   :  { %v3134_v1 = vsel %vm63_vm4, %v5529_v59, 0.0  ;;  %vm8161_vm4 = vmmov %vm8149_vm2 }
0x1051   :  { %v5531_v7 = vpop.eup %5530  ;;  %v3129_v36 = vmul.f32 1.442695, %v3115_v10  ;;  %5540 = vpow2.f32 %v3131_v40 }
0x1052   :  { %v3133_v46 = vsel %vm62_vm7, %v5531_v7, 0.0  ;;  %vm8160_vm7 = vmmov %vm8149_vm2  ;;  %v3419_v7 = vld [vmem:[%s7973_s0 + $0x180] sm:$0xf] }
0x1053   :  { %5542 = vpow2.f32 %v3129_v36  ;;  %4736 = vmatprep.mubr.msk.f32.mxu1 %vm8158_vm13, %v3133_v46  ;;  %v5533_v3 = vpop.eup %5532  ;;  %vm5633_vm13 = vmmov 0   ;;  %v3589_v36 = vld [vmem:[%s7972_s1 + $0x258] sm:$0xff] }
0x1054   :  { %4737 = vmatmul.mubr.msk.f32.vlgmr.msra.gmra.mrb[88].mxu1 %vm8149_vm2, %v3134_v1  ;;  %v3136_v0 = vsel %vm65_vm1, %v5533_v3, 0.0  ;;  %vm8163_vm1 = vmmov %vm8149_vm2  ;;  %4792 = vmatprep.mubr.msk.f32.mxu0 %vm5633_vm13, %v8061_v5  ;;  %v3591_v3 = vld [vmem:[%s7972_s1 + $0x268] sm:$0xff] }
0x1055   :  { %v5535_v49 = vpop.eup %5534  ;;  %5263 = vmatpush3.bf16.msra.mxu1 %v7630_v14  ;;  %vm8166_vm6 = vmmov %vm8163_vm1 }
0x1056   :  { %5265 = vmatprep.subr.bf16.mxu1 %v7634_v51  ;;  %v3135_v55 = vsel %vm64_vm15, %v5535_v49, 0.0  ;;  %vm8162_vm15 = vmmov %vm8149_vm2  ;;  %v3592_v49 = vld [vmem:[%s7972_s1 + $0x270] sm:$0xff] }
0x1057   :  { %4739 = vmatprep.mubr.msk.f32.mxu1 %vm8159_vm5, %v3135_v55  ;;  %v5537_v47 = vpop.eup %5536 }
0x1058   :  { %4740 = vmatmul.mubr.msk.f32.gmra.mrb[90].mxu1 %vm8160_vm7, %v3136_v0  ;;  %v3138_v54 = vsel %vm67_vm12, %v5537_v47, 0.0  ;;  %vm8165_vm12 = vmmov %vm8163_vm1 }
0x1059   :  { %v5539_v58 = vpop.eup %5538  ;;  %5267 = vmatpush3.bf16.msra.mxu1 %v7634_v51 }
0x105a   :  { %5269 = vmatprep.subr.bf16.mxu1 %v7638_v11  ;;  %v3137_v14 = vsel %vm66_vm9, %v5539_v58, 0.0  ;;  %vm8164_vm9 = vmmov %vm8163_vm1 }
0x105b   :  { %4742 = vmatprep.mubr.msk.f32.mxu1 %vm8161_vm4, %v3137_v14  ;;  %v5541_v30 = vpop.eup %5540 }
0x105c   :  { %4743 = vmatmul.mubr.msk.f32.gmra.mrb[92].mxu1 %vm8162_vm15, %v3138_v54  ;;  %v3140_v12 = vsel %vm69_vm0, %v5541_v30, 0.0  ;;  %vm8167_vm0 = vmmov %vm8163_vm1 }
0x105d   :  { %v5543_v32 = vpop.eup %5542  ;;  %5271 = vmatpush3.bf16.msra.mxu1 %v7638_v11  ;;  %vm8168_vm10 = vmmov %vm8167_vm0 }
0x105e   :  { %5273 = vmatprep.subr.bf16.mxu1 %v7642_v43  ;;  %v3139_v51 = vsel %vm68_vm11, %v5543_v32, 0.0  ;;  %vm8169_vm11 = vmmov %vm8167_vm0 }
0x105f   :  { %4745 = vmatprep.mubr.msk.f32.mxu1 %vm8163_vm1, %v3139_v51  ;;  %vm8170_vm14 = vmmov %vm8167_vm0 }
0x1060   :  { %4746 = vmatmul.mubr.msk.f32.gmra.mrb[94].mxu1 %vm8164_vm9, %v3140_v12  ;;  %vm8171_vm8 = vmmov %vm8167_vm0 }
0x1061   :  { %5275 = vmatpush3.bf16.msra.mxu1 %v7642_v43  ;;  %vm8172_vm3 = vmmov %vm8167_vm0 }
0x1062   :  { %5288 = vmatprep.subr.bf16.mxu1 %v5632_v13 }
0x1127   :  { %v4738_v62 = vpop.f32.mrb[88].mxu1 }
0x1128   :  { %5544 = vrcp.f32 %v4738_v62  ;;  %v3231_v63 = vpop.f32.mrb[89].mxu1  ;;  %v3682_v62 = vld [vmem:[%s7972_s1 + $0x290] sm:$0xff] }
0x1129   :  { %5546 = vrcp.f32 %v3231_v63 }
0x112b   :  { %v4741_v38 = vpop.f32.mrb[90].mxu1 }
0x112c   :  { %5548 = vrcp.f32 %v4741_v38  ;;  %v3241_v11 = vpop.f32.mrb[91].mxu1  ;;  %v3683_v38 = vld [vmem:[%s7972_s1 + $0x298] sm:$0xff] }
0x112d   :  { %5550 = vrcp.f32 %v3241_v11  ;;  %v5310_v11 = vpack.c.bf16 %v3683_v38, %v3682_v62 }
0x112f   :  { %v4744_v21 = vpop.f32.mrb[92].mxu1 }
0x1130   :  { %5552 = vrcp.f32 %v4744_v21  ;;  %v3251_v44 = vpop.f32.mrb[93].mxu1  ;;  %v3762_v21 = vld [vmem:[%s7974_s2 + $0x5c0] sm:$0xff] }
0x1131   :  { %5554 = vrcp.f32 %v3251_v44  ;;  %v3763_v44 = vld [vmem:[%s7974_s2 + $0x5d0] sm:$0xff] }
0x1132   :  { %v5545_v20 = vpop.eup %5544 }
0x1133   :  { %v5547_v33 = vpop.eup %5546  ;;  %v4747_v16 = vpop.f32.mrb[94].mxu1  ;;  %v3279_v61 = vmul.f32 %v5545_v20, %v3134_v1  ;;  %v3764_v20 = vld [vmem:[%s7974_s2 + $0x5e0] sm:$0xff] }
0x1134   :  { %5556 = vrcp.f32 %v4747_v16  ;;  %v3261_v39 = vpop.f32.mrb[95].mxu1  ;;  %v3278_v50 = vmul.f32 %v5547_v33, %v3133_v46  ;;  %v3590_v46 = vld [vmem:[%s7972_s1 + $0x260] sm:$0xff]  ;;  %v5313_v33 = vpack.c.bf16 %v3763_v44, %v3762_v21  ;;  %v3765_v16 = vld [vmem:[%s7974_s2 + $0x5f0] sm:$0xff] }
0x1135   :  { %5558 = vrcp.f32 %v3261_v39  ;;  %v5301_v1 = vpack.c.bf16 %v3590_v46, %v3589_v36  ;;  %v5316_v39 = vpack.c.bf16 %v3765_v16, %v3764_v20 }
0x1136   :  { %v5549_v43 = vpop.eup %5548  ;;  %4764 = vmatprep.mubr.msk.f32.mxu1 %vm8165_vm12, %v3278_v50  ;;  %v3766_v50 = vld [vmem:[%s7974_s2 + $0x600] sm:$0xff] }
0x1137   :  { %v5551_v53 = vpop.eup %5550  ;;  %4765 = vmatmul.mubr.msk.f32.vlgmr.msra.gmra.mrb[96].mxu1 %vm8166_vm6, %v3279_v61  ;;  %v3281_v25 = vmul.f32 %v5549_v43, %v3136_v0  ;;  %v3767_v61 = vld [vmem:[%s7974_s2 + $0x610] sm:$0xff] }
0x1138   :  { %v3280_v26 = vmul.f32 %v5551_v53, %v3135_v55  ;;  %v5304_v55 = vpack.c.bf16 %v3592_v49, %v3591_v3  ;;  %v5319_v43 = vpack.c.bf16 %v3767_v61, %v3766_v50  ;;  %v4104_v53 = vld [vmem:[%s7972_s1 + $0x278] ss:$0 sm:$0xff] }
0x113a   :  { %v5553_v4 = vpop.eup %5552  ;;  %4767 = vmatprep.mubr.msk.f32.mxu1 %vm8167_vm0, %v3280_v26 }
0x113b   :  { %v5555_v2 = vpop.eup %5554  ;;  %4768 = vmatmul.mubr.msk.f32.gmra.mrb[98].mxu1 %vm8168_vm10, %v3281_v25  ;;  %v3283_v23 = vmul.f32 %v5553_v4, %v3138_v54 }
0x113c   :  { %v3282_v52 = vmul.f32 %v5555_v2, %v3137_v14 }
0x113e   :  { %v5557_v22 = vpop.eup %5556  ;;  %4770 = vmatprep.mubr.msk.f32.mxu1 %vm8169_vm11, %v3282_v52 }
0x113f   :  { %v5559_v48 = vpop.eup %5558  ;;  %4771 = vmatmul.mubr.msk.f32.gmra.mrb[100].mxu1 %vm8170_vm14, %v3283_v23  ;;  %v3285_v60 = vmul.f32 %v5557_v22, %v3140_v12  ;;  %vm8173_vm14 = vmmov %vm8172_vm3  ;;  %v3681_v12 = vld [vmem:[%s7972_s1 + $0x288] sm:$0xff] }
0x1140   :  { %v3284_v41 = vmul.f32 %v5559_v48, %v3139_v51  ;;  %v3680_v51 = vld [vmem:[%s7972_s1 + $0x280] sm:$0xff] }
0x1141   :  { %v5307_v63 = vpack.c.bf16 %v3681_v12, %v3680_v51 }
0x1142   :  { %4773 = vmatprep.mubr.msk.f32.mxu1 %vm8171_vm8, %v3284_v41  ;;  %vm8174_vm8 = vmmov %vm8172_vm3 }
0x1143   :  { %4774 = vmatmul.mubr.msk.f32.gmra.mrb[102].mxu1 %vm8172_vm3, %v3285_v60  ;;  %vm8175_vm3 = vcmask 261120  }
0x1144   :  { %4811 = vmatprep.mubr.msk.f32.mxu1 %vm5633_vm13, %v8061_v5 }
0x120a   :  { %v4766_v24 = vpop.f32.mrb[96].mxu1 }
0x120b   :  { %v3386_v34 = vadd.f32 %v4766_v24, %v4077_v28  ;;  %v3380_v17 = vpop.f32.mrb[97].mxu1 }
0x120c   :  { %v3381_v6 = vadd.f32 %v4077_v28, %v3380_v17 }
0x120d   :  { %vm3421_vm2 = vcmp.ne.f32.partialorder %v3386_v34, 0.0 }
0x120e   :  { %vm3420_vm5 = vcmp.ne.f32.partialorder %v3381_v6, 0.0  ;;  %v5277_v27 = vpack.c.bf16 %v3386_v34, %v3381_v6  ;;  %v4769_v37 = vpop.f32.mrb[98].mxu1  ;;  %v3769_v34 = vld [vmem:[%s7974_s2 + $0x630] sm:$0xff]  ;;  %v4106_v6 = vld [vmem:[%s7972_s1 + $0x2a0] ss:$0 sm:$0xff] }
0x120f   :  { %vm5289_vm7 = vmpackc.low %vm3421_vm2, %vm3420_vm5  ;;  %v3396_v45 = vadd.f32 %v4769_v37, %v4077_v28  ;;  %v3390_v31 = vpop.f32.mrb[99].mxu1 }
0x1210   :  { %v3391_v15 = vadd.f32 %v4077_v28, %v3390_v31  ;;  %5278 = vmatpush3.bf16.msra.mxu0 %v5277_v27  ;;  %5290 = vmatpush3.bf16.msk.msra.mxu1 %vm5289_vm7, %v5634_v56  ;;  %vm8176_vm2 = vmmov %vm8175_vm3  ;;  %vm3846_vm7 = vcmask 31744  }
0x1211   :  { %vm3423_vm4 = vcmp.ne.f32.partialorder %v3396_v45, 0.0  ;;  %5279 = vmatprep.subr.bf16.mxu0 %v5632_v13  ;;  %5291 = vmatprep.subr.bf16.mxu1 %v5632_v13  ;;  %vm8177_vm5 = vmmov %vm8174_vm8 }
0x1212   :  { %vm3422_vm15 = vcmp.ne.f32.partialorder %v3391_v15, 0.0  ;;  %v5280_v29 = vpack.c.bf16 %v3396_v45, %v3391_v15  ;;  %v4772_v18 = vpop.f32.mrb[100].mxu1 }
0x1213   :  { %vm5292_vm1 = vmpackc.low %vm3423_vm4, %vm3422_vm15  ;;  %v3406_v57 = vadd.f32 %v4772_v18, %v4077_v28  ;;  %v3400_v42 = vpop.f32.mrb[101].mxu1 }
0x1214   :  { %v3401_v35 = vadd.f32 %v4077_v28, %v3400_v42  ;;  %5281 = vmatpush3.bf16.msra.mxu0 %v5280_v29  ;;  %5293 = vmatpush3.bf16.msk.msra.mxu1 %vm5292_vm1, %v5634_v56  ;;  %v3845_v29 = vld [vmem:[%s7974_s2 + $0x650] sm:$0x3] }
0x1215   :  { %vm3425_vm9 = vcmp.ne.f32.partialorder %v3406_v57, 0.0  ;;  %5282 = vmatprep.subr.bf16.mxu0 %v5632_v13  ;;  %5294 = vmatprep.subr.bf16.mxu1 %v5632_v13 }
0x1216   :  { %vm3424_vm12 = vcmp.ne.f32.partialorder %v3401_v35, 0.0  ;;  %v5283_v19 = vpack.c.bf16 %v3406_v57, %v3401_v35  ;;  %v4775_v9 = vpop.f32.mrb[102].mxu1 }
0x1217   :  { %vm5295_vm6 = vmpackc.low %vm3425_vm9, %vm3424_vm12  ;;  %v3416_v8 = vadd.f32 %v4775_v9, %v4077_v28  ;;  %v3410_v40 = vpop.f32.mrb[103].mxu1 }
0x1218   :  { %v3411_v10 = vadd.f32 %v4077_v28, %v3410_v40  ;;  %5284 = vmatpush3.bf16.msra.mxu0 %v5283_v19  ;;  %5296 = vmatpush3.bf16.msk.msra.mxu1 %vm5295_vm6, %v5634_v56 }
0x1219   :  { %vm3427_vm0 = vcmp.ne.f32.partialorder %v3416_v8, 0.0  ;;  %5285 = vmatprep.subr.bf16.mxu0 %v5632_v13  ;;  %5297 = vmatprep.subr.bf16.mxu1 %v5632_v13 }
0x121a   :  { %vm3426_vm10 = vcmp.ne.f32.partialorder %v3411_v10, 0.0  ;;  %v5286_v59 = vpack.c.bf16 %v3416_v8, %v3411_v10 }
0x121b   :  { %vm5298_vm11 = vmpackc.low %vm3427_vm0, %vm3426_vm10 }
0x121c   :  { %5287 = vmatpush3.bf16.msra.mxu0 %v5286_v59  ;;  %5299 = vmatpush3.bf16.msk.msra.mxu1 %vm5298_vm11, %v5634_v56 }
0x121d   :  { %5300 = vmatprep.subr.bf16.mxu0 %v5632_v13  ;;  %5312 = vmatprep.subr.bf16.mxu1 %v5632_v13 }
0x121f   :  { %4812 = vmatmul.mubr.msk.f32.vlgmr.msra.gmra.mrb[104].mxu1 %vm8173_vm14, %v3419_v7  ;;  %4793 = vmatmul.mubr.msk.f32.vlgmr.msra.gmra.mrb[104].mxu0 %vm8174_vm8, %v3419_v7 }
0x1220   :  { %4822 = vmatprep.mubr.msk.f32.mxu0 %vm5633_vm13, %v8061_v5  ;;  %4852 = vmatprep.mubr.msk.f32.mxu1 %vm5633_vm13, %v8061_v5 }
0x1221   :  { %5302 = vmatpush3.bf16.msra.mxu0 %v5301_v1  ;;  %5314 = vmatpush3.bf16.msra.mxu1 %v5313_v33 }
0x1222   :  { %5303 = vmatprep.subr.bf16.mxu0 %v5632_v13  ;;  %5315 = vmatprep.subr.bf16.mxu1 %v5632_v13 }
0x1225   :  { %5305 = vmatpush3.bf16.msra.mxu0 %v5304_v55  ;;  %5317 = vmatpush3.bf16.msra.mxu1 %v5316_v39 }
0x1226   :  { %5306 = vmatprep.subr.bf16.mxu0 %v5632_v13  ;;  %5318 = vmatprep.subr.bf16.mxu1 %v5632_v13 }
0x1229   :  { %5320 = vmatpush3.bf16.msra.mxu1 %v5319_v43 }
0x122a   :  { %5321 = vmatprep.subr.bf16.mxu1 %v5632_v13 }
0x12f2   :  { %v3583_v0 = vpop.f32.mrb[104].mxu1  ;;  %v3513_v47 = vpop.f32.mrb[104].mxu0 }
0x12f3   :  { %v3584_v58 = vadd.f32 1e-10, %v3583_v0  ;;  %v4813_v14 = vpop.f32.mrb[105].mxu1  ;;  %v4794_v54 = vpop.f32.mrb[105].mxu0 }
0x12f5   :  { %5560 = vrcp.f32 %v3584_v58 }
0x12ff   :  { %v5561_v30 = vpop.eup %5560 }
0x1300   :  { %v3588_v32 = vmul.f32 %v5561_v30, %v3513_v47 }
0x1302   :  { %4823 = vmatmul.mubr.msk.f32.vlgmr.msra.gmra.mrb[106].mxu0 %vm8175_vm3, %v3588_v32 }
0x1303   :  { %4833 = vmatprep.mubr.msk.f32.mxu0 %vm5633_vm13, %v8061_v5  ;;  %5308 = vmatpush3.bf16.msra.mxu0 %v5307_v63 }
0x1304   :  { %5309 = vmatprep.subr.bf16.mxu0 %v5632_v13  ;;  %v3768_v13 = vld [vmem:[%s7974_s2 + $0x620] sm:$0xff] }
0x1305   :  { %v5322_v17 = vpack.c.bf16 %v3769_v34, %v3768_v13 }
0x1307   :  { %5311 = vmatpush3.bf16.msra.mxu0 %v5310_v11  ;;  %5323 = vmatpush3.bf16.msra.mxu1 %v5322_v17 }
0x1308   :  { %4855 = vmatprep.subr.mxu0 %v8061_v5 }
0x13d5   :  { %v3667_v26 = vpop.f32.mrb[106].mxu0 }
0x13d6   :  { %v3668_v25 = vadd.f32 %v4104_v53, %v3667_v26  ;;  %v4824_v4 = vpop.f32.mrb[107].mxu0 }
0x13d8   :  { %v3672_v2 = vmul.f32 0.044715, %v3668_v25  ;;  %v3671_v60 = vmul.f32 0.5, %v3668_v25 }
0x13da   :  { %v3673_v52 = vmul.f32 %v3672_v2, %v3668_v25 }
0x13dc   :  { %v3674_v23 = vmul.f32 %v3673_v52, %v3668_v25 }
0x13de   :  { %v3675_v22 = vadd.f32 %v3674_v23, %v3668_v25 }
0x13e0   :  { %v3676_v48 = vmul.f32 0.7978846, %v3675_v22 }
0x13e2   :  { %5562 = vtanh.f32 %v3676_v48 }
0x13ec   :  { %v5563_v41 = vpop.eup %5562 }
0x13ed   :  { %v3678_v28 = vadd.f32 1.0, %v5563_v41 }
0x13ef   :  { %v3679_v24 = vmul.f32 %v3678_v28, %v3671_v60 }
0x13f1   :  { %4834 = vmatmul.mubr.msk.f32.vlgmr.msra.gmra.mrb[108].mxu0 %vm8176_vm2, %v3679_v24 }
0x13f2   :  { %4857 = vmatprep.mubr.msk.f32.mxu0 %vm5633_vm13, %v8061_v5  ;;  %v3843_v5 = vld [vmem:[%s7974_s2 + $0x640] sm:$0xf]  ;;  %vm3850_vm13 = vcmask 1043456  }
0x14c4   :  { %v3758_v27 = vpop.f32.mrb[108].mxu0 }
0x14c5   :  { %v3759_v37 = vadd.f32 %v4106_v6, %v3758_v27  ;;  %v4835_v45 = vpop.f32.mrb[109].mxu0 }
0x14c7   :  { %4853 = vmatmul.mubr.msk.f32.vlgmr.msra.gmra.mrb[106].mxu1 %vm8177_vm5, %v3759_v37 }
0x159a   :  { %v3839_v31 = vpop.f32.mrb[106].mxu1 }
0x159b   :  { %v3844_v15 = vmul.f32 %v3843_v5, %v3839_v31  ;;  %v4854_v56 = vpop.f32.mrb[107].mxu1 }
0x159d   :  { %4856 = vmatpush3.msk.msra.mxu0 %vm3850_vm13, %v3844_v15 }
0x159e   :  { %4858 = vmatmul.mubr.msk.f32.vlgmr.msra.gmra.mrb[110].mxu0 %vm3846_vm7, %v3845_v29 }
0x1671   :  { %v3920_v18 = vpop.f32.mrb[110].mxu0 }
0x1672   :  { %3924 = vst [vmem:[%s7975_s3] sm:$0x3] %v3920_v18  ;;  %v4859_v57 = vpop.f32.mrb[111].mxu0 }

</bundles_post_ra>
